<compile_context>
chip_gen: v7x
topology: tpu7x:2x2x1
jax: 0.10.0
libtpu: 0.0.40
codegen_flags: <defaults>
</compile_context>

<pallas_src>
import functools

import jax
import jax.numpy as jnp
from jax.experimental import pallas as pl
from jax.experimental.pallas import tpu as pltpu


_VMEM_LIMIT = 32 * 1024 * 1024  # v7x-safe scoped-VMEM request (<= 64 MiB physical)


def _pick_row_tile(rows, row_width, channels, max_out_elems=64 * 1024):
    """Largest divisor t of `rows` whose (t*row_width, channels) output block is
    sublane-aligned (t*row_width % 8 == 0, or the full extent) and fits a modest
    per-block VMEM budget (keeps double-buffering healthy on v7x's 64 MiB)."""
    valid = [t for t in range(1, rows + 1)
             if rows % t == 0 and ((t * row_width) % 8 == 0 or t == rows)]
    fitting = [t for t in valid if t * row_width * channels <= max_out_elems]
    return max(fitting) if fitting else min(valid)


# ---------------------------------------------------------------------------
# Conv3x3 ("same" padding, stride 1) + bias + ReLU.
# The padded image stays resident in VMEM across row tiles; 9 shifted bf16
# matmuls accumulate into an f32 register accumulator; bias+ReLU in f32.
# ---------------------------------------------------------------------------
def _conv3x3_relu_kernel(xpad_ref, w_ref, b_ref, o_ref, *, th, wo, cin, cout):
    # xpad_ref: (1, H+2, W+2, Cin) f32  -- full padded image (block idx const over r)
    # w_ref:    (9, Cin, Cout)     bf16
    # b_ref:    (1, Cout)          f32
    # o_ref:    (1, th*W, Cout)    f32
    r0 = pl.program_id(1) * th
    acc = jnp.zeros((th * wo, cout), jnp.float32)
    for ky in range(3):
        for kx in range(3):
            tap = xpad_ref[0, pl.ds(r0 + ky, th), pl.ds(kx, wo), :]
            tap = tap.reshape(th * wo, cin).astype(jnp.bfloat16)
            acc = acc + jnp.dot(tap, w_ref[3 * ky + kx],
                                preferred_element_type=jnp.float32)
    acc = acc + b_ref[...]                                   # f32 bias on the VPU
    o_ref[0] = jnp.maximum(acc, 0.0).astype(o_ref.dtype)     # f32 ReLU


def conv3x3_relu(x, w, b):
    """x: (N, H, W, Cin) f32; w: (3, 3, Cin, Cout); b: (Cout,). -> (N, H, W, Cout) f32."""
    N, H, W, Cin = x.shape
    Cout = w.shape[-1]
    th = _pick_row_tile(H, W, Cout)
    num_rt = H // th

    xpad = jnp.pad(x.astype(jnp.float32), ((0, 0), (1, 1), (1, 1), (0, 0)))
    w9 = w.astype(jnp.bfloat16).reshape(9, Cin, Cout)        # bf16 weights for the MXU
    b2 = b.astype(jnp.float32).reshape(1, Cout)

    kernel = functools.partial(_conv3x3_relu_kernel, th=th, wo=W, cin=Cin, cout=Cout)
    out = pl.pallas_call(
        kernel,
        out_shape=jax.ShapeDtypeStruct((N, H * W, Cout), jnp.float32),
        grid=(N, num_rt),
        in_specs=[
            pl.BlockSpec((1, H + 2, W + 2, Cin), lambda n, r: (n, 0, 0, 0)),
            pl.BlockSpec((9, Cin, Cout), lambda n, r: (0, 0, 0)),
            pl.BlockSpec((1, Cout), lambda n, r: (0, 0)),
        ],
        out_specs=pl.BlockSpec((1, th * W, Cout), lambda n, r: (n, r, 0)),
        compiler_params=pltpu.CompilerParams(
            dimension_semantics=("parallel", "parallel"),
            vmem_limit_bytes=_VMEM_LIMIT),
    )(xpad, w9, b2)
    return out.reshape(N, H, W, Cout)


# ---------------------------------------------------------------------------
# MaxPool 2x2 stride 2, single-input kernel.
# Wrapper reshape (N,H,W,C)->(N,H,W/2,2C) is a free contiguous view: the width
# pair lives on the lane dim (static lane slices), the row pair on a leading
# dim (layout-preserving reshape + reduce).
# ---------------------------------------------------------------------------
def _maxpool2x2_kernel(x_ref, o_ref, *, pth, wo, c):
    # x_ref: (1, 2*pth, Wo, 2*C) f32 ; o_ref: (1, pth*Wo, C) f32
    v = x_ref[0]
    colmax = jnp.maximum(v[:, :, :c], v[:, :, c:])           # width-pair max (2*pth, Wo, C)
    colmax = colmax.reshape(pth, 2, wo, c)                   # split leading dim only
    m = jnp.max(colmax, axis=1)                              # row-pair max (pth, Wo, C)
    o_ref[0] = m.reshape(pth * wo, c)


def maxpool2x2(x):
    """x: (N, H, W, C) -> (N, H//2, W//2, C)."""
    N, H, W, C = x.shape
    Ho, Wo = H // 2, W // 2
    pth = _pick_row_tile(Ho, Wo, C)
    num_rt = Ho // pth

    xr = x.reshape(N, H, Wo, 2 * C)                          # free reshape, no HBM copy
    kernel = functools.partial(_maxpool2x2_kernel, pth=pth, wo=Wo, c=C)
    out = pl.pallas_call(
        kernel,
        out_shape=jax.ShapeDtypeStruct((N, Ho * Wo, C), jnp.float32),
        grid=(N, num_rt),
        in_specs=[pl.BlockSpec((1, 2 * pth, Wo, 2 * C), lambda n, r: (n, r, 0, 0))],
        out_specs=pl.BlockSpec((1, pth * Wo, C), lambda n, r: (n, r, 0)),
        compiler_params=pltpu.CompilerParams(
            dimension_semantics=("parallel", "parallel"),
            vmem_limit_bytes=_VMEM_LIMIT),
    )(xr)
    return out.reshape(N, Ho, Wo, C)


# ---------------------------------------------------------------------------
# MSE (torch.nn.MSELoss(): mean over all elements), gridded reduction.
# ---------------------------------------------------------------------------
def _mse_kernel(a_ref, b_ref, o_ref, *, inv_total):
    @pl.when(pl.program_id(0) == 0)
    def _init():
        o_ref[...] = jnp.zeros_like(o_ref)

    d = a_ref[...].astype(jnp.float32) - b_ref[...].astype(jnp.float32)
    o_ref[...] += jnp.sum(d * d, keepdims=True)

    @pl.when(pl.program_id(0) == pl.num_programs(0) - 1)
    def _fin():
        o_ref[...] = o_ref[...] * inv_total                  # global-count normalization


def _pick_mse_rows(rows, max_rows=2048):
    if rows <= max_rows:
        return rows
    for t in range(max_rows, 0, -1):
        if rows % t == 0 and t % 8 == 0:
            return t
    return rows


def mse(a, b):
    C = a.shape[-1]
    a2 = a.reshape(-1, C).astype(jnp.float32)
    b2 = b.reshape(-1, C).astype(jnp.float32)
    R = a2.shape[0]
    tr = _pick_mse_rows(R)
    kernel = functools.partial(_mse_kernel, inv_total=1.0 / float(R * C))
    out = pl.pallas_call(
        kernel,
        out_shape=jax.ShapeDtypeStruct((1, 1), jnp.float32),
        grid=(R // tr,),
        in_specs=[pl.BlockSpec((tr, C), lambda i: (i, 0)),
                  pl.BlockSpec((tr, C), lambda i: (i, 0))],
        out_specs=pl.BlockSpec((1, 1), lambda i: (0, 0)),
        compiler_params=pltpu.CompilerParams(
            dimension_semantics=("arbitrary",),
            vmem_limit_bytes=_VMEM_LIMIT),
    )(a2, b2)
    return out[0, 0]


# ---------------------------------------------------------------------------
# PerceptualLoss forward.
# ---------------------------------------------------------------------------
def init_params(key):
    # TODO(synk): pretrained VGG16 weights cannot be loaded here (no network/files);
    # deterministic random weights with identical shapes are used instead.
    shapes = [
        ("w1", (3, 3, 3, 64)), ("b1", (64,)),
        ("w2", (3, 3, 64, 64)), ("b2", (64,)),
        ("w3", (3, 3, 64, 128)), ("b3", (128,)),
        ("w4", (3, 3, 128, 128)), ("b4", (128,)),
    ]
    params = {}
    keys = jax.random.split(key, len(shapes))
    for k, (name, shp) in zip(keys, shapes):
        if name.startswith("w"):
            fan_in = shp[0] * shp[1] * shp[2]
            params[name] = (jax.random.normal(k, shp, jnp.float32)
                            * jnp.sqrt(2.0 / fan_in))
        else:
            params[name] = jax.random.normal(k, shp, jnp.float32) * 0.01
    return params


def perceptual_loss(y, y_, params):
    # layout: y, y_ are NCHW (N, 3, H, W) like the PyTorch module; convert to NHWC.
    ya = jnp.transpose(y, (0, 2, 3, 1)).astype(jnp.float32)
    yb = jnp.transpose(y_, (0, 2, 3, 1)).astype(jnp.float32)
    n = ya.shape[0]
    x = jnp.concatenate([ya, yb], axis=0)      # run both branches through VGG once

    # vgg16.features[0:4]
    f1 = conv3x3_relu(x, params["w1"], params["b1"])
    f1 = conv3x3_relu(f1, params["w2"], params["b2"])
    loss = mse(f1[:n], f1[n:])

    # vgg16.features[4:9] (reuses f1 — same weights as the [0:4] prefix)
    f2 = maxpool2x2(f1)
    f2 = conv3x3_relu(f2, params["w3"], params["b3"])
    f2 = conv3x3_relu(f2, params["w4"], params["b4"])
    loss = loss + mse(f2[:n], f2[n:])
    return loss


if __name__ == "__main__":
    key = jax.random.PRNGKey(0)
    k_y, k_y_, k_p = jax.random.split(key, 3)

    # Small shapes consistent with the module: batch=2, 3 input channels, 16x16 spatial.
    y = jax.random.normal(k_y, (2, 3, 16, 16), jnp.float32)
    y_ = jax.random.normal(k_y_, (2, 3, 16, 16), jnp.float32)
    params = init_params(k_p)

    loss_fn = jax.jit(functools.partial(perceptual_loss, params=params))
    loss = loss_fn(y, y_)
    jax.block_until_ready(loss)
    assert loss.shape == () and bool(jnp.isfinite(loss))
    print("KERNEL_OK")
</pallas_src>

<mosaic_0001>
module attributes {stable_mosaic.version = 11 : i64} {
  func.func @_conv3x3_relu_kernel(%arg0: i32, %arg1: i32, %arg2: memref<1x18x18x3xf32, #tpu.memory_space<vmem>>, %arg3: memref<9x3x64xbf16, #tpu.memory_space<vmem>>, %arg4: memref<1x64xf32, #tpu.memory_space<vmem>>, %arg5: memref<1x256x64xf32, #tpu.memory_space<vmem>>) attributes {dimension_semantics = [#tpu.dimension_semantics<parallel>, #tpu.dimension_semantics<parallel>], iteration_bounds = array<i64: 4, 1>, scalar_prefetch = 0 : i64, scratch_operands = 0 : i64, tpu.core_type = #tpu.core_type<tc>, window_params = [{transform_indices = @transform_0, window_bounds = array<i64: 1, 18, 18, 3>}, {pipeline_mode = #tpu.pipeline_mode<synchronous>, transform_indices = @transform_1, window_bounds = array<i64: 9, 3, 64>}, {pipeline_mode = #tpu.pipeline_mode<synchronous>, transform_indices = @transform_2, window_bounds = array<i64: 1, 64>}, {transform_indices = @transform_3, window_bounds = array<i64: 1, 256, 64>}]} {
    %c16_i32 = arith.constant 16 : i32
    %0 = arith.muli %arg1, %c16_i32 : i32
    %cst = arith.constant 0.000000e+00 : f32
    %1 = vector.broadcast %cst : f32 to vector<256x64xf32>
    %c0_i32 = arith.constant 0 : i32
    %2 = arith.addi %0, %c0_i32 : i32
    %c0 = arith.constant 0 : index
    %3 = arith.index_cast %2 : i32 to index
    %c0_0 = arith.constant 0 : index
    %c0_1 = arith.constant 0 : index
    %4 = vector.load %arg2[%c0, %3, %c0_0, %c0_1] : memref<1x18x18x3xf32, #tpu.memory_space<vmem>>, vector<1x16x16x3xf32>
    %5 = vector.shape_cast %4 : vector<1x16x16x3xf32> to vector<16x16x3xf32>
    %6 = vector.shape_cast %5 : vector<16x16x3xf32> to vector<256x3xf32>
    %7 = arith.truncf %6 : vector<256x3xf32> to vector<256x3xbf16>
    %c0_2 = arith.constant 0 : index
    %c0_3 = arith.constant 0 : index
    %c0_4 = arith.constant 0 : index
    %8 = vector.load %arg3[%c0_2, %c0_3, %c0_4] : memref<9x3x64xbf16, #tpu.memory_space<vmem>>, vector<1x3x64xbf16>
    %9 = vector.shape_cast %8 : vector<1x3x64xbf16> to vector<3x64xbf16>
    %cst_5 = arith.constant dense<0.000000e+00> : vector<256x64xf32>
    %10 = tpu.matmul %7, %9, %cst_5 {dimension_numbers = #tpu.dot_dimension_numbers<[1], [0], [0], [1], [0, 0, 1, 1], [], []>} : vector<256x3xbf16>, vector<3x64xbf16>, vector<256x64xf32> -> vector<256x64xf32>
    %11 = arith.addf %1, %10 : vector<256x64xf32>
    %c0_i32_6 = arith.constant 0 : i32
    %12 = arith.addi %0, %c0_i32_6 : i32
    %c0_7 = arith.constant 0 : index
    %13 = arith.index_cast %12 : i32 to index
    %c1 = arith.constant 1 : index
    %c0_8 = arith.constant 0 : index
    %14 = vector.load %arg2[%c0_7, %13, %c1, %c0_8] : memref<1x18x18x3xf32, #tpu.memory_space<vmem>>, vector<1x16x16x3xf32>
    %15 = vector.shape_cast %14 : vector<1x16x16x3xf32> to vector<16x16x3xf32>
    %16 = vector.shape_cast %15 : vector<16x16x3xf32> to vector<256x3xf32>
    %17 = arith.truncf %16 : vector<256x3xf32> to vector<256x3xbf16>
    %c1_9 = arith.constant 1 : index
    %c0_10 = arith.constant 0 : index
    %c0_11 = arith.constant 0 : index
    %18 = vector.load %arg3[%c1_9, %c0_10, %c0_11] : memref<9x3x64xbf16, #tpu.memory_space<vmem>>, vector<1x3x64xbf16>
    %19 = vector.shape_cast %18 : vector<1x3x64xbf16> to vector<3x64xbf16>
    %cst_12 = arith.constant dense<0.000000e+00> : vector<256x64xf32>
    %20 = tpu.matmul %17, %19, %cst_12 {dimension_numbers = #tpu.dot_dimension_numbers<[1], [0], [0], [1], [0, 0, 1, 1], [], []>} : vector<256x3xbf16>, vector<3x64xbf16>, vector<256x64xf32> -> vector<256x64xf32>
    %21 = arith.addf %11, %20 : vector<256x64xf32>
    %c0_i32_13 = arith.constant 0 : i32
    %22 = arith.addi %0, %c0_i32_13 : i32
    %c0_14 = arith.constant 0 : index
    %23 = arith.index_cast %22 : i32 to index
    %c2 = arith.constant 2 : index
    %c0_15 = arith.constant 0 : index
    %24 = vector.load %arg2[%c0_14, %23, %c2, %c0_15] : memref<1x18x18x3xf32, #tpu.memory_space<vmem>>, vector<1x16x16x3xf32>
    %25 = vector.shape_cast %24 : vector<1x16x16x3xf32> to vector<16x16x3xf32>
    %26 = vector.shape_cast %25 : vector<16x16x3xf32> to vector<256x3xf32>
    %27 = arith.truncf %26 : vector<256x3xf32> to vector<256x3xbf16>
    %c2_16 = arith.constant 2 : index
    %c0_17 = arith.constant 0 : index
    %c0_18 = arith.constant 0 : index
    %28 = vector.load %arg3[%c2_16, %c0_17, %c0_18] : memref<9x3x64xbf16, #tpu.memory_space<vmem>>, vector<1x3x64xbf16>
    %29 = vector.shape_cast %28 : vector<1x3x64xbf16> to vector<3x64xbf16>
    %cst_19 = arith.constant dense<0.000000e+00> : vector<256x64xf32>
    %30 = tpu.matmul %27, %29, %cst_19 {dimension_numbers = #tpu.dot_dimension_numbers<[1], [0], [0], [1], [0, 0, 1, 1], [], []>} : vector<256x3xbf16>, vector<3x64xbf16>, vector<256x64xf32> -> vector<256x64xf32>
    %31 = arith.addf %21, %30 : vector<256x64xf32>
    %c1_i32 = arith.constant 1 : i32
    %32 = arith.addi %0, %c1_i32 : i32
    %c0_20 = arith.constant 0 : index
    %33 = arith.index_cast %32 : i32 to index
    %c0_21 = arith.constant 0 : index
    %c0_22 = arith.constant 0 : index
    %34 = vector.load %arg2[%c0_20, %33, %c0_21, %c0_22] : memref<1x18x18x3xf32, #tpu.memory_space<vmem>>, vector<1x16x16x3xf32>
    %35 = vector.shape_cast %34 : vector<1x16x16x3xf32> to vector<16x16x3xf32>
    %36 = vector.shape_cast %35 : vector<16x16x3xf32> to vector<256x3xf32>
    %37 = arith.truncf %36 : vector<256x3xf32> to vector<256x3xbf16>
    %c3 = arith.constant 3 : index
    %c0_23 = arith.constant 0 : index
    %c0_24 = arith.constant 0 : index
    %38 = vector.load %arg3[%c3, %c0_23, %c0_24] : memref<9x3x64xbf16, #tpu.memory_space<vmem>>, vector<1x3x64xbf16>
    %39 = vector.shape_cast %38 : vector<1x3x64xbf16> to vector<3x64xbf16>
    %cst_25 = arith.constant dense<0.000000e+00> : vector<256x64xf32>
    %40 = tpu.matmul %37, %39, %cst_25 {dimension_numbers = #tpu.dot_dimension_numbers<[1], [0], [0], [1], [0, 0, 1, 1], [], []>} : vector<256x3xbf16>, vector<3x64xbf16>, vector<256x64xf32> -> vector<256x64xf32>
    %41 = arith.addf %31, %40 : vector<256x64xf32>
    %c1_i32_26 = arith.constant 1 : i32
    %42 = arith.addi %0, %c1_i32_26 : i32
    %c0_27 = arith.constant 0 : index
    %43 = arith.index_cast %42 : i32 to index
    %c1_28 = arith.constant 1 : index
    %c0_29 = arith.constant 0 : index
    %44 = vector.load %arg2[%c0_27, %43, %c1_28, %c0_29] : memref<1x18x18x3xf32, #tpu.memory_space<vmem>>, vector<1x16x16x3xf32>
    %45 = vector.shape_cast %44 : vector<1x16x16x3xf32> to vector<16x16x3xf32>
    %46 = vector.shape_cast %45 : vector<16x16x3xf32> to vector<256x3xf32>
    %47 = arith.truncf %46 : vector<256x3xf32> to vector<256x3xbf16>
    %c4 = arith.constant 4 : index
    %c0_30 = arith.constant 0 : index
    %c0_31 = arith.constant 0 : index
    %48 = vector.load %arg3[%c4, %c0_30, %c0_31] : memref<9x3x64xbf16, #tpu.memory_space<vmem>>, vector<1x3x64xbf16>
    %49 = vector.shape_cast %48 : vector<1x3x64xbf16> to vector<3x64xbf16>
    %cst_32 = arith.constant dense<0.000000e+00> : vector<256x64xf32>
    %50 = tpu.matmul %47, %49, %cst_32 {dimension_numbers = #tpu.dot_dimension_numbers<[1], [0], [0], [1], [0, 0, 1, 1], [], []>} : vector<256x3xbf16>, vector<3x64xbf16>, vector<256x64xf32> -> vector<256x64xf32>
    %51 = arith.addf %41, %50 : vector<256x64xf32>
    %c1_i32_33 = arith.constant 1 : i32
    %52 = arith.addi %0, %c1_i32_33 : i32
    %c0_34 = arith.constant 0 : index
    %53 = arith.index_cast %52 : i32 to index
    %c2_35 = arith.constant 2 : index
    %c0_36 = arith.constant 0 : index
    %54 = vector.load %arg2[%c0_34, %53, %c2_35, %c0_36] : memref<1x18x18x3xf32, #tpu.memory_space<vmem>>, vector<1x16x16x3xf32>
    %55 = vector.shape_cast %54 : vector<1x16x16x3xf32> to vector<16x16x3xf32>
    %56 = vector.shape_cast %55 : vector<16x16x3xf32> to vector<256x3xf32>
    %57 = arith.truncf %56 : vector<256x3xf32> to vector<256x3xbf16>
    %c5 = arith.constant 5 : index
    %c0_37 = arith.constant 0 : index
    %c0_38 = arith.constant 0 : index
    %58 = vector.load %arg3[%c5, %c0_37, %c0_38] : memref<9x3x64xbf16, #tpu.memory_space<vmem>>, vector<1x3x64xbf16>
    %59 = vector.shape_cast %58 : vector<1x3x64xbf16> to vector<3x64xbf16>
    %cst_39 = arith.constant dense<0.000000e+00> : vector<256x64xf32>
    %60 = tpu.matmul %57, %59, %cst_39 {dimension_numbers = #tpu.dot_dimension_numbers<[1], [0], [0], [1], [0, 0, 1, 1], [], []>} : vector<256x3xbf16>, vector<3x64xbf16>, vector<256x64xf32> -> vector<256x64xf32>
    %61 = arith.addf %51, %60 : vector<256x64xf32>
    %c2_i32 = arith.constant 2 : i32
    %62 = arith.addi %0, %c2_i32 : i32
    %c0_40 = arith.constant 0 : index
    %63 = arith.index_cast %62 : i32 to index
    %c0_41 = arith.constant 0 : index
    %c0_42 = arith.constant 0 : index
    %64 = vector.load %arg2[%c0_40, %63, %c0_41, %c0_42] : memref<1x18x18x3xf32, #tpu.memory_space<vmem>>, vector<1x16x16x3xf32>
    %65 = vector.shape_cast %64 : vector<1x16x16x3xf32> to vector<16x16x3xf32>
    %66 = vector.shape_cast %65 : vector<16x16x3xf32> to vector<256x3xf32>
    %67 = arith.truncf %66 : vector<256x3xf32> to vector<256x3xbf16>
    %c6 = arith.constant 6 : index
    %c0_43 = arith.constant 0 : index
    %c0_44 = arith.constant 0 : index
    %68 = vector.load %arg3[%c6, %c0_43, %c0_44] : memref<9x3x64xbf16, #tpu.memory_space<vmem>>, vector<1x3x64xbf16>
    %69 = vector.shape_cast %68 : vector<1x3x64xbf16> to vector<3x64xbf16>
    %cst_45 = arith.constant dense<0.000000e+00> : vector<256x64xf32>
    %70 = tpu.matmul %67, %69, %cst_45 {dimension_numbers = #tpu.dot_dimension_numbers<[1], [0], [0], [1], [0, 0, 1, 1], [], []>} : vector<256x3xbf16>, vector<3x64xbf16>, vector<256x64xf32> -> vector<256x64xf32>
    %71 = arith.addf %61, %70 : vector<256x64xf32>
    %c2_i32_46 = arith.constant 2 : i32
    %72 = arith.addi %0, %c2_i32_46 : i32
    %c0_47 = arith.constant 0 : index
    %73 = arith.index_cast %72 : i32 to index
    %c1_48 = arith.constant 1 : index
    %c0_49 = arith.constant 0 : index
    %74 = vector.load %arg2[%c0_47, %73, %c1_48, %c0_49] : memref<1x18x18x3xf32, #tpu.memory_space<vmem>>, vector<1x16x16x3xf32>
    %75 = vector.shape_cast %74 : vector<1x16x16x3xf32> to vector<16x16x3xf32>
    %76 = vector.shape_cast %75 : vector<16x16x3xf32> to vector<256x3xf32>
    %77 = arith.truncf %76 : vector<256x3xf32> to vector<256x3xbf16>
    %c7 = arith.constant 7 : index
    %c0_50 = arith.constant 0 : index
    %c0_51 = arith.constant 0 : index
    %78 = vector.load %arg3[%c7, %c0_50, %c0_51] : memref<9x3x64xbf16, #tpu.memory_space<vmem>>, vector<1x3x64xbf16>
    %79 = vector.shape_cast %78 : vector<1x3x64xbf16> to vector<3x64xbf16>
    %cst_52 = arith.constant dense<0.000000e+00> : vector<256x64xf32>
    %80 = tpu.matmul %77, %79, %cst_52 {dimension_numbers = #tpu.dot_dimension_numbers<[1], [0], [0], [1], [0, 0, 1, 1], [], []>} : vector<256x3xbf16>, vector<3x64xbf16>, vector<256x64xf32> -> vector<256x64xf32>
    %81 = arith.addf %71, %80 : vector<256x64xf32>
    %c2_i32_53 = arith.constant 2 : i32
    %82 = arith.addi %0, %c2_i32_53 : i32
    %c0_54 = arith.constant 0 : index
    %83 = arith.index_cast %82 : i32 to index
    %c2_55 = arith.constant 2 : index
    %c0_56 = arith.constant 0 : index
    %84 = vector.load %arg2[%c0_54, %83, %c2_55, %c0_56] : memref<1x18x18x3xf32, #tpu.memory_space<vmem>>, vector<1x16x16x3xf32>
    %85 = vector.shape_cast %84 : vector<1x16x16x3xf32> to vector<16x16x3xf32>
    %86 = vector.shape_cast %85 : vector<16x16x3xf32> to vector<256x3xf32>
    %87 = arith.truncf %86 : vector<256x3xf32> to vector<256x3xbf16>
    %c8 = arith.constant 8 : index
    %c0_57 = arith.constant 0 : index
    %c0_58 = arith.constant 0 : index
    %88 = vector.load %arg3[%c8, %c0_57, %c0_58] : memref<9x3x64xbf16, #tpu.memory_space<vmem>>, vector<1x3x64xbf16>
    %89 = vector.shape_cast %88 : vector<1x3x64xbf16> to vector<3x64xbf16>
    %cst_59 = arith.constant dense<0.000000e+00> : vector<256x64xf32>
    %90 = tpu.matmul %87, %89, %cst_59 {dimension_numbers = #tpu.dot_dimension_numbers<[1], [0], [0], [1], [0, 0, 1, 1], [], []>} : vector<256x3xbf16>, vector<3x64xbf16>, vector<256x64xf32> -> vector<256x64xf32>
    %91 = arith.addf %81, %90 : vector<256x64xf32>
    %c0_60 = arith.constant 0 : index
    %c0_61 = arith.constant 0 : index
    %92 = vector.load %arg4[%c0_60, %c0_61] : memref<1x64xf32, #tpu.memory_space<vmem>>, vector<1x64xf32>
    %93 = vector.broadcast %92 : vector<1x64xf32> to vector<256x64xf32>
    %94 = arith.addf %91, %93 : vector<256x64xf32>
    %cst_62 = arith.constant 0.000000e+00 : f32
    %95 = vector.broadcast %cst_62 : f32 to vector<256x64xf32>
    %96 = arith.maximumf %94, %95 : vector<256x64xf32>
    %c0_63 = arith.constant 0 : index
    %c0_64 = arith.constant 0 : index
    %c0_65 = arith.constant 0 : index
    %97 = vector.load %arg5[%c0_63, %c0_64, %c0_65] : memref<1x256x64xf32, #tpu.memory_space<vmem>>, vector<1x256x64xf32>
    %98 = vector.shape_cast %97 : vector<1x256x64xf32> to vector<256x64xf32>
    %99 = vector.shape_cast %96 : vector<256x64xf32> to vector<1x256x64xf32>
    tpu.vector_store %arg5[%c0_63, %c0_64, %c0_65], %99 {strides = array<i32>} : memref<1x256x64xf32, #tpu.memory_space<vmem>>, vector<1x256x64xf32>,
    return
  }
  func.func @transform_0(%arg0: i32, %arg1: i32) -> (i32, i32, i32, i32) {
    %c0_i32 = arith.constant 0 : i32
    %c0_i32_0 = arith.constant 0 : i32
    %c0_i32_1 = arith.constant 0 : i32
    %c0_i32_2 = arith.constant 0 : i32
    return %arg0, %c0_i32, %c0_i32_0, %c0_i32_1 : i32, i32, i32, i32
  }
  func.func @transform_1(%arg0: i32, %arg1: i32) -> (i32, i32, i32) {
    %c0_i32 = arith.constant 0 : i32
    %c0_i32_0 = arith.constant 0 : i32
    %c0_i32_1 = arith.constant 0 : i32
    %c0_i32_2 = arith.constant 0 : i32
    return %c0_i32, %c0_i32_0, %c0_i32_1 : i32, i32, i32
  }
  func.func @transform_2(%arg0: i32, %arg1: i32) -> (i32, i32) {
    %c0_i32 = arith.constant 0 : i32
    %c0_i32_0 = arith.constant 0 : i32
    %c0_i32_1 = arith.constant 0 : i32
    return %c0_i32, %c0_i32_0 : i32, i32
  }
  func.func @transform_3(%arg0: i32, %arg1: i32) -> (i32, i32, i32) {
    %c0_i32 = arith.constant 0 : i32
    %c0_i32_0 = arith.constant 0 : i32
    return %arg0, %arg1, %c0_i32 : i32, i32, i32
  }
}

module attributes {stable_mosaic.version = 11 : i64} {
  func.func @_conv3x3_relu_kernel(%arg0: i32, %arg1: i32, %arg2: memref<1x18x18x64xf32, #tpu.memory_space<vmem>>, %arg3: memref<9x64x64xbf16, #tpu.memory_space<vmem>>, %arg4: memref<1x64xf32, #tpu.memory_space<vmem>>, %arg5: memref<1x256x64xf32, #tpu.memory_space<vmem>>) attributes {dimension_semantics = [#tpu.dimension_semantics<parallel>, #tpu.dimension_semantics<parallel>], iteration_bounds = array<i64: 4, 1>, scalar_prefetch = 0 : i64, scratch_operands = 0 : i64, tpu.core_type = #tpu.core_type<tc>, window_params = [{transform_indices = @transform_0, window_bounds = array<i64: 1, 18, 18, 64>}, {pipeline_mode = #tpu.pipeline_mode<synchronous>, transform_indices = @transform_1, window_bounds = array<i64: 9, 64, 64>}, {pipeline_mode = #tpu.pipeline_mode<synchronous>, transform_indices = @transform_2, window_bounds = array<i64: 1, 64>}, {transform_indices = @transform_3, window_bounds = array<i64: 1, 256, 64>}]} {
    %c16_i32 = arith.constant 16 : i32
    %0 = arith.muli %arg1, %c16_i32 : i32
    %cst = arith.constant 0.000000e+00 : f32
    %1 = vector.broadcast %cst : f32 to vector<256x64xf32>
    %c0_i32 = arith.constant 0 : i32
    %2 = arith.addi %0, %c0_i32 : i32
    %c0 = arith.constant 0 : index
    %3 = arith.index_cast %2 : i32 to index
    %c0_0 = arith.constant 0 : index
    %c0_1 = arith.constant 0 : index
    %4 = vector.load %arg2[%c0, %3, %c0_0, %c0_1] : memref<1x18x18x64xf32, #tpu.memory_space<vmem>>, vector<1x16x16x64xf32>
    %5 = vector.shape_cast %4 : vector<1x16x16x64xf32> to vector<16x16x64xf32>
    %6 = vector.shape_cast %5 : vector<16x16x64xf32> to vector<256x64xf32>
    %7 = arith.truncf %6 : vector<256x64xf32> to vector<256x64xbf16>
    %c0_2 = arith.constant 0 : index
    %c0_3 = arith.constant 0 : index
    %c0_4 = arith.constant 0 : index
    %8 = vector.load %arg3[%c0_2, %c0_3, %c0_4] : memref<9x64x64xbf16, #tpu.memory_space<vmem>>, vector<1x64x64xbf16>
    %9 = vector.shape_cast %8 : vector<1x64x64xbf16> to vector<64x64xbf16>
    %cst_5 = arith.constant dense<0.000000e+00> : vector<256x64xf32>
    %10 = tpu.matmul %7, %9, %cst_5 {dimension_numbers = #tpu.dot_dimension_numbers<[1], [0], [0], [1], [0, 0, 1, 1], [], []>} : vector<256x64xbf16>, vector<64x64xbf16>, vector<256x64xf32> -> vector<256x64xf32>
    %11 = arith.addf %1, %10 : vector<256x64xf32>
    %c0_i32_6 = arith.constant 0 : i32
    %12 = arith.addi %0, %c0_i32_6 : i32
    %c0_7 = arith.constant 0 : index
    %13 = arith.index_cast %12 : i32 to index
    %c1 = arith.constant 1 : index
    %c0_8 = arith.constant 0 : index
    %14 = vector.load %arg2[%c0_7, %13, %c1, %c0_8] : memref<1x18x18x64xf32, #tpu.memory_space<vmem>>, vector<1x16x16x64xf32>
    %15 = vector.shape_cast %14 : vector<1x16x16x64xf32> to vector<16x16x64xf32>
    %16 = vector.shape_cast %15 : vector<16x16x64xf32> to vector<256x64xf32>
    %17 = arith.truncf %16 : vector<256x64xf32> to vector<256x64xbf16>
    %c1_9 = arith.constant 1 : index
    %c0_10 = arith.constant 0 : index
    %c0_11 = arith.constant 0 : index
    %18 = vector.load %arg3[%c1_9, %c0_10, %c0_11] : memref<9x64x64xbf16, #tpu.memory_space<vmem>>, vector<1x64x64xbf16>
    %19 = vector.shape_cast %18 : vector<1x64x64xbf16> to vector<64x64xbf16>
    %cst_12 = arith.constant dense<0.000000e+00> : vector<256x64xf32>
    %20 = tpu.matmul %17, %19, %cst_12 {dimension_numbers = #tpu.dot_dimension_numbers<[1], [0], [0], [1], [0, 0, 1, 1], [], []>} : vector<256x64xbf16>, vector<64x64xbf16>, vector<256x64xf32> -> vector<256x64xf32>
    %21 = arith.addf %11, %20 : vector<256x64xf32>
    %c0_i32_13 = arith.constant 0 : i32
    %22 = arith.addi %0, %c0_i32_13 : i32
    %c0_14 = arith.constant 0 : index
    %23 = arith.index_cast %22 : i32 to index
    %c2 = arith.constant 2 : index
    %c0_15 = arith.constant 0 : index
    %24 = vector.load %arg2[%c0_14, %23, %c2, %c0_15] : memref<1x18x18x64xf32, #tpu.memory_space<vmem>>, vector<1x16x16x64xf32>
    %25 = vector.shape_cast %24 : vector<1x16x16x64xf32> to vector<16x16x64xf32>
    %26 = vector.shape_cast %25 : vector<16x16x64xf32> to vector<256x64xf32>
    %27 = arith.truncf %26 : vector<256x64xf32> to vector<256x64xbf16>
    %c2_16 = arith.constant 2 : index
    %c0_17 = arith.constant 0 : index
    %c0_18 = arith.constant 0 : index
    %28 = vector.load %arg3[%c2_16, %c0_17, %c0_18] : memref<9x64x64xbf16, #tpu.memory_space<vmem>>, vector<1x64x64xbf16>
    %29 = vector.shape_cast %28 : vector<1x64x64xbf16> to vector<64x64xbf16>
    %cst_19 = arith.constant dense<0.000000e+00> : vector<256x64xf32>
    %30 = tpu.matmul %27, %29, %cst_19 {dimension_numbers = #tpu.dot_dimension_numbers<[1], [0], [0], [1], [0, 0, 1, 1], [], []>} : vector<256x64xbf16>, vector<64x64xbf16>, vector<256x64xf32> -> vector<256x64xf32>
    %31 = arith.addf %21, %30 : vector<256x64xf32>
    %c1_i32 = arith.constant 1 : i32
    %32 = arith.addi %0, %c1_i32 : i32
    %c0_20 = arith.constant 0 : index
    %33 = arith.index_cast %32 : i32 to index
    %c0_21 = arith.constant 0 : index
    %c0_22 = arith.constant 0 : index
    %34 = vector.load %arg2[%c0_20, %33, %c0_21, %c0_22] : memref<1x18x18x64xf32, #tpu.memory_space<vmem>>, vector<1x16x16x64xf32>
    %35 = vector.shape_cast %34 : vector<1x16x16x64xf32> to vector<16x16x64xf32>
    %36 = vector.shape_cast %35 : vector<16x16x64xf32> to vector<256x64xf32>
    %37 = arith.truncf %36 : vector<256x64xf32> to vector<256x64xbf16>
    %c3 = arith.constant 3 : index
    %c0_23 = arith.constant 0 : index
    %c0_24 = arith.constant 0 : index
    %38 = vector.load %arg3[%c3, %c0_23, %c0_24] : memref<9x64x64xbf16, #tpu.memory_space<vmem>>, vector<1x64x64xbf16>
    %39 = vector.shape_cast %38 : vector<1x64x64xbf16> to vector<64x64xbf16>
    %cst_25 = arith.constant dense<0.000000e+00> : vector<256x64xf32>
    %40 = tpu.matmul %37, %39, %cst_25 {dimension_numbers = #tpu.dot_dimension_numbers<[1], [0], [0], [1], [0, 0, 1, 1], [], []>} : vector<256x64xbf16>, vector<64x64xbf16>, vector<256x64xf32> -> vector<256x64xf32>
    %41 = arith.addf %31, %40 : vector<256x64xf32>
    %c1_i32_26 = arith.constant 1 : i32
    %42 = arith.addi %0, %c1_i32_26 : i32
    %c0_27 = arith.constant 0 : index
    %43 = arith.index_cast %42 : i32 to index
    %c1_28 = arith.constant 1 : index
    %c0_29 = arith.constant 0 : index
    %44 = vector.load %arg2[%c0_27, %43, %c1_28, %c0_29] : memref<1x18x18x64xf32, #tpu.memory_space<vmem>>, vector<1x16x16x64xf32>
    %45 = vector.shape_cast %44 : vector<1x16x16x64xf32> to vector<16x16x64xf32>
    %46 = vector.shape_cast %45 : vector<16x16x64xf32> to vector<256x64xf32>
    %47 = arith.truncf %46 : vector<256x64xf32> to vector<256x64xbf16>
    %c4 = arith.constant 4 : index
    %c0_30 = arith.constant 0 : index
    %c0_31 = arith.constant 0 : index
    %48 = vector.load %arg3[%c4, %c0_30, %c0_31] : memref<9x64x64xbf16, #tpu.memory_space<vmem>>, vector<1x64x64xbf16>
    %49 = vector.shape_cast %48 : vector<1x64x64xbf16> to vector<64x64xbf16>
    %cst_32 = arith.constant dense<0.000000e+00> : vector<256x64xf32>
    %50 = tpu.matmul %47, %49, %cst_32 {dimension_numbers = #tpu.dot_dimension_numbers<[1], [0], [0], [1], [0, 0, 1, 1], [], []>} : vector<256x64xbf16>, vector<64x64xbf16>, vector<256x64xf32> -> vector<256x64xf32>
    %51 = arith.addf %41, %50 : vector<256x64xf32>
    %c1_i32_33 = arith.constant 1 : i32
    %52 = arith.addi %0, %c1_i32_33 : i32
    %c0_34 = arith.constant 0 : index
    %53 = arith.index_cast %52 : i32 to index
    %c2_35 = arith.constant 2 : index
    %c0_36 = arith.constant 0 : index
    %54 = vector.load %arg2[%c0_34, %53, %c2_35, %c0_36] : memref<1x18x18x64xf32, #tpu.memory_space<vmem>>, vector<1x16x16x64xf32>
    %55 = vector.shape_cast %54 : vector<1x16x16x64xf32> to vector<16x16x64xf32>
    %56 = vector.shape_cast %55 : vector<16x16x64xf32> to vector<256x64xf32>
    %57 = arith.truncf %56 : vector<256x64xf32> to vector<256x64xbf16>
    %c5 = arith.constant 5 : index
    %c0_37 = arith.constant 0 : index
    %c0_38 = arith.constant 0 : index
    %58 = vector.load %arg3[%c5, %c0_37, %c0_38] : memref<9x64x64xbf16, #tpu.memory_space<vmem>>, vector<1x64x64xbf16>
    %59 = vector.shape_cast %58 : vector<1x64x64xbf16> to vector<64x64xbf16>
    %cst_39 = arith.constant dense<0.000000e+00> : vector<256x64xf32>
    %60 = tpu.matmul %57, %59, %cst_39 {dimension_numbers = #tpu.dot_dimension_numbers<[1], [0], [0], [1], [0, 0, 1, 1], [], []>} : vector<256x64xbf16>, vector<64x64xbf16>, vector<256x64xf32> -> vector<256x64xf32>
    %61 = arith.addf %51, %60 : vector<256x64xf32>
    %c2_i32 = arith.constant 2 : i32
    %62 = arith.addi %0, %c2_i32 : i32
    %c0_40 = arith.constant 0 : index
    %63 = arith.index_cast %62 : i32 to index
    %c0_41 = arith.constant 0 : index
    %c0_42 = arith.constant 0 : index
    %64 = vector.load %arg2[%c0_40, %63, %c0_41, %c0_42] : memref<1x18x18x64xf32, #tpu.memory_space<vmem>>, vector<1x16x16x64xf32>
    %65 = vector.shape_cast %64 : vector<1x16x16x64xf32> to vector<16x16x64xf32>
    %66 = vector.shape_cast %65 : vector<16x16x64xf32> to vector<256x64xf32>
    %67 = arith.truncf %66 : vector<256x64xf32> to vector<256x64xbf16>
    %c6 = arith.constant 6 : index
    %c0_43 = arith.constant 0 : index
    %c0_44 = arith.constant 0 : index
    %68 = vector.load %arg3[%c6, %c0_43, %c0_44] : memref<9x64x64xbf16, #tpu.memory_space<vmem>>, vector<1x64x64xbf16>
    %69 = vector.shape_cast %68 : vector<1x64x64xbf16> to vector<64x64xbf16>
    %cst_45 = arith.constant dense<0.000000e+00> : vector<256x64xf32>
    %70 = tpu.matmul %67, %69, %cst_45 {dimension_numbers = #tpu.dot_dimension_numbers<[1], [0], [0], [1], [0, 0, 1, 1], [], []>} : vector<256x64xbf16>, vector<64x64xbf16>, vector<256x64xf32> -> vector<256x64xf32>
    %71 = arith.addf %61, %70 : vector<256x64xf32>
    %c2_i32_46 = arith.constant 2 : i32
    %72 = arith.addi %0, %c2_i32_46 : i32
    %c0_47 = arith.constant 0 : index
    %73 = arith.index_cast %72 : i32 to index
    %c1_48 = arith.constant 1 : index
    %c0_49 = arith.constant 0 : index
    %74 = vector.load %arg2[%c0_47, %73, %c1_48, %c0_49] : memref<1x18x18x64xf32, #tpu.memory_space<vmem>>, vector<1x16x16x64xf32>
    %75 = vector.shape_cast %74 : vector<1x16x16x64xf32> to vector<16x16x64xf32>
    %76 = vector.shape_cast %75 : vector<16x16x64xf32> to vector<256x64xf32>
    %77 = arith.truncf %76 : vector<256x64xf32> to vector<256x64xbf16>
    %c7 = arith.constant 7 : index
    %c0_50 = arith.constant 0 : index
    %c0_51 = arith.constant 0 : index
    %78 = vector.load %arg3[%c7, %c0_50, %c0_51] : memref<9x64x64xbf16, #tpu.memory_space<vmem>>, vector<1x64x64xbf16>
    %79 = vector.shape_cast %78 : vector<1x64x64xbf16> to vector<64x64xbf16>
    %cst_52 = arith.constant dense<0.000000e+00> : vector<256x64xf32>
    %80 = tpu.matmul %77, %79, %cst_52 {dimension_numbers = #tpu.dot_dimension_numbers<[1], [0], [0], [1], [0, 0, 1, 1], [], []>} : vector<256x64xbf16>, vector<64x64xbf16>, vector<256x64xf32> -> vector<256x64xf32>
    %81 = arith.addf %71, %80 : vector<256x64xf32>
    %c2_i32_53 = arith.constant 2 : i32
    %82 = arith.addi %0, %c2_i32_53 : i32
    %c0_54 = arith.constant 0 : index
    %83 = arith.index_cast %82 : i32 to index
    %c2_55 = arith.constant 2 : index
    %c0_56 = arith.constant 0 : index
    %84 = vector.load %arg2[%c0_54, %83, %c2_55, %c0_56] : memref<1x18x18x64xf32, #tpu.memory_space<vmem>>, vector<1x16x16x64xf32>
    %85 = vector.shape_cast %84 : vector<1x16x16x64xf32> to vector<16x16x64xf32>
    %86 = vector.shape_cast %85 : vector<16x16x64xf32> to vector<256x64xf32>
    %87 = arith.truncf %86 : vector<256x64xf32> to vector<256x64xbf16>
    %c8 = arith.constant 8 : index
    %c0_57 = arith.constant 0 : index
    %c0_58 = arith.constant 0 : index
    %88 = vector.load %arg3[%c8, %c0_57, %c0_58] : memref<9x64x64xbf16, #tpu.memory_space<vmem>>, vector<1x64x64xbf16>
    %89 = vector.shape_cast %88 : vector<1x64x64xbf16> to vector<64x64xbf16>
    %cst_59 = arith.constant dense<0.000000e+00> : vector<256x64xf32>
    %90 = tpu.matmul %87, %89, %cst_59 {dimension_numbers = #tpu.dot_dimension_numbers<[1], [0], [0], [1], [0, 0, 1, 1], [], []>} : vector<256x64xbf16>, vector<64x64xbf16>, vector<256x64xf32> -> vector<256x64xf32>
    %91 = arith.addf %81, %90 : vector<256x64xf32>
    %c0_60 = arith.constant 0 : index
    %c0_61 = arith.constant 0 : index
    %92 = vector.load %arg4[%c0_60, %c0_61] : memref<1x64xf32, #tpu.memory_space<vmem>>, vector<1x64xf32>
    %93 = vector.broadcast %92 : vector<1x64xf32> to vector<256x64xf32>
    %94 = arith.addf %91, %93 : vector<256x64xf32>
    %cst_62 = arith.constant 0.000000e+00 : f32
    %95 = vector.broadcast %cst_62 : f32 to vector<256x64xf32>
    %96 = arith.maximumf %94, %95 : vector<256x64xf32>
    %c0_63 = arith.constant 0 : index
    %c0_64 = arith.constant 0 : index
    %c0_65 = arith.constant 0 : index
    %97 = vector.load %arg5[%c0_63, %c0_64, %c0_65] : memref<1x256x64xf32, #tpu.memory_space<vmem>>, vector<1x256x64xf32>
    %98 = vector.shape_cast %97 : vector<1x256x64xf32> to vector<256x64xf32>
    %99 = vector.shape_cast %96 : vector<256x64xf32> to vector<1x256x64xf32>
    tpu.vector_store %arg5[%c0_63, %c0_64, %c0_65], %99 {strides = array<i32>} : memref<1x256x64xf32, #tpu.memory_space<vmem>>, vector<1x256x64xf32>,
    return
  }
  func.func @transform_0(%arg0: i32, %arg1: i32) -> (i32, i32, i32, i32) {
    %c0_i32 = arith.constant 0 : i32
    %c0_i32_0 = arith.constant 0 : i32
    %c0_i32_1 = arith.constant 0 : i32
    %c0_i32_2 = arith.constant 0 : i32
    return %arg0, %c0_i32, %c0_i32_0, %c0_i32_1 : i32, i32, i32, i32
  }
  func.func @transform_1(%arg0: i32, %arg1: i32) -> (i32, i32, i32) {
    %c0_i32 = arith.constant 0 : i32
    %c0_i32_0 = arith.constant 0 : i32
    %c0_i32_1 = arith.constant 0 : i32
    %c0_i32_2 = arith.constant 0 : i32
    return %c0_i32, %c0_i32_0, %c0_i32_1 : i32, i32, i32
  }
  func.func @transform_2(%arg0: i32, %arg1: i32) -> (i32, i32) {
    %c0_i32 = arith.constant 0 : i32
    %c0_i32_0 = arith.constant 0 : i32
    %c0_i32_1 = arith.constant 0 : i32
    return %c0_i32, %c0_i32_0 : i32, i32
  }
  func.func @transform_3(%arg0: i32, %arg1: i32) -> (i32, i32, i32) {
    %c0_i32 = arith.constant 0 : i32
    %c0_i32_0 = arith.constant 0 : i32
    return %arg0, %arg1, %c0_i32 : i32, i32, i32
  }
}

module attributes {stable_mosaic.version = 11 : i64} {
  func.func @_maxpool2x2_kernel(%arg0: i32, %arg1: i32, %arg2: memref<1x16x8x128xf32, #tpu.memory_space<vmem>>, %arg3: memref<1x64x64xf32, #tpu.memory_space<vmem>>) attributes {dimension_semantics = [#tpu.dimension_semantics<parallel>, #tpu.dimension_semantics<parallel>], iteration_bounds = array<i64: 4, 1>, scalar_prefetch = 0 : i64, scratch_operands = 0 : i64, tpu.core_type = #tpu.core_type<tc>, window_params = [{transform_indices = @transform_0, window_bounds = array<i64: 1, 16, 8, 128>}, {transform_indices = @transform_1, window_bounds = array<i64: 1, 64, 64>}]} {
    %c0 = arith.constant 0 : index
    %c0_0 = arith.constant 0 : index
    %c0_1 = arith.constant 0 : index
    %c0_2 = arith.constant 0 : index
    %0 = vector.load %arg2[%c0, %c0_0, %c0_1, %c0_2] : memref<1x16x8x128xf32, #tpu.memory_space<vmem>>, vector<1x16x8x128xf32>
    %1 = vector.shape_cast %0 : vector<1x16x8x128xf32> to vector<16x8x128xf32>
    %2 = vector.extract_strided_slice %1 {offsets = [0, 0, 0], sizes = [16, 8, 64], strides = [1, 1, 1]} : vector<16x8x128xf32> to vector<16x8x64xf32>
    %3 = vector.extract_strided_slice %1 {offsets = [0, 0, 64], sizes = [16, 8, 64], strides = [1, 1, 1]} : vector<16x8x128xf32> to vector<16x8x64xf32>
    %4 = arith.maximumf %2, %3 : vector<16x8x64xf32>
    %5 = vector.shape_cast %4 : vector<16x8x64xf32> to vector<8x2x8x64xf32>
    %cst = arith.constant dense<0xFF800000> : vector<8x8x64xf32>
    %6 = vector.multi_reduction <maximumf>, %5, %cst [1] : vector<8x2x8x64xf32> to vector<8x8x64xf32>
    %7 = vector.shape_cast %6 : vector<8x8x64xf32> to vector<64x64xf32>
    %c0_3 = arith.constant 0 : index
    %c0_4 = arith.constant 0 : index
    %c0_5 = arith.constant 0 : index
    %8 = vector.load %arg3[%c0_3, %c0_4, %c0_5] : memref<1x64x64xf32, #tpu.memory_space<vmem>>, vector<1x64x64xf32>
    %9 = vector.shape_cast %8 : vector<1x64x64xf32> to vector<64x64xf32>
    %10 = vector.shape_cast %7 : vector<64x64xf32> to vector<1x64x64xf32>
    tpu.vector_store %arg3[%c0_3, %c0_4, %c0_5], %10 {strides = array<i32>} : memref<1x64x64xf32, #tpu.memory_space<vmem>>, vector<1x64x64xf32>,
    return
  }
  func.func @transform_0(%arg0: i32, %arg1: i32) -> (i32, i32, i32, i32) {
    %c0_i32 = arith.constant 0 : i32
    %c0_i32_0 = arith.constant 0 : i32
    %c0_i32_1 = arith.constant 0 : i32
    return %arg0, %arg1, %c0_i32, %c0_i32_0 : i32, i32, i32, i32
  }
  func.func @transform_1(%arg0: i32, %arg1: i32) -> (i32, i32, i32) {
    %c0_i32 = arith.constant 0 : i32
    %c0_i32_0 = arith.constant 0 : i32
    return %arg0, %arg1, %c0_i32 : i32, i32, i32
  }
}

module attributes {stable_mosaic.version = 11 : i64} {
  func.func @_mse_kernel(%arg0: i32, %arg1: memref<512x64xf32, #tpu.memory_space<vmem>>, %arg2: memref<512x64xf32, #tpu.memory_space<vmem>>, %arg3: memref<1x1xf32, #tpu.memory_space<vmem>>) attributes {dimension_semantics = [#tpu.dimension_semantics<arbitrary>], iteration_bounds = array<i64: 1>, scalar_prefetch = 0 : i64, scratch_operands = 0 : i64, tpu.core_type = #tpu.core_type<tc>, window_params = [{transform_indices = @transform_0, window_bounds = array<i64: 512, 64>}, {transform_indices = @transform_1, window_bounds = array<i64: 512, 64>}, {pipeline_mode = #tpu.pipeline_mode<synchronous>, transform_indices = @transform_2, window_bounds = array<i64: 1, 1>}]} {
    %c0_i32 = arith.constant 0 : i32
    %0 = arith.cmpi eq, %arg0, %c0_i32 : i32
    %1 = arith.extui %0 : i1 to i32
    %c0_i32_0 = arith.constant 0 : i32
    %2 = arith.cmpi ne, %1, %c0_i32_0 : i32
    scf.if %2 {
      %cst_10 = arith.constant 0.000000e+00 : f32
      %18 = vector.broadcast %cst_10 : f32 to vector<1x1xf32>
      %c0_11 = arith.constant 0 : index
      %c0_12 = arith.constant 0 : index
      %19 = vector.load %arg3[%c0_11, %c0_12] : memref<1x1xf32, #tpu.memory_space<vmem>>, vector<1x1xf32>
      tpu.vector_store %arg3[%c0_11, %c0_12], %18 {strides = array<i32>} : memref<1x1xf32, #tpu.memory_space<vmem>>, vector<1x1xf32>,
    } else {
    }
    %c0 = arith.constant 0 : index
    %c0_1 = arith.constant 0 : index
    %3 = vector.load %arg1[%c0, %c0_1] : memref<512x64xf32, #tpu.memory_space<vmem>>, vector<512x64xf32>
    %c0_2 = arith.constant 0 : index
    %c0_3 = arith.constant 0 : index
    %4 = vector.load %arg2[%c0_2, %c0_3] : memref<512x64xf32, #tpu.memory_space<vmem>>, vector<512x64xf32>
    %5 = arith.subf %3, %4 : vector<512x64xf32>
    %c0_4 = arith.constant 0 : index
    %c0_5 = arith.constant 0 : index
    %6 = vector.load %arg3[%c0_4, %c0_5] : memref<1x1xf32, #tpu.memory_space<vmem>>, vector<1x1xf32>
    %7 = arith.mulf %5, %5 : vector<512x64xf32>
    %8 = vector.shape_cast %7 : vector<512x64xf32> to vector<1x512x64xf32>
    %cst = arith.constant dense<0.000000e+00> : vector<1xf32>
    %9 = vector.multi_reduction <add>, %8, %cst [1, 2] : vector<1x512x64xf32> to vector<1xf32>
    %10 = vector.shape_cast %9 : vector<1xf32> to vector<1x1x1xf32>
    %11 = vector.extract %10[0, 0, 0] : f32 from vector<1x1x1xf32>
    %12 = vector.broadcast %11 : f32 to vector<1x1xf32>
    %13 = arith.addf %6, %12 : vector<1x1xf32>
    %c0_6 = arith.constant 0 : index
    %c0_7 = arith.constant 0 : index
    %14 = vector.load %arg3[%c0_6, %c0_7] : memref<1x1xf32, #tpu.memory_space<vmem>>, vector<1x1xf32>
    tpu.vector_store %arg3[%c0_6, %c0_7], %13 {strides = array<i32>} : memref<1x1xf32, #tpu.memory_space<vmem>>, vector<1x1xf32>,
    %c0_i32_8 = arith.constant 0 : i32
    %15 = arith.cmpi eq, %arg0, %c0_i32_8 : i32
    %16 = arith.extui %15 : i1 to i32
    %c0_i32_9 = arith.constant 0 : i32
    %17 = arith.cmpi ne, %16, %c0_i32_9 : i32
    scf.if %17 {
      %c0_10 = arith.constant 0 : index
      %c0_11 = arith.constant 0 : index
      %18 = vector.load %arg3[%c0_10, %c0_11] : memref<1x1xf32, #tpu.memory_space<vmem>>, vector<1x1xf32>
      %cst_12 = arith.constant 3.05175781E-5 : f32
      %19 = vector.broadcast %cst_12 : f32 to vector<1x1xf32>
      %20 = arith.mulf %18, %19 : vector<1x1xf32>
      %c0_13 = arith.constant 0 : index
      %c0_14 = arith.constant 0 : index
      %21 = vector.load %arg3[%c0_13, %c0_14] : memref<1x1xf32, #tpu.memory_space<vmem>>, vector<1x1xf32>
      tpu.vector_store %arg3[%c0_13, %c0_14], %20 {strides = array<i32>} : memref<1x1xf32, #tpu.memory_space<vmem>>, vector<1x1xf32>,
    } else {
    }
    return
  }
  func.func @transform_0(%arg0: i32) -> (i32, i32) {
    %c0_i32 = arith.constant 0 : i32
    %c0_i32_0 = arith.constant 0 : i32
    return %arg0, %c0_i32 : i32, i32
  }
  func.func @transform_1(%arg0: i32) -> (i32, i32) {
    %c0_i32 = arith.constant 0 : i32
    %c0_i32_0 = arith.constant 0 : i32
    return %arg0, %c0_i32 : i32, i32
  }
  func.func @transform_2(%arg0: i32) -> (i32, i32) {
    %c0_i32 = arith.constant 0 : i32
    %c0_i32_0 = arith.constant 0 : i32
    %c0_i32_1 = arith.constant 0 : i32
    return %c0_i32, %c0_i32_0 : i32, i32
  }
}

module attributes {stable_mosaic.version = 11 : i64} {
  func.func @_conv3x3_relu_kernel(%arg0: i32, %arg1: i32, %arg2: memref<1x10x10x64xf32, #tpu.memory_space<vmem>>, %arg3: memref<9x64x128xbf16, #tpu.memory_space<vmem>>, %arg4: memref<1x128xf32, #tpu.memory_space<vmem>>, %arg5: memref<1x64x128xf32, #tpu.memory_space<vmem>>) attributes {dimension_semantics = [#tpu.dimension_semantics<parallel>, #tpu.dimension_semantics<parallel>], iteration_bounds = array<i64: 4, 1>, scalar_prefetch = 0 : i64, scratch_operands = 0 : i64, tpu.core_type = #tpu.core_type<tc>, window_params = [{transform_indices = @transform_0, window_bounds = array<i64: 1, 10, 10, 64>}, {pipeline_mode = #tpu.pipeline_mode<synchronous>, transform_indices = @transform_1, window_bounds = array<i64: 9, 64, 128>}, {pipeline_mode = #tpu.pipeline_mode<synchronous>, transform_indices = @transform_2, window_bounds = array<i64: 1, 128>}, {transform_indices = @transform_3, window_bounds = array<i64: 1, 64, 128>}]} {
    %c8_i32 = arith.constant 8 : i32
    %0 = arith.muli %arg1, %c8_i32 : i32
    %cst = arith.constant 0.000000e+00 : f32
    %1 = vector.broadcast %cst : f32 to vector<64x128xf32>
    %c0_i32 = arith.constant 0 : i32
    %2 = arith.addi %0, %c0_i32 : i32
    %c0 = arith.constant 0 : index
    %3 = arith.index_cast %2 : i32 to index
    %c0_0 = arith.constant 0 : index
    %c0_1 = arith.constant 0 : index
    %4 = vector.load %arg2[%c0, %3, %c0_0, %c0_1] : memref<1x10x10x64xf32, #tpu.memory_space<vmem>>, vector<1x8x8x64xf32>
    %5 = vector.shape_cast %4 : vector<1x8x8x64xf32> to vector<8x8x64xf32>
    %6 = vector.shape_cast %5 : vector<8x8x64xf32> to vector<64x64xf32>
    %7 = arith.truncf %6 : vector<64x64xf32> to vector<64x64xbf16>
    %c0_2 = arith.constant 0 : index
    %c0_3 = arith.constant 0 : index
    %c0_4 = arith.constant 0 : index
    %8 = vector.load %arg3[%c0_2, %c0_3, %c0_4] : memref<9x64x128xbf16, #tpu.memory_space<vmem>>, vector<1x64x128xbf16>
    %9 = vector.shape_cast %8 : vector<1x64x128xbf16> to vector<64x128xbf16>
    %cst_5 = arith.constant dense<0.000000e+00> : vector<64x128xf32>
    %10 = tpu.matmul %7, %9, %cst_5 {dimension_numbers = #tpu.dot_dimension_numbers<[1], [0], [0], [1], [0, 0, 1, 1], [], []>} : vector<64x64xbf16>, vector<64x128xbf16>, vector<64x128xf32> -> vector<64x128xf32>
    %11 = arith.addf %1, %10 : vector<64x128xf32>
    %c0_i32_6 = arith.constant 0 : i32
    %12 = arith.addi %0, %c0_i32_6 : i32
    %c0_7 = arith.constant 0 : index
    %13 = arith.index_cast %12 : i32 to index
    %c1 = arith.constant 1 : index
    %c0_8 = arith.constant 0 : index
    %14 = vector.load %arg2[%c0_7, %13, %c1, %c0_8] : memref<1x10x10x64xf32, #tpu.memory_space<vmem>>, vector<1x8x8x64xf32>
    %15 = vector.shape_cast %14 : vector<1x8x8x64xf32> to vector<8x8x64xf32>
    %16 = vector.shape_cast %15 : vector<8x8x64xf32> to vector<64x64xf32>
    %17 = arith.truncf %16 : vector<64x64xf32> to vector<64x64xbf16>
    %c1_9 = arith.constant 1 : index
    %c0_10 = arith.constant 0 : index
    %c0_11 = arith.constant 0 : index
    %18 = vector.load %arg3[%c1_9, %c0_10, %c0_11] : memref<9x64x128xbf16, #tpu.memory_space<vmem>>, vector<1x64x128xbf16>
    %19 = vector.shape_cast %18 : vector<1x64x128xbf16> to vector<64x128xbf16>
    %cst_12 = arith.constant dense<0.000000e+00> : vector<64x128xf32>
    %20 = tpu.matmul %17, %19, %cst_12 {dimension_numbers = #tpu.dot_dimension_numbers<[1], [0], [0], [1], [0, 0, 1, 1], [], []>} : vector<64x64xbf16>, vector<64x128xbf16>, vector<64x128xf32> -> vector<64x128xf32>
    %21 = arith.addf %11, %20 : vector<64x128xf32>
    %c0_i32_13 = arith.constant 0 : i32
    %22 = arith.addi %0, %c0_i32_13 : i32
    %c0_14 = arith.constant 0 : index
    %23 = arith.index_cast %22 : i32 to index
    %c2 = arith.constant 2 : index
    %c0_15 = arith.constant 0 : index
    %24 = vector.load %arg2[%c0_14, %23, %c2, %c0_15] : memref<1x10x10x64xf32, #tpu.memory_space<vmem>>, vector<1x8x8x64xf32>
    %25 = vector.shape_cast %24 : vector<1x8x8x64xf32> to vector<8x8x64xf32>
    %26 = vector.shape_cast %25 : vector<8x8x64xf32> to vector<64x64xf32>
    %27 = arith.truncf %26 : vector<64x64xf32> to vector<64x64xbf16>
    %c2_16 = arith.constant 2 : index
    %c0_17 = arith.constant 0 : index
    %c0_18 = arith.constant 0 : index
    %28 = vector.load %arg3[%c2_16, %c0_17, %c0_18] : memref<9x64x128xbf16, #tpu.memory_space<vmem>>, vector<1x64x128xbf16>
    %29 = vector.shape_cast %28 : vector<1x64x128xbf16> to vector<64x128xbf16>
    %cst_19 = arith.constant dense<0.000000e+00> : vector<64x128xf32>
    %30 = tpu.matmul %27, %29, %cst_19 {dimension_numbers = #tpu.dot_dimension_numbers<[1], [0], [0], [1], [0, 0, 1, 1], [], []>} : vector<64x64xbf16>, vector<64x128xbf16>, vector<64x128xf32> -> vector<64x128xf32>
    %31 = arith.addf %21, %30 : vector<64x128xf32>
    %c1_i32 = arith.constant 1 : i32
    %32 = arith.addi %0, %c1_i32 : i32
    %c0_20 = arith.constant 0 : index
    %33 = arith.index_cast %32 : i32 to index
    %c0_21 = arith.constant 0 : index
    %c0_22 = arith.constant 0 : index
    %34 = vector.load %arg2[%c0_20, %33, %c0_21, %c0_22] : memref<1x10x10x64xf32, #tpu.memory_space<vmem>>, vector<1x8x8x64xf32>
    %35 = vector.shape_cast %34 : vector<1x8x8x64xf32> to vector<8x8x64xf32>
    %36 = vector.shape_cast %35 : vector<8x8x64xf32> to vector<64x64xf32>
    %37 = arith.truncf %36 : vector<64x64xf32> to vector<64x64xbf16>
    %c3 = arith.constant 3 : index
    %c0_23 = arith.constant 0 : index
    %c0_24 = arith.constant 0 : index
    %38 = vector.load %arg3[%c3, %c0_23, %c0_24] : memref<9x64x128xbf16, #tpu.memory_space<vmem>>, vector<1x64x128xbf16>
    %39 = vector.shape_cast %38 : vector<1x64x128xbf16> to vector<64x128xbf16>
    %cst_25 = arith.constant dense<0.000000e+00> : vector<64x128xf32>
    %40 = tpu.matmul %37, %39, %cst_25 {dimension_numbers = #tpu.dot_dimension_numbers<[1], [0], [0], [1], [0, 0, 1, 1], [], []>} : vector<64x64xbf16>, vector<64x128xbf16>, vector<64x128xf32> -> vector<64x128xf32>
    %41 = arith.addf %31, %40 : vector<64x128xf32>
    %c1_i32_26 = arith.constant 1 : i32
    %42 = arith.addi %0, %c1_i32_26 : i32
    %c0_27 = arith.constant 0 : index
    %43 = arith.index_cast %42 : i32 to index
    %c1_28 = arith.constant 1 : index
    %c0_29 = arith.constant 0 : index
    %44 = vector.load %arg2[%c0_27, %43, %c1_28, %c0_29] : memref<1x10x10x64xf32, #tpu.memory_space<vmem>>, vector<1x8x8x64xf32>
    %45 = vector.shape_cast %44 : vector<1x8x8x64xf32> to vector<8x8x64xf32>
    %46 = vector.shape_cast %45 : vector<8x8x64xf32> to vector<64x64xf32>
    %47 = arith.truncf %46 : vector<64x64xf32> to vector<64x64xbf16>
    %c4 = arith.constant 4 : index
    %c0_30 = arith.constant 0 : index
    %c0_31 = arith.constant 0 : index
    %48 = vector.load %arg3[%c4, %c0_30, %c0_31] : memref<9x64x128xbf16, #tpu.memory_space<vmem>>, vector<1x64x128xbf16>
    %49 = vector.shape_cast %48 : vector<1x64x128xbf16> to vector<64x128xbf16>
    %cst_32 = arith.constant dense<0.000000e+00> : vector<64x128xf32>
    %50 = tpu.matmul %47, %49, %cst_32 {dimension_numbers = #tpu.dot_dimension_numbers<[1], [0], [0], [1], [0, 0, 1, 1], [], []>} : vector<64x64xbf16>, vector<64x128xbf16>, vector<64x128xf32> -> vector<64x128xf32>
    %51 = arith.addf %41, %50 : vector<64x128xf32>
    %c1_i32_33 = arith.constant 1 : i32
    %52 = arith.addi %0, %c1_i32_33 : i32
    %c0_34 = arith.constant 0 : index
    %53 = arith.index_cast %52 : i32 to index
    %c2_35 = arith.constant 2 : index
    %c0_36 = arith.constant 0 : index
    %54 = vector.load %arg2[%c0_34, %53, %c2_35, %c0_36] : memref<1x10x10x64xf32, #tpu.memory_space<vmem>>, vector<1x8x8x64xf32>
    %55 = vector.shape_cast %54 : vector<1x8x8x64xf32> to vector<8x8x64xf32>
    %56 = vector.shape_cast %55 : vector<8x8x64xf32> to vector<64x64xf32>
    %57 = arith.truncf %56 : vector<64x64xf32> to vector<64x64xbf16>
    %c5 = arith.constant 5 : index
    %c0_37 = arith.constant 0 : index
    %c0_38 = arith.constant 0 : index
    %58 = vector.load %arg3[%c5, %c0_37, %c0_38] : memref<9x64x128xbf16, #tpu.memory_space<vmem>>, vector<1x64x128xbf16>
    %59 = vector.shape_cast %58 : vector<1x64x128xbf16> to vector<64x128xbf16>
    %cst_39 = arith.constant dense<0.000000e+00> : vector<64x128xf32>
    %60 = tpu.matmul %57, %59, %cst_39 {dimension_numbers = #tpu.dot_dimension_numbers<[1], [0], [0], [1], [0, 0, 1, 1], [], []>} : vector<64x64xbf16>, vector<64x128xbf16>, vector<64x128xf32> -> vector<64x128xf32>
    %61 = arith.addf %51, %60 : vector<64x128xf32>
    %c2_i32 = arith.constant 2 : i32
    %62 = arith.addi %0, %c2_i32 : i32
    %c0_40 = arith.constant 0 : index
    %63 = arith.index_cast %62 : i32 to index
    %c0_41 = arith.constant 0 : index
    %c0_42 = arith.constant 0 : index
    %64 = vector.load %arg2[%c0_40, %63, %c0_41, %c0_42] : memref<1x10x10x64xf32, #tpu.memory_space<vmem>>, vector<1x8x8x64xf32>
    %65 = vector.shape_cast %64 : vector<1x8x8x64xf32> to vector<8x8x64xf32>
    %66 = vector.shape_cast %65 : vector<8x8x64xf32> to vector<64x64xf32>
    %67 = arith.truncf %66 : vector<64x64xf32> to vector<64x64xbf16>
    %c6 = arith.constant 6 : index
    %c0_43 = arith.constant 0 : index
    %c0_44 = arith.constant 0 : index
    %68 = vector.load %arg3[%c6, %c0_43, %c0_44] : memref<9x64x128xbf16, #tpu.memory_space<vmem>>, vector<1x64x128xbf16>
    %69 = vector.shape_cast %68 : vector<1x64x128xbf16> to vector<64x128xbf16>
    %cst_45 = arith.constant dense<0.000000e+00> : vector<64x128xf32>
    %70 = tpu.matmul %67, %69, %cst_45 {dimension_numbers = #tpu.dot_dimension_numbers<[1], [0], [0], [1], [0, 0, 1, 1], [], []>} : vector<64x64xbf16>, vector<64x128xbf16>, vector<64x128xf32> -> vector<64x128xf32>
    %71 = arith.addf %61, %70 : vector<64x128xf32>
    %c2_i32_46 = arith.constant 2 : i32
    %72 = arith.addi %0, %c2_i32_46 : i32
    %c0_47 = arith.constant 0 : index
    %73 = arith.index_cast %72 : i32 to index
    %c1_48 = arith.constant 1 : index
    %c0_49 = arith.constant 0 : index
    %74 = vector.load %arg2[%c0_47, %73, %c1_48, %c0_49] : memref<1x10x10x64xf32, #tpu.memory_space<vmem>>, vector<1x8x8x64xf32>
    %75 = vector.shape_cast %74 : vector<1x8x8x64xf32> to vector<8x8x64xf32>
    %76 = vector.shape_cast %75 : vector<8x8x64xf32> to vector<64x64xf32>
    %77 = arith.truncf %76 : vector<64x64xf32> to vector<64x64xbf16>
    %c7 = arith.constant 7 : index
    %c0_50 = arith.constant 0 : index
    %c0_51 = arith.constant 0 : index
    %78 = vector.load %arg3[%c7, %c0_50, %c0_51] : memref<9x64x128xbf16, #tpu.memory_space<vmem>>, vector<1x64x128xbf16>
    %79 = vector.shape_cast %78 : vector<1x64x128xbf16> to vector<64x128xbf16>
    %cst_52 = arith.constant dense<0.000000e+00> : vector<64x128xf32>
    %80 = tpu.matmul %77, %79, %cst_52 {dimension_numbers = #tpu.dot_dimension_numbers<[1], [0], [0], [1], [0, 0, 1, 1], [], []>} : vector<64x64xbf16>, vector<64x128xbf16>, vector<64x128xf32> -> vector<64x128xf32>
    %81 = arith.addf %71, %80 : vector<64x128xf32>
    %c2_i32_53 = arith.constant 2 : i32
    %82 = arith.addi %0, %c2_i32_53 : i32
    %c0_54 = arith.constant 0 : index
    %83 = arith.index_cast %82 : i32 to index
    %c2_55 = arith.constant 2 : index
    %c0_56 = arith.constant 0 : index
    %84 = vector.load %arg2[%c0_54, %83, %c2_55, %c0_56] : memref<1x10x10x64xf32, #tpu.memory_space<vmem>>, vector<1x8x8x64xf32>
    %85 = vector.shape_cast %84 : vector<1x8x8x64xf32> to vector<8x8x64xf32>
    %86 = vector.shape_cast %85 : vector<8x8x64xf32> to vector<64x64xf32>
    %87 = arith.truncf %86 : vector<64x64xf32> to vector<64x64xbf16>
    %c8 = arith.constant 8 : index
    %c0_57 = arith.constant 0 : index
    %c0_58 = arith.constant 0 : index
    %88 = vector.load %arg3[%c8, %c0_57, %c0_58] : memref<9x64x128xbf16, #tpu.memory_space<vmem>>, vector<1x64x128xbf16>
    %89 = vector.shape_cast %88 : vector<1x64x128xbf16> to vector<64x128xbf16>
    %cst_59 = arith.constant dense<0.000000e+00> : vector<64x128xf32>
    %90 = tpu.matmul %87, %89, %cst_59 {dimension_numbers = #tpu.dot_dimension_numbers<[1], [0], [0], [1], [0, 0, 1, 1], [], []>} : vector<64x64xbf16>, vector<64x128xbf16>, vector<64x128xf32> -> vector<64x128xf32>
    %91 = arith.addf %81, %90 : vector<64x128xf32>
    %c0_60 = arith.constant 0 : index
    %c0_61 = arith.constant 0 : index
    %92 = vector.load %arg4[%c0_60, %c0_61] : memref<1x128xf32, #tpu.memory_space<vmem>>, vector<1x128xf32>
    %93 = vector.broadcast %92 : vector<1x128xf32> to vector<64x128xf32>
    %94 = arith.addf %91, %93 : vector<64x128xf32>
    %cst_62 = arith.constant 0.000000e+00 : f32
    %95 = vector.broadcast %cst_62 : f32 to vector<64x128xf32>
    %96 = arith.maximumf %94, %95 : vector<64x128xf32>
    %c0_63 = arith.constant 0 : index
    %c0_64 = arith.constant 0 : index
    %c0_65 = arith.constant 0 : index
    %97 = vector.load %arg5[%c0_63, %c0_64, %c0_65] : memref<1x64x128xf32, #tpu.memory_space<vmem>>, vector<1x64x128xf32>
    %98 = vector.shape_cast %97 : vector<1x64x128xf32> to vector<64x128xf32>
    %99 = vector.shape_cast %96 : vector<64x128xf32> to vector<1x64x128xf32>
    tpu.vector_store %arg5[%c0_63, %c0_64, %c0_65], %99 {strides = array<i32>} : memref<1x64x128xf32, #tpu.memory_space<vmem>>, vector<1x64x128xf32>,
    return
  }
  func.func @transform_0(%arg0: i32, %arg1: i32) -> (i32, i32, i32, i32) {
    %c0_i32 = arith.constant 0 : i32
    %c0_i32_0 = arith.constant 0 : i32
    %c0_i32_1 = arith.constant 0 : i32
    %c0_i32_2 = arith.constant 0 : i32
    return %arg0, %c0_i32, %c0_i32_0, %c0_i32_1 : i32, i32, i32, i32
  }
  func.func @transform_1(%arg0: i32, %arg1: i32) -> (i32, i32, i32) {
    %c0_i32 = arith.constant 0 : i32
    %c0_i32_0 = arith.constant 0 : i32
    %c0_i32_1 = arith.constant 0 : i32
    %c0_i32_2 = arith.constant 0 : i32
    return %c0_i32, %c0_i32_0, %c0_i32_1 : i32, i32, i32
  }
  func.func @transform_2(%arg0: i32, %arg1: i32) -> (i32, i32) {
    %c0_i32 = arith.constant 0 : i32
    %c0_i32_0 = arith.constant 0 : i32
    %c0_i32_1 = arith.constant 0 : i32
    return %c0_i32, %c0_i32_0 : i32, i32
  }
  func.func @transform_3(%arg0: i32, %arg1: i32) -> (i32, i32, i32) {
    %c0_i32 = arith.constant 0 : i32
    %c0_i32_0 = arith.constant 0 : i32
    return %arg0, %arg1, %c0_i32 : i32, i32, i32
  }
}

module attributes {stable_mosaic.version = 11 : i64} {
  func.func @_conv3x3_relu_kernel(%arg0: i32, %arg1: i32, %arg2: memref<1x10x10x128xf32, #tpu.memory_space<vmem>>, %arg3: memref<9x128x128xbf16, #tpu.memory_space<vmem>>, %arg4: memref<1x128xf32, #tpu.memory_space<vmem>>, %arg5: memref<1x64x128xf32, #tpu.memory_space<vmem>>) attributes {dimension_semantics = [#tpu.dimension_semantics<parallel>, #tpu.dimension_semantics<parallel>], iteration_bounds = array<i64: 4, 1>, scalar_prefetch = 0 : i64, scratch_operands = 0 : i64, tpu.core_type = #tpu.core_type<tc>, window_params = [{transform_indices = @transform_0, window_bounds = array<i64: 1, 10, 10, 128>}, {pipeline_mode = #tpu.pipeline_mode<synchronous>, transform_indices = @transform_1, window_bounds = array<i64: 9, 128, 128>}, {pipeline_mode = #tpu.pipeline_mode<synchronous>, transform_indices = @transform_2, window_bounds = array<i64: 1, 128>}, {transform_indices = @transform_3, window_bounds = array<i64: 1, 64, 128>}]} {
    %c8_i32 = arith.constant 8 : i32
    %0 = arith.muli %arg1, %c8_i32 : i32
    %cst = arith.constant 0.000000e+00 : f32
    %1 = vector.broadcast %cst : f32 to vector<64x128xf32>
    %c0_i32 = arith.constant 0 : i32
    %2 = arith.addi %0, %c0_i32 : i32
    %c0 = arith.constant 0 : index
    %3 = arith.index_cast %2 : i32 to index
    %c0_0 = arith.constant 0 : index
    %c0_1 = arith.constant 0 : index
    %4 = vector.load %arg2[%c0, %3, %c0_0, %c0_1] : memref<1x10x10x128xf32, #tpu.memory_space<vmem>>, vector<1x8x8x128xf32>
    %5 = vector.shape_cast %4 : vector<1x8x8x128xf32> to vector<8x8x128xf32>
    %6 = vector.shape_cast %5 : vector<8x8x128xf32> to vector<64x128xf32>
    %7 = arith.truncf %6 : vector<64x128xf32> to vector<64x128xbf16>
    %c0_2 = arith.constant 0 : index
    %c0_3 = arith.constant 0 : index
    %c0_4 = arith.constant 0 : index
    %8 = vector.load %arg3[%c0_2, %c0_3, %c0_4] : memref<9x128x128xbf16, #tpu.memory_space<vmem>>, vector<1x128x128xbf16>
    %9 = vector.shape_cast %8 : vector<1x128x128xbf16> to vector<128x128xbf16>
    %cst_5 = arith.constant dense<0.000000e+00> : vector<64x128xf32>
    %10 = tpu.matmul %7, %9, %cst_5 {dimension_numbers = #tpu.dot_dimension_numbers<[1], [0], [0], [1], [0, 0, 1, 1], [], []>} : vector<64x128xbf16>, vector<128x128xbf16>, vector<64x128xf32> -> vector<64x128xf32>
    %11 = arith.addf %1, %10 : vector<64x128xf32>
    %c0_i32_6 = arith.constant 0 : i32
    %12 = arith.addi %0, %c0_i32_6 : i32
    %c0_7 = arith.constant 0 : index
    %13 = arith.index_cast %12 : i32 to index
    %c1 = arith.constant 1 : index
    %c0_8 = arith.constant 0 : index
    %14 = vector.load %arg2[%c0_7, %13, %c1, %c0_8] : memref<1x10x10x128xf32, #tpu.memory_space<vmem>>, vector<1x8x8x128xf32>
    %15 = vector.shape_cast %14 : vector<1x8x8x128xf32> to vector<8x8x128xf32>
    %16 = vector.shape_cast %15 : vector<8x8x128xf32> to vector<64x128xf32>
    %17 = arith.truncf %16 : vector<64x128xf32> to vector<64x128xbf16>
    %c1_9 = arith.constant 1 : index
    %c0_10 = arith.constant 0 : index
    %c0_11 = arith.constant 0 : index
    %18 = vector.load %arg3[%c1_9, %c0_10, %c0_11] : memref<9x128x128xbf16, #tpu.memory_space<vmem>>, vector<1x128x128xbf16>
    %19 = vector.shape_cast %18 : vector<1x128x128xbf16> to vector<128x128xbf16>
    %cst_12 = arith.constant dense<0.000000e+00> : vector<64x128xf32>
    %20 = tpu.matmul %17, %19, %cst_12 {dimension_numbers = #tpu.dot_dimension_numbers<[1], [0], [0], [1], [0, 0, 1, 1], [], []>} : vector<64x128xbf16>, vector<128x128xbf16>, vector<64x128xf32> -> vector<64x128xf32>
    %21 = arith.addf %11, %20 : vector<64x128xf32>
    %c0_i32_13 = arith.constant 0 : i32
    %22 = arith.addi %0, %c0_i32_13 : i32
    %c0_14 = arith.constant 0 : index
    %23 = arith.index_cast %22 : i32 to index
    %c2 = arith.constant 2 : index
    %c0_15 = arith.constant 0 : index
    %24 = vector.load %arg2[%c0_14, %23, %c2, %c0_15] : memref<1x10x10x128xf32, #tpu.memory_space<vmem>>, vector<1x8x8x128xf32>
    %25 = vector.shape_cast %24 : vector<1x8x8x128xf32> to vector<8x8x128xf32>
    %26 = vector.shape_cast %25 : vector<8x8x128xf32> to vector<64x128xf32>
    %27 = arith.truncf %26 : vector<64x128xf32> to vector<64x128xbf16>
    %c2_16 = arith.constant 2 : index
    %c0_17 = arith.constant 0 : index
    %c0_18 = arith.constant 0 : index
    %28 = vector.load %arg3[%c2_16, %c0_17, %c0_18] : memref<9x128x128xbf16, #tpu.memory_space<vmem>>, vector<1x128x128xbf16>
    %29 = vector.shape_cast %28 : vector<1x128x128xbf16> to vector<128x128xbf16>
    %cst_19 = arith.constant dense<0.000000e+00> : vector<64x128xf32>
    %30 = tpu.matmul %27, %29, %cst_19 {dimension_numbers = #tpu.dot_dimension_numbers<[1], [0], [0], [1], [0, 0, 1, 1], [], []>} : vector<64x128xbf16>, vector<128x128xbf16>, vector<64x128xf32> -> vector<64x128xf32>
    %31 = arith.addf %21, %30 : vector<64x128xf32>
    %c1_i32 = arith.constant 1 : i32
    %32 = arith.addi %0, %c1_i32 : i32
    %c0_20 = arith.constant 0 : index
    %33 = arith.index_cast %32 : i32 to index
    %c0_21 = arith.constant 0 : index
    %c0_22 = arith.constant 0 : index
    %34 = vector.load %arg2[%c0_20, %33, %c0_21, %c0_22] : memref<1x10x10x128xf32, #tpu.memory_space<vmem>>, vector<1x8x8x128xf32>
    %35 = vector.shape_cast %34 : vector<1x8x8x128xf32> to vector<8x8x128xf32>
    %36 = vector.shape_cast %35 : vector<8x8x128xf32> to vector<64x128xf32>
    %37 = arith.truncf %36 : vector<64x128xf32> to vector<64x128xbf16>
    %c3 = arith.constant 3 : index
    %c0_23 = arith.constant 0 : index
    %c0_24 = arith.constant 0 : index
    %38 = vector.load %arg3[%c3, %c0_23, %c0_24] : memref<9x128x128xbf16, #tpu.memory_space<vmem>>, vector<1x128x128xbf16>
    %39 = vector.shape_cast %38 : vector<1x128x128xbf16> to vector<128x128xbf16>
    %cst_25 = arith.constant dense<0.000000e+00> : vector<64x128xf32>
    %40 = tpu.matmul %37, %39, %cst_25 {dimension_numbers = #tpu.dot_dimension_numbers<[1], [0], [0], [1], [0, 0, 1, 1], [], []>} : vector<64x128xbf16>, vector<128x128xbf16>, vector<64x128xf32> -> vector<64x128xf32>
    %41 = arith.addf %31, %40 : vector<64x128xf32>
    %c1_i32_26 = arith.constant 1 : i32
    %42 = arith.addi %0, %c1_i32_26 : i32
    %c0_27 = arith.constant 0 : index
    %43 = arith.index_cast %42 : i32 to index
    %c1_28 = arith.constant 1 : index
    %c0_29 = arith.constant 0 : index
    %44 = vector.load %arg2[%c0_27, %43, %c1_28, %c0_29] : memref<1x10x10x128xf32, #tpu.memory_space<vmem>>, vector<1x8x8x128xf32>
    %45 = vector.shape_cast %44 : vector<1x8x8x128xf32> to vector<8x8x128xf32>
    %46 = vector.shape_cast %45 : vector<8x8x128xf32> to vector<64x128xf32>
    %47 = arith.truncf %46 : vector<64x128xf32> to vector<64x128xbf16>
    %c4 = arith.constant 4 : index
    %c0_30 = arith.constant 0 : index
    %c0_31 = arith.constant 0 : index
    %48 = vector.load %arg3[%c4, %c0_30, %c0_31] : memref<9x128x128xbf16, #tpu.memory_space<vmem>>, vector<1x128x128xbf16>
    %49 = vector.shape_cast %48 : vector<1x128x128xbf16> to vector<128x128xbf16>
    %cst_32 = arith.constant dense<0.000000e+00> : vector<64x128xf32>
    %50 = tpu.matmul %47, %49, %cst_32 {dimension_numbers = #tpu.dot_dimension_numbers<[1], [0], [0], [1], [0, 0, 1, 1], [], []>} : vector<64x128xbf16>, vector<128x128xbf16>, vector<64x128xf32> -> vector<64x128xf32>
    %51 = arith.addf %41, %50 : vector<64x128xf32>
    %c1_i32_33 = arith.constant 1 : i32
    %52 = arith.addi %0, %c1_i32_33 : i32
    %c0_34 = arith.constant 0 : index
    %53 = arith.index_cast %52 : i32 to index
    %c2_35 = arith.constant 2 : index
    %c0_36 = arith.constant 0 : index
    %54 = vector.load %arg2[%c0_34, %53, %c2_35, %c0_36] : memref<1x10x10x128xf32, #tpu.memory_space<vmem>>, vector<1x8x8x128xf32>
    %55 = vector.shape_cast %54 : vector<1x8x8x128xf32> to vector<8x8x128xf32>
    %56 = vector.shape_cast %55 : vector<8x8x128xf32> to vector<64x128xf32>
    %57 = arith.truncf %56 : vector<64x128xf32> to vector<64x128xbf16>
    %c5 = arith.constant 5 : index
    %c0_37 = arith.constant 0 : index
    %c0_38 = arith.constant 0 : index
    %58 = vector.load %arg3[%c5, %c0_37, %c0_38] : memref<9x128x128xbf16, #tpu.memory_space<vmem>>, vector<1x128x128xbf16>
    %59 = vector.shape_cast %58 : vector<1x128x128xbf16> to vector<128x128xbf16>
    %cst_39 = arith.constant dense<0.000000e+00> : vector<64x128xf32>
    %60 = tpu.matmul %57, %59, %cst_39 {dimension_numbers = #tpu.dot_dimension_numbers<[1], [0], [0], [1], [0, 0, 1, 1], [], []>} : vector<64x128xbf16>, vector<128x128xbf16>, vector<64x128xf32> -> vector<64x128xf32>
    %61 = arith.addf %51, %60 : vector<64x128xf32>
    %c2_i32 = arith.constant 2 : i32
    %62 = arith.addi %0, %c2_i32 : i32
    %c0_40 = arith.constant 0 : index
    %63 = arith.index_cast %62 : i32 to index
    %c0_41 = arith.constant 0 : index
    %c0_42 = arith.constant 0 : index
    %64 = vector.load %arg2[%c0_40, %63, %c0_41, %c0_42] : memref<1x10x10x128xf32, #tpu.memory_space<vmem>>, vector<1x8x8x128xf32>
    %65 = vector.shape_cast %64 : vector<1x8x8x128xf32> to vector<8x8x128xf32>
    %66 = vector.shape_cast %65 : vector<8x8x128xf32> to vector<64x128xf32>
    %67 = arith.truncf %66 : vector<64x128xf32> to vector<64x128xbf16>
    %c6 = arith.constant 6 : index
    %c0_43 = arith.constant 0 : index
    %c0_44 = arith.constant 0 : index
    %68 = vector.load %arg3[%c6, %c0_43, %c0_44] : memref<9x128x128xbf16, #tpu.memory_space<vmem>>, vector<1x128x128xbf16>
    %69 = vector.shape_cast %68 : vector<1x128x128xbf16> to vector<128x128xbf16>
    %cst_45 = arith.constant dense<0.000000e+00> : vector<64x128xf32>
    %70 = tpu.matmul %67, %69, %cst_45 {dimension_numbers = #tpu.dot_dimension_numbers<[1], [0], [0], [1], [0, 0, 1, 1], [], []>} : vector<64x128xbf16>, vector<128x128xbf16>, vector<64x128xf32> -> vector<64x128xf32>
    %71 = arith.addf %61, %70 : vector<64x128xf32>
    %c2_i32_46 = arith.constant 2 : i32
    %72 = arith.addi %0, %c2_i32_46 : i32
    %c0_47 = arith.constant 0 : index
    %73 = arith.index_cast %72 : i32 to index
    %c1_48 = arith.constant 1 : index
    %c0_49 = arith.constant 0 : index
    %74 = vector.load %arg2[%c0_47, %73, %c1_48, %c0_49] : memref<1x10x10x128xf32, #tpu.memory_space<vmem>>, vector<1x8x8x128xf32>
    %75 = vector.shape_cast %74 : vector<1x8x8x128xf32> to vector<8x8x128xf32>
    %76 = vector.shape_cast %75 : vector<8x8x128xf32> to vector<64x128xf32>
    %77 = arith.truncf %76 : vector<64x128xf32> to vector<64x128xbf16>
    %c7 = arith.constant 7 : index
    %c0_50 = arith.constant 0 : index
    %c0_51 = arith.constant 0 : index
    %78 = vector.load %arg3[%c7, %c0_50, %c0_51] : memref<9x128x128xbf16, #tpu.memory_space<vmem>>, vector<1x128x128xbf16>
    %79 = vector.shape_cast %78 : vector<1x128x128xbf16> to vector<128x128xbf16>
    %cst_52 = arith.constant dense<0.000000e+00> : vector<64x128xf32>
    %80 = tpu.matmul %77, %79, %cst_52 {dimension_numbers = #tpu.dot_dimension_numbers<[1], [0], [0], [1], [0, 0, 1, 1], [], []>} : vector<64x128xbf16>, vector<128x128xbf16>, vector<64x128xf32> -> vector<64x128xf32>
    %81 = arith.addf %71, %80 : vector<64x128xf32>
    %c2_i32_53 = arith.constant 2 : i32
    %82 = arith.addi %0, %c2_i32_53 : i32
    %c0_54 = arith.constant 0 : index
    %83 = arith.index_cast %82 : i32 to index
    %c2_55 = arith.constant 2 : index
    %c0_56 = arith.constant 0 : index
    %84 = vector.load %arg2[%c0_54, %83, %c2_55, %c0_56] : memref<1x10x10x128xf32, #tpu.memory_space<vmem>>, vector<1x8x8x128xf32>
    %85 = vector.shape_cast %84 : vector<1x8x8x128xf32> to vector<8x8x128xf32>
    %86 = vector.shape_cast %85 : vector<8x8x128xf32> to vector<64x128xf32>
    %87 = arith.truncf %86 : vector<64x128xf32> to vector<64x128xbf16>
    %c8 = arith.constant 8 : index
    %c0_57 = arith.constant 0 : index
    %c0_58 = arith.constant 0 : index
    %88 = vector.load %arg3[%c8, %c0_57, %c0_58] : memref<9x128x128xbf16, #tpu.memory_space<vmem>>, vector<1x128x128xbf16>
    %89 = vector.shape_cast %88 : vector<1x128x128xbf16> to vector<128x128xbf16>
    %cst_59 = arith.constant dense<0.000000e+00> : vector<64x128xf32>
    %90 = tpu.matmul %87, %89, %cst_59 {dimension_numbers = #tpu.dot_dimension_numbers<[1], [0], [0], [1], [0, 0, 1, 1], [], []>} : vector<64x128xbf16>, vector<128x128xbf16>, vector<64x128xf32> -> vector<64x128xf32>
    %91 = arith.addf %81, %90 : vector<64x128xf32>
    %c0_60 = arith.constant 0 : index
    %c0_61 = arith.constant 0 : index
    %92 = vector.load %arg4[%c0_60, %c0_61] : memref<1x128xf32, #tpu.memory_space<vmem>>, vector<1x128xf32>
    %93 = vector.broadcast %92 : vector<1x128xf32> to vector<64x128xf32>
    %94 = arith.addf %91, %93 : vector<64x128xf32>
    %cst_62 = arith.constant 0.000000e+00 : f32
    %95 = vector.broadcast %cst_62 : f32 to vector<64x128xf32>
    %96 = arith.maximumf %94, %95 : vector<64x128xf32>
    %c0_63 = arith.constant 0 : index
    %c0_64 = arith.constant 0 : index
    %c0_65 = arith.constant 0 : index
    %97 = vector.load %arg5[%c0_63, %c0_64, %c0_65] : memref<1x64x128xf32, #tpu.memory_space<vmem>>, vector<1x64x128xf32>
    %98 = vector.shape_cast %97 : vector<1x64x128xf32> to vector<64x128xf32>
    %99 = vector.shape_cast %96 : vector<64x128xf32> to vector<1x64x128xf32>
    tpu.vector_store %arg5[%c0_63, %c0_64, %c0_65], %99 {strides = array<i32>} : memref<1x64x128xf32, #tpu.memory_space<vmem>>, vector<1x64x128xf32>,
    return
  }
  func.func @transform_0(%arg0: i32, %arg1: i32) -> (i32, i32, i32, i32) {
    %c0_i32 = arith.constant 0 : i32
    %c0_i32_0 = arith.constant 0 : i32
    %c0_i32_1 = arith.constant 0 : i32
    %c0_i32_2 = arith.constant 0 : i32
    return %arg0, %c0_i32, %c0_i32_0, %c0_i32_1 : i32, i32, i32, i32
  }
  func.func @transform_1(%arg0: i32, %arg1: i32) -> (i32, i32, i32) {
    %c0_i32 = arith.constant 0 : i32
    %c0_i32_0 = arith.constant 0 : i32
    %c0_i32_1 = arith.constant 0 : i32
    %c0_i32_2 = arith.constant 0 : i32
    return %c0_i32, %c0_i32_0, %c0_i32_1 : i32, i32, i32
  }
  func.func @transform_2(%arg0: i32, %arg1: i32) -> (i32, i32) {
    %c0_i32 = arith.constant 0 : i32
    %c0_i32_0 = arith.constant 0 : i32
    %c0_i32_1 = arith.constant 0 : i32
    return %c0_i32, %c0_i32_0 : i32, i32
  }
  func.func @transform_3(%arg0: i32, %arg1: i32) -> (i32, i32, i32) {
    %c0_i32 = arith.constant 0 : i32
    %c0_i32_0 = arith.constant 0 : i32
    return %arg0, %arg1, %c0_i32 : i32, i32, i32
  }
}

module attributes {stable_mosaic.version = 11 : i64} {
  func.func @_mse_kernel(%arg0: i32, %arg1: memref<128x128xf32, #tpu.memory_space<vmem>>, %arg2: memref<128x128xf32, #tpu.memory_space<vmem>>, %arg3: memref<1x1xf32, #tpu.memory_space<vmem>>) attributes {dimension_semantics = [#tpu.dimension_semantics<arbitrary>], iteration_bounds = array<i64: 1>, scalar_prefetch = 0 : i64, scratch_operands = 0 : i64, tpu.core_type = #tpu.core_type<tc>, window_params = [{transform_indices = @transform_0, window_bounds = array<i64: 128, 128>}, {transform_indices = @transform_1, window_bounds = array<i64: 128, 128>}, {pipeline_mode = #tpu.pipeline_mode<synchronous>, transform_indices = @transform_2, window_bounds = array<i64: 1, 1>}]} {
    %c0_i32 = arith.constant 0 : i32
    %0 = arith.cmpi eq, %arg0, %c0_i32 : i32
    %1 = arith.extui %0 : i1 to i32
    %c0_i32_0 = arith.constant 0 : i32
    %2 = arith.cmpi ne, %1, %c0_i32_0 : i32
    scf.if %2 {
      %cst_10 = arith.constant 0.000000e+00 : f32
      %18 = vector.broadcast %cst_10 : f32 to vector<1x1xf32>
      %c0_11 = arith.constant 0 : index
      %c0_12 = arith.constant 0 : index
      %19 = vector.load %arg3[%c0_11, %c0_12] : memref<1x1xf32, #tpu.memory_space<vmem>>, vector<1x1xf32>
      tpu.vector_store %arg3[%c0_11, %c0_12], %18 {strides = array<i32>} : memref<1x1xf32, #tpu.memory_space<vmem>>, vector<1x1xf32>,
    } else {
    }
    %c0 = arith.constant 0 : index
    %c0_1 = arith.constant 0 : index
    %3 = vector.load %arg1[%c0, %c0_1] : memref<128x128xf32, #tpu.memory_space<vmem>>, vector<128x128xf32>
    %c0_2 = arith.constant 0 : index
    %c0_3 = arith.constant 0 : index
    %4 = vector.load %arg2[%c0_2, %c0_3] : memref<128x128xf32, #tpu.memory_space<vmem>>, vector<128x128xf32>
    %5 = arith.subf %3, %4 : vector<128x128xf32>
    %c0_4 = arith.constant 0 : index
    %c0_5 = arith.constant 0 : index
    %6 = vector.load %arg3[%c0_4, %c0_5] : memref<1x1xf32, #tpu.memory_space<vmem>>, vector<1x1xf32>
    %7 = arith.mulf %5, %5 : vector<128x128xf32>
    %8 = vector.shape_cast %7 : vector<128x128xf32> to vector<1x128x128xf32>
    %cst = arith.constant dense<0.000000e+00> : vector<1xf32>
    %9 = vector.multi_reduction <add>, %8, %cst [1, 2] : vector<1x128x128xf32> to vector<1xf32>
    %10 = vector.shape_cast %9 : vector<1xf32> to vector<1x1x1xf32>
    %11 = vector.extract %10[0, 0, 0] : f32 from vector<1x1x1xf32>
    %12 = vector.broadcast %11 : f32 to vector<1x1xf32>
    %13 = arith.addf %6, %12 : vector<1x1xf32>
    %c0_6 = arith.constant 0 : index
    %c0_7 = arith.constant 0 : index
    %14 = vector.load %arg3[%c0_6, %c0_7] : memref<1x1xf32, #tpu.memory_space<vmem>>, vector<1x1xf32>
    tpu.vector_store %arg3[%c0_6, %c0_7], %13 {strides = array<i32>} : memref<1x1xf32, #tpu.memory_space<vmem>>, vector<1x1xf32>,
    %c0_i32_8 = arith.constant 0 : i32
    %15 = arith.cmpi eq, %arg0, %c0_i32_8 : i32
    %16 = arith.extui %15 : i1 to i32
    %c0_i32_9 = arith.constant 0 : i32
    %17 = arith.cmpi ne, %16, %c0_i32_9 : i32
    scf.if %17 {
      %c0_10 = arith.constant 0 : index
      %c0_11 = arith.constant 0 : index
      %18 = vector.load %arg3[%c0_10, %c0_11] : memref<1x1xf32, #tpu.memory_space<vmem>>, vector<1x1xf32>
      %cst_12 = arith.constant 6.10351563E-5 : f32
      %19 = vector.broadcast %cst_12 : f32 to vector<1x1xf32>
      %20 = arith.mulf %18, %19 : vector<1x1xf32>
      %c0_13 = arith.constant 0 : index
      %c0_14 = arith.constant 0 : index
      %21 = vector.load %arg3[%c0_13, %c0_14] : memref<1x1xf32, #tpu.memory_space<vmem>>, vector<1x1xf32>
      tpu.vector_store %arg3[%c0_13, %c0_14], %20 {strides = array<i32>} : memref<1x1xf32, #tpu.memory_space<vmem>>, vector<1x1xf32>,
    } else {
    }
    return
  }
  func.func @transform_0(%arg0: i32) -> (i32, i32) {
    %c0_i32 = arith.constant 0 : i32
    %c0_i32_0 = arith.constant 0 : i32
    return %arg0, %c0_i32 : i32, i32
  }
  func.func @transform_1(%arg0: i32) -> (i32, i32) {
    %c0_i32 = arith.constant 0 : i32
    %c0_i32_0 = arith.constant 0 : i32
    return %arg0, %c0_i32 : i32, i32
  }
  func.func @transform_2(%arg0: i32) -> (i32, i32) {
    %c0_i32 = arith.constant 0 : i32
    %c0_i32_0 = arith.constant 0 : i32
    %c0_i32_1 = arith.constant 0 : i32
    return %c0_i32, %c0_i32_0 : i32, i32
  }
}

</mosaic_0001>

<bundles_post_ra>
// kernel: perceptual_loss.7
= control target key start
LH: loop header
LB: loop body
LE: loop exit
PB: predicated region body
PF: predicated region fallthrough
CT: control target
= control target key end

     0   :  { %s4129_s12 = smov 0   ;;  %s4131_s13 = smov 0   ;;  %s4821_s0 = inlined_call_operand.vmem [shape: f32[4,18,18,3], index: 0, kind: input, shape index: {}]   ;;  %s4822_s1 = inlined_call_operand.vmem [shape: bf16[9,3,64], index: 1, kind: input, shape index: {}]   ;;  %s4823_s2 = inlined_call_operand.vmem [shape: f32[1,64], index: 2, kind: input, shape index: {}]   ;;  %s4824_s3 = inlined_call_operand.vmem [shape: f32[4,256,64], index: 3, kind: output, shape index: {}]  }
   0x1   :  { %s4133_s14 = smov 0  }
   0x2 LB: > { %s25_s15 = sadd.s32 1, %s4102_s13  ;;  %p2989_p0 = scmp.ge.s32.totalorder %s4106_s14, 1  ;;  %s4106_s14 = sphi %s4133_s14, %s13_s14   ;;  %s4102_s13 = sphi %s4131_s13, %s4826_s13   ;;  %s4098_s12 = sphi %s4129_s12, %s4825_s12  }
   0x3   : > { %p27_p1 = scmp.ge.s32.totalorder %s25_s15, 4  ;;  %p151_p2 = scmp.lt.s32.totalorder %s4106_s14, 5 }
   0x5   : > { %s4828_s15 = smov (%p27_p1, %s25_s15), 0  ;;  %p152_p3 = pnand %p2989_p0, %p151_p2 }
   0x6   : > { %v2993_v0 = vld [vmem:[%s4822_s1 + $0x2] sm:$0x3] (!%p152_p3)  ;;  %vm346_vm0 = vcmask (!%p152_p3), 1040384   ;;  %vm347_vm1 = vcmask (!%p152_p3), 1041408   ;;  %p179_p4 = scmp.lt.s32.totalorder (!%p152_p3), %s4098_s12, 3  ;;  %v4108_v1 = vmov (!%p152_p3), 65535  }
   0x7   : > { %155 = sbr.rel (%p152_p3) target bundleno = 525 (0x20d), region = 32  ;;  %v348_v2 = vsel (!%p152_p3), %vm346_vm0, 4294967295, %v4108_v1  ;;  %v3124_v3 = vld [vmem:[%s4822_s1 + $0x8] sm:$0x3] (!%p152_p3)  ;;  %v246_v4 = vld [vmem:[%s4822_s1] sm:$0x3] (!%p152_p3) }
   0x8   : > { %v4156_v5 = vsel (!%p152_p3), %vm347_vm1, %v348_v2, 0  ;;  %v3173_v6 = vld [vmem:[%s4822_s1 + $0xa] sm:$0x3] (!%p152_p3)  ;;  %v3222_v11 = vld [vmem:[%s4822_s1 + $0xc] sm:$0x3] (!%p152_p3)  ;;  %vm297_vm2 = vcmask (!%p152_p3), 23552  }
   0x9   : > { %v351_v7 = vand.u32 (!%p152_p3), %v2993_v0, %v4156_v5  ;;  %v4165_v8 = vand.u32 (!%p152_p3), %v3124_v3, %v4156_v5  ;;  %v563_v9 = vand.u32 (!%p152_p3), %v4156_v5, %v246_v4  ;;  %v1710_v10 = vand.u32 (!%p152_p3), %v3173_v6, %v4156_v5  ;;  %v3026_v12 = vld [vmem:[%s4822_s1 + $0x4] sm:$0x3] (!%p152_p3)  ;;  %v3271_v54 = vld [vmem:[%s4822_s1 + $0xe] sm:$0x3] (!%p152_p3) }
   0xa   : > { %v2007_v25 = vand.u32 (!%p152_p3), %v3222_v11, %v4156_v5  ;;  %v4200_v26 = vand.u32 (!%p152_p3), %v3026_v12, %v4156_v5  ;;  %v4277_v58 = vand.u32 (!%p152_p3), %v3271_v54, %v4156_v5  ;;  %vm2861_vm3 = vcmask (!%p152_p3), 523264  }
   0xb   : > { %3494 = vmatprep.subr.bf16.mxu1 (!%p152_p3), %v351_v7  ;;  %3630 = vmatprep.subr.bf16.mxu0 (!%p152_p3), %v4165_v8 }
   0xc   : > { %3495 = vmatpush3.bf16.msra.mxu1 (!%p152_p3), %v351_v7  ;;  %3631 = vmatpush3.bf16.msra.mxu0 (!%p152_p3), %v4165_v8 }
   0xd   : > { %3528 = vmatprep.subr.bf16.mxu1 (!%p152_p3), %v563_v9  ;;  %3664 = vmatprep.subr.bf16.mxu0 (!%p152_p3), %v1710_v10 }
   0xe   : > { %s4830_s12 = smov (!%p179_p4, %s4098_s12), 3 }
   0xf   : > { %s4058_s24 = smul.u32 432, %s4830_s12  ;;  %s3340_s17 = sshll.u32 %s4830_s12, 8 }
  0x10   : > { %s4711_s20 = scalar_lea.vmem %s4824_s3, %s3340_s17 }
  0x11   : > { %s4175_s27 = scalar_lea.vmem %s4821_s0, %s4058_s24 }
  0x12   : > { %v247_v13 = vld [vmem:[%s4175_s27 + $0x1] sm:$0xff]  ;;  %v248_v14 = vld [vmem:[%s4175_s27 + $0x9] sm:$0xff]  ;;  %v3092_v15 = vld [vmem:[%s4175_s27 + $0x19] sm:$0xff] }
  0x13   : > { %v279_v16 = vpack.c.bf16 %v248_v14, %v247_v13  ;;  %v3093_v17 = vld [vmem:[%s4175_s27 + $0x21] sm:$0xff]  ;;  %v3094_v18 = vld [vmem:[%s4175_s27 + $0x31] sm:$0xff]  ;;  %v3095_v19 = vld [vmem:[%s4175_s27 + $0x39] sm:$0xff] }
  0x14   : > { %v1349_v20 = vpack.c.bf16 %v3093_v17, %v3092_v15  ;;  %v4189_v21 = vpack.c.bf16 %v3095_v19, %v3094_v18  ;;  %v3096_v22 = vld [vmem:[%s4175_s27 + $0x49] sm:$0xff]  ;;  %v3097_v23 = vld [vmem:[%s4175_s27 + $0x51] sm:$0xff]  ;;  %v3098_v27 = vld [vmem:[%s4175_s27 + $0x61] sm:$0xff] }
  0x15   : > { %3496 = vmatprep.mubr.msk.bf16.mxu1 %vm297_vm2, %v279_v16  ;;  %v4194_v24 = vpack.c.bf16 %v3097_v23, %v3096_v22  ;;  %v3099_v28 = vld [vmem:[%s4175_s27 + $0x69] sm:$0xff]  ;;  %v3100_v29 = vld [vmem:[%s4175_s27 + $0x79] sm:$0xff]  ;;  %v3101_v30 = vld [vmem:[%s4175_s27 + $0x81] sm:$0xff] }
  0x16   : > { %3632 = vmatprep.mubr.msk.bf16.mxu0 %vm297_vm2, %v1349_v20  ;;  %3497 = vmatmul.mubr.msk.bf16.vlgmr.msra.gmra.mrb[0].mxu1 %vm297_vm2, %v1349_v20  ;;  %v4213_v31 = vpack.c.bf16 %v3099_v28, %v3098_v27  ;;  %v4215_v32 = vpack.c.bf16 %v3101_v30, %v3100_v29  ;;  %v3102_v33 = vld [vmem:[%s4175_s27 + $0x91] sm:$0xff]  ;;  %v3103_v34 = vld [vmem:[%s4175_s27 + $0x99] sm:$0xff]  ;;  %v3104_v35 = vld [vmem:[%s4175_s27 + $0xa9] sm:$0xff] }
  0x17   : > { %3529 = vmatpush3.bf16.msra.mxu1 %v563_v9  ;;  %3633 = vmatmul.mubr.msk.bf16.vlgmr.msra.gmra.mrb[0].mxu0 %vm297_vm2, %v4189_v21  ;;  %v3105_v36 = vld [vmem:[%s4175_s27 + $0xb1] sm:$0xff]  ;;  %v4229_v37 = vpack.c.bf16 %v3103_v34, %v3102_v33  ;;  %v3106_v39 = vld [vmem:[%s4175_s27 + $0xc1] sm:$0xff]  ;;  %v3107_v40 = vld [vmem:[%s4175_s27 + $0xc9] sm:$0xff] }
  0x18   : > { %3665 = vmatpush3.bf16.msra.mxu0 %v1710_v10  ;;  %3500 = vmatprep.mubr.msk.bf16.mxu1 %vm297_vm2, %v4189_v21  ;;  %v4231_v38 = vpack.c.bf16 %v3105_v36, %v3104_v35  ;;  %v3141_v41 = vld [vmem:[%s4175_s27 + $0x1a] sm:$0xff]  ;;  %v3142_v42 = vld [vmem:[%s4175_s27 + $0x22] sm:$0xff]  ;;  %v4245_v43 = vpack.c.bf16 %v3107_v40, %v3106_v39  ;;  %v3143_v47 = vld [vmem:[%s4175_s27 + $0x32] sm:$0xff] }
  0x19   : > { %3636 = vmatprep.mubr.msk.bf16.mxu0 %vm297_vm2, %v4194_v24  ;;  %3698 = vmatprep.subr.bf16.mxu0 %v2007_v25  ;;  %v4247_v44 = vpack.c.bf16 %v3142_v42, %v3141_v41  ;;  %v265_v45 = vld [vmem:[%s4175_s27 + $0xd9] sm:$0xff]  ;;  %v266_v46 = vld [vmem:[%s4175_s27 + $0xe1] sm:$0xff]  ;;  %v267_v49 = vld [vmem:[%s4175_s27 + $0xf1] sm:$0xff] }
  0x1a   : > { %3562 = vmatprep.subr.bf16.mxu1 %v4200_v26  ;;  %v3144_v48 = vld [vmem:[%s4175_s27 + $0x3a] sm:$0xff]  ;;  %v3145_v51 = vld [vmem:[%s4175_s27 + $0x4a] sm:$0xff]  ;;  %v3146_v52 = vld [vmem:[%s4175_s27 + $0x52] sm:$0xff]  ;;  %v4265_v53 = vpack.c.bf16 %v266_v46, %v265_v45 }
  0x1b   : > { %v268_v50 = vld [vmem:[%s4175_s27 + $0xf9] sm:$0xff]  ;;  %v4270_v55 = vpack.c.bf16 %v3144_v48, %v3143_v47  ;;  %v4274_v57 = vpack.c.bf16 %v3146_v52, %v3145_v51  ;;  %v269_v59 = vld [vmem:[%s4175_s27 + $0x109] sm:$0xff]  ;;  %v270_v60 = vld [vmem:[%s4175_s27 + $0x111] sm:$0xff] }
  0x1c   : > { %v4272_v56 = vpack.c.bf16 %v268_v50, %v267_v49  ;;  %v3147_v61 = vld [vmem:[%s4175_s27 + $0x62] sm:$0xff]  ;;  %v3148_v62 = vld [vmem:[%s4175_s27 + $0x6a] sm:$0xff]  ;;  %v3149_v1 = vld [vmem:[%s4175_s27 + $0x7a] sm:$0xff]  ;;  %v4296_v3 = vpack.c.bf16 %v270_v60, %v269_v59 }
  0x1d   : > { %v271_v63 = vld [vmem:[%s4175_s27 + $0x121] sm:$0xff]  ;;  %v272_v0 = vld [vmem:[%s4175_s27 + $0x129] sm:$0xff]  ;;  %v4298_v4 = vpack.c.bf16 %v3148_v62, %v3147_v61  ;;  %v273_v9 = vld [vmem:[%s4175_s27 + $0x139] sm:$0xff] }
  0x1e   : > { %3501 = vmatmul.mubr.msk.bf16.gmra.mrb[4].mxu1 %vm297_vm2, %v4194_v24  ;;  %v3150_v2 = vld [vmem:[%s4175_s27 + $0x82] sm:$0xff]  ;;  %v4300_v6 = vpack.c.bf16 %v272_v0, %v271_v63  ;;  %v3151_v11 = vld [vmem:[%s4175_s27 + $0x92] sm:$0xff]  ;;  %v3152_v12 = vld [vmem:[%s4175_s27 + $0x9a] sm:$0xff] }
  0x1f   : > { %3637 = vmatmul.mubr.msk.bf16.gmra.mrb[4].mxu0 %vm297_vm2, %v4213_v31  ;;  %3504 = vmatprep.mubr.msk.bf16.mxu1 %vm297_vm2, %v4213_v31  ;;  %v4302_v7 = vpack.c.bf16 %v3150_v2, %v3149_v1  ;;  %v274_v10 = vld [vmem:[%s4175_s27 + $0x141] sm:$0xff]  ;;  %v275_v13 = vld [vmem:[%s4175_s27 + $0x151] sm:$0xff]  ;;  %v276_v14 = vld [vmem:[%s4175_s27 + $0x159] sm:$0xff]  ;;  %v4322_v18 = vpack.c.bf16 %v3152_v12, %v3151_v11 }
  0x20   : > { %3640 = vmatprep.mubr.msk.bf16.mxu0 %vm297_vm2, %v4215_v32  ;;  %v3153_v15 = vld [vmem:[%s4175_s27 + $0xaa] sm:$0xff]  ;;  %v3154_v16 = vld [vmem:[%s4175_s27 + $0xb2] sm:$0xff]  ;;  %v4320_v17 = vpack.c.bf16 %v274_v10, %v273_v9  ;;  %v4324_v19 = vpack.c.bf16 %v276_v14, %v275_v13  ;;  %v198_v28 = vld [vmem:[%s4175_s27] sm:$0xff] }
  0x21   : > { %v4326_v20 = vpack.c.bf16 %v3154_v16, %v3153_v15  ;;  %v277_v22 = vld [vmem:[%s4175_s27 + $0x169] sm:$0xff]  ;;  %v278_v23 = vld [vmem:[%s4175_s27 + $0x171] sm:$0xff]  ;;  %v3157_v30 = vld [vmem:[%s4175_s27 + $0xda] sm:$0xff] }
  0x22   : > { %v3156_v27 = vld [vmem:[%s4175_s27 + $0xca] sm:$0xff]  ;;  %v3158_v33 = vld [vmem:[%s4175_s27 + $0xe2] sm:$0xff]  ;;  %v4344_v34 = vpack.c.bf16 %v278_v23, %v277_v22  ;;  %v200_v40 = vld [vmem:[%s4175_s27 + $0x18] sm:$0xff] }
  0x23   : > { %v199_v29 = vld [vmem:[%s4175_s27 + $0x8] sm:$0xff]  ;;  %v4348_v39 = vpack.c.bf16 %v3158_v33, %v3157_v30  ;;  %v201_v41 = vld [vmem:[%s4175_s27 + $0x20] sm:$0xff]  ;;  %v3159_v42 = vld [vmem:[%s4175_s27 + $0xf2] sm:$0xff] }
  0x24   : > { %v230_v36 = vpack.c.bf16 %v199_v29, %v198_v28  ;;  %v3160_v45 = vld [vmem:[%s4175_s27 + $0xfa] sm:$0xff]  ;;  %v202_v46 = vld [vmem:[%s4175_s27 + $0x30] sm:$0xff]  ;;  %v4365_v50 = vpack.c.bf16 %v201_v41, %v200_v40  ;;  %v3075_v51 = vld [vmem:[%s4822_s1 + $0x6] sm:$0x3] }
  0x25   : > { %v203_v47 = vld [vmem:[%s4175_s27 + $0x38] sm:$0xff]  ;;  %v3161_v48 = vld [vmem:[%s4175_s27 + $0x10a] sm:$0xff]  ;;  %v4370_v52 = vpack.c.bf16 %v3160_v45, %v3159_v42  ;;  %v4377_v60 = vand.u32 %v3075_v51, %v4156_v5  ;;  %v3163_v63 = vld [vmem:[%s4175_s27 + $0x122] sm:$0xff] }
  0x26   : > { %3505 = vmatmul.mubr.msk.bf16.gmra.mrb[8].mxu1 %vm297_vm2, %v4215_v32  ;;  %v3162_v49 = vld [vmem:[%s4175_s27 + $0x112] sm:$0xff]  ;;  %v4372_v54 = vpack.c.bf16 %v203_v47, %v202_v46  ;;  %v204_v61 = vld [vmem:[%s4175_s27 + $0x48] sm:$0xff]  ;;  %v206_v1 = vld [vmem:[%s4175_s27 + $0x60] sm:$0xff] }
  0x27   : > { %3641 = vmatmul.mubr.msk.bf16.gmra.mrb[8].mxu0 %vm297_vm2, %v4229_v37  ;;  %3508 = vmatprep.mubr.msk.bf16.mxu1 %vm297_vm2, %v4229_v37  ;;  %v4374_v59 = vpack.c.bf16 %v3162_v49, %v3161_v48  ;;  %v205_v62 = vld [vmem:[%s4175_s27 + $0x50] sm:$0xff]  ;;  %v207_v2 = vld [vmem:[%s4175_s27 + $0x68] sm:$0xff]  ;;  %v208_v14 = vld [vmem:[%s4175_s27 + $0x78] sm:$0xff] }
  0x28   : > { %3644 = vmatprep.mubr.msk.bf16.mxu0 %vm297_vm2, %v4231_v38  ;;  %v3164_v0 = vld [vmem:[%s4175_s27 + $0x12a] sm:$0xff]  ;;  %v3166_v9 = vld [vmem:[%s4175_s27 + $0x142] sm:$0xff]  ;;  %v4397_v10 = vpack.c.bf16 %v205_v62, %v204_v61  ;;  %v4401_v12 = vpack.c.bf16 %v207_v2, %v206_v1  ;;  %v3167_v16 = vld [vmem:[%s4175_s27 + $0x152] sm:$0xff] }
  0x29   : > { %v4399_v11 = vpack.c.bf16 %v3164_v0, %v3163_v63  ;;  %v209_v15 = vld [vmem:[%s4175_s27 + $0x80] sm:$0xff]  ;;  %v210_v23 = vld [vmem:[%s4175_s27 + $0x90] sm:$0xff]  ;;  %v212_v40 = vld [vmem:[%s4175_s27 + $0xa8] sm:$0xff] }
  0x2a   : > { %v3168_v22 = vld [vmem:[%s4175_s27 + $0x15a] sm:$0xff]  ;;  %v3170_v28 = vld [vmem:[%s4175_s27 + $0x172] sm:$0xff]  ;;  %v4421_v29 = vpack.c.bf16 %v209_v15, %v208_v14  ;;  %v3171_v42 = vld [vmem:[%s4175_s27 + $0x182] sm:$0xff] }
  0x2b   : > { %v4423_v30 = vpack.c.bf16 %v3168_v22, %v3167_v16  ;;  %v213_v41 = vld [vmem:[%s4175_s27 + $0xb0] sm:$0xff]  ;;  %v214_v46 = vld [vmem:[%s4175_s27 + $0xc0] sm:$0xff]  ;;  %v215_v47 = vld [vmem:[%s4175_s27 + $0xc8] sm:$0xff] }
  0x2c   : > { %v3172_v45 = vld [vmem:[%s4175_s27 + $0x18a] sm:$0xff]  ;;  %v4443_v48 = vpack.c.bf16 %v213_v41, %v212_v40  ;;  %v4447_v51 = vpack.c.bf16 %v215_v47, %v214_v46  ;;  %v216_v61 = vld [vmem:[%s4175_s27 + $0xd8] sm:$0xff]  ;;  %v217_v62 = vld [vmem:[%s4175_s27 + $0xe0] sm:$0xff] }
  0x2d   : > { %v4445_v49 = vpack.c.bf16 %v3172_v45, %v3171_v42  ;;  %v218_v63 = vld [vmem:[%s4175_s27 + $0xf0] sm:$0xff]  ;;  %v219_v0 = vld [vmem:[%s4175_s27 + $0xf8] sm:$0xff]  ;;  %v4461_v1 = vpack.c.bf16 %v217_v62, %v216_v61  ;;  %v220_v14 = vld [vmem:[%s4175_s27 + $0x108] sm:$0xff] }
  0x2e   : > { %3509 = vmatmul.mubr.msk.bf16.gmra.mrb[12].mxu1 %vm297_vm2, %v4231_v38  ;;  %v3320_v2 = vld [vmem:[%s4822_s1 + $0x10] sm:$0x3]  ;;  %v223_v16 = vld [vmem:[%s4175_s27 + $0x128] sm:$0xff] }
  0x2f   : > { %3645 = vmatmul.mubr.msk.bf16.gmra.mrb[12].mxu0 %vm297_vm2, %v4245_v43  ;;  %3512 = vmatprep.mubr.msk.bf16.mxu1 %vm297_vm2, %v4245_v43  ;;  %v221_v15 = vld [vmem:[%s4175_s27 + $0x110] sm:$0xff]  ;;  %v228_v42 = vld [vmem:[%s4175_s27 + $0x168] sm:$0xff] }
  0x30   : > { %3666 = vmatprep.mubr.msk.bf16.mxu0 %vm297_vm2, %v4247_v44  ;;  %v4485_v22 = vpack.c.bf16 %v221_v15, %v220_v14  ;;  %v229_v45 = vld [vmem:[%s4175_s27 + $0x170] sm:$0xff]  ;;  %v726_v46 = vld [vmem:[%s4175_s27 + $0x2] sm:$0xff] }
  0x31   : > { %v727_v47 = vld [vmem:[%s4175_s27 + $0xa] sm:$0xff]  ;;  %v4517_v61 = vpack.c.bf16 %v229_v45, %v228_v42 }
  0x32   : > { %v758_v62 = vpack.c.bf16 %v727_v47, %v726_v46 }
  0x36   : > { %3513 = vmatmul.mubr.msk.bf16.gmra.mrb[16].mxu1 %vm297_vm2, %v4265_v53 }
  0x37   : > { %3667 = vmatmul.mubr.msk.bf16.vlgmr.msra.gmra.mrb[0].mxu0 %vm297_vm2, %v4270_v55  ;;  %3516 = vmatprep.mubr.msk.bf16.mxu1 %vm297_vm2, %v4272_v56 }
  0x38   : > { %3699 = vmatpush3.bf16.msra.mxu0 %v2007_v25  ;;  %3670 = vmatprep.mubr.msk.bf16.mxu0 %vm297_vm2, %v4274_v57  ;;  %v3155_v25 = vld [vmem:[%s4175_s27 + $0xc2] sm:$0xff] }
  0x39   : > { %3732 = vmatprep.subr.bf16.mxu0 %v4277_v58  ;;  %v4346_v35 = vpack.c.bf16 %v3156_v27, %v3155_v25  ;;  %v211_v25 = vld [vmem:[%s4175_s27 + $0x98] sm:$0xff]  ;;  %v3169_v27 = vld [vmem:[%s4175_s27 + $0x16a] sm:$0xff] }
  0x3a   : > { %v4425_v33 = vpack.c.bf16 %v211_v25, %v210_v23  ;;  %v225_v25 = vld [vmem:[%s4175_s27 + $0x140] sm:$0xff] }
  0x3e   : > { %3517 = vmatmul.mubr.msk.bf16.gmra.mrb[20].mxu1 %vm297_vm2, %v4296_v3 }
  0x3f   : > { %3671 = vmatmul.mubr.msk.bf16.gmra.mrb[4].mxu0 %vm297_vm2, %v4298_v4  ;;  %3520 = vmatprep.mubr.msk.bf16.mxu1 %vm297_vm2, %v4300_v6 }
  0x40   : > { %3674 = vmatprep.mubr.msk.bf16.mxu0 %vm297_vm2, %v4302_v7 }
  0x46   : > { %3521 = vmatmul.mubr.msk.bf16.gmra.mrb[24].mxu1 %vm297_vm2, %v4320_v17 }
  0x47   : > { %3675 = vmatmul.mubr.msk.bf16.gmra.mrb[8].mxu0 %vm297_vm2, %v4322_v18  ;;  %3524 = vmatprep.mubr.msk.bf16.mxu1 %vm297_vm2, %v4324_v19 }
  0x48   : > { %3678 = vmatprep.mubr.msk.bf16.mxu0 %vm297_vm2, %v4326_v20 }
  0x4e   : > { %3525 = vmatmul.mubr.msk.bf16.gmra.mrb[28].mxu1 %vm297_vm2, %v4344_v34 }
  0x4f   : > { %3679 = vmatmul.mubr.msk.bf16.gmra.mrb[12].mxu0 %vm297_vm2, %v4346_v35  ;;  %3530 = vmatprep.mubr.msk.bf16.mxu1 %vm297_vm2, %v230_v36  ;;  %v4427_v36 = vpack.c.bf16 %v3170_v28, %v3169_v27  ;;  %v226_v27 = vld [vmem:[%s4175_s27 + $0x150] sm:$0xff]  ;;  %v227_v28 = vld [vmem:[%s4175_s27 + $0x158] sm:$0xff] }
  0x50   : > { %3682 = vmatprep.mubr.msk.bf16.mxu0 %vm297_vm2, %v4348_v39  ;;  %v4503_v41 = vpack.c.bf16 %v227_v28, %v226_v27 }
  0x56   : > { %3531 = vmatmul.mubr.msk.bf16.vlgmr.msra.gmra.mrb[0].mxu1 %vm297_vm2, %v4365_v50 }
  0x57   : > { %3563 = vmatpush3.bf16.msra.mxu1 %v4200_v26  ;;  %3683 = vmatmul.mubr.msk.bf16.gmra.mrb[16].mxu0 %vm297_vm2, %v4370_v52  ;;  %v3165_v26 = vld [vmem:[%s4175_s27 + $0x13a] sm:$0xff] }
  0x58   : > { %3534 = vmatprep.mubr.msk.bf16.mxu1 %vm297_vm2, %v4372_v54  ;;  %3686 = vmatprep.mubr.msk.bf16.mxu0 %vm297_vm2, %v4374_v59  ;;  %v4403_v13 = vpack.c.bf16 %v3166_v9, %v3165_v26  ;;  %v4466_v26 = vpack.c.bf16 %v219_v0, %v218_v63  ;;  %v4469_v9 = vand.u32 %v3320_v2, %v4156_v5  ;;  %v222_v5 = vld [vmem:[%s4175_s27 + $0x120] sm:$0xff]  ;;  %v3220_v0 = vld [vmem:[%s4175_s27 + $0x198] sm:$0xff] }
  0x59   : > { %3596 = vmatprep.subr.bf16.mxu1 %v4377_v60  ;;  %v4487_v23 = vpack.c.bf16 %v223_v16, %v222_v5  ;;  %v3221_v2 = vld [vmem:[%s4175_s27 + $0x1a0] sm:$0xff] }
  0x5a   : > { %v1955_v14 = vpack.c.bf16 %v3221_v2, %v3220_v0 }
  0x5e   : > { %3535 = vmatmul.mubr.msk.bf16.gmra.mrb[4].mxu1 %vm297_vm2, %v4397_v10 }
  0x5f   : > { %3687 = vmatmul.mubr.msk.bf16.gmra.mrb[20].mxu0 %vm297_vm2, %v4399_v11  ;;  %3538 = vmatprep.mubr.msk.bf16.mxu1 %vm297_vm2, %v4401_v12 }
  0x60   : > { %3690 = vmatprep.mubr.msk.bf16.mxu0 %vm297_vm2, %v4403_v13 }
  0x66   : > { %3539 = vmatmul.mubr.msk.bf16.gmra.mrb[8].mxu1 %vm297_vm2, %v4421_v29 }
  0x67   : > { %3691 = vmatmul.mubr.msk.bf16.gmra.mrb[24].mxu0 %vm297_vm2, %v4423_v30  ;;  %3542 = vmatprep.mubr.msk.bf16.mxu1 %vm297_vm2, %v4425_v33 }
  0x68   : > { %3694 = vmatprep.mubr.msk.bf16.mxu0 %vm297_vm2, %v4427_v36 }
  0x6e   : > { %3543 = vmatmul.mubr.msk.bf16.gmra.mrb[12].mxu1 %vm297_vm2, %v4443_v48 }
  0x6f   : > { %3695 = vmatmul.mubr.msk.bf16.gmra.mrb[28].mxu0 %vm297_vm2, %v4445_v49  ;;  %3546 = vmatprep.mubr.msk.bf16.mxu1 %vm297_vm2, %v4447_v51 }
  0x70   : > { %3700 = vmatprep.mubr.msk.bf16.mxu0 %vm297_vm2, %v4372_v54 }
  0x76   : > { %3547 = vmatmul.mubr.msk.bf16.gmra.mrb[16].mxu1 %vm297_vm2, %v4461_v1 }
  0x77   : > { %3701 = vmatmul.mubr.msk.bf16.vlgmr.msra.gmra.mrb[0].mxu0 %vm297_vm2, %v4397_v10  ;;  %3550 = vmatprep.mubr.msk.bf16.mxu1 %vm297_vm2, %v4466_v26 }
  0x78   : > { %3733 = vmatpush3.bf16.msra.mxu0 %v4277_v58  ;;  %3704 = vmatprep.mubr.msk.bf16.mxu0 %vm297_vm2, %v4401_v12  ;;  %v224_v58 = vld [vmem:[%s4175_s27 + $0x138] sm:$0xff] }
  0x79   : > { %3766 = vmatprep.subr.bf16.mxu0 %v4469_v9  ;;  %v4501_v40 = vpack.c.bf16 %v225_v25, %v224_v58 }
  0x7e   : > { %3551 = vmatmul.mubr.msk.bf16.gmra.mrb[20].mxu1 %vm297_vm2, %v4485_v22 }
  0x7f   : > { %3705 = vmatmul.mubr.msk.bf16.gmra.mrb[4].mxu0 %vm297_vm2, %v4421_v29  ;;  %3554 = vmatprep.mubr.msk.bf16.mxu1 %vm297_vm2, %v4487_v23 }
  0x80   : > { %3708 = vmatprep.mubr.msk.bf16.mxu0 %vm297_vm2, %v4425_v33 }
  0x86   : > { %3555 = vmatmul.mubr.msk.bf16.gmra.mrb[24].mxu1 %vm297_vm2, %v4501_v40 }
  0x87   : > { %3709 = vmatmul.mubr.msk.bf16.gmra.mrb[8].mxu0 %vm297_vm2, %v4443_v48  ;;  %3558 = vmatprep.mubr.msk.bf16.mxu1 %vm297_vm2, %v4503_v41 }
  0x88   : > { %3712 = vmatprep.mubr.msk.bf16.mxu0 %vm297_vm2, %v4447_v51 }
  0x8e   : > { %3559 = vmatmul.mubr.msk.bf16.gmra.mrb[28].mxu1 %vm297_vm2, %v4517_v61 }
  0x8f   : > { %3713 = vmatmul.mubr.msk.bf16.gmra.mrb[12].mxu0 %vm297_vm2, %v4461_v1  ;;  %3564 = vmatprep.mubr.msk.bf16.mxu1 %vm297_vm2, %v758_v62 }
  0x90   : > { %3716 = vmatprep.mubr.msk.bf16.mxu0 %vm297_vm2, %v4466_v26 }
  0x96   : > { %3565 = vmatmul.mubr.msk.bf16.vlgmr.msra.gmra.mrb[0].mxu1 %vm297_vm2, %v4247_v44  ;;  %v3218_v44 = vld [vmem:[%s4175_s27 + $0x180] sm:$0xff] }
  0x97   : > { %3597 = vmatpush3.bf16.msra.mxu1 %v4377_v60  ;;  %3717 = vmatmul.mubr.msk.bf16.gmra.mrb[16].mxu0 %vm297_vm2, %v4485_v22  ;;  %v3219_v60 = vld [vmem:[%s4175_s27 + $0x188] sm:$0xff] }
  0x98   : > { %3568 = vmatprep.mubr.msk.bf16.mxu1 %vm297_vm2, %v4270_v55  ;;  %3720 = vmatprep.mubr.msk.bf16.mxu0 %vm297_vm2, %v4487_v23  ;;  %v4546_v63 = vpack.c.bf16 %v3219_v60, %v3218_v44 }
  0x99   : > { %3800 = vmatprep.subr.bf16.mxu1 %v4165_v8 }
  0x9e   : > { %3569 = vmatmul.mubr.msk.bf16.gmra.mrb[4].mxu1 %vm297_vm2, %v4274_v57 }
  0x9f   : > { %3721 = vmatmul.mubr.msk.bf16.gmra.mrb[20].mxu0 %vm297_vm2, %v4501_v40  ;;  %3572 = vmatprep.mubr.msk.bf16.mxu1 %vm297_vm2, %v4298_v4 }
  0xa0   : > { %3724 = vmatprep.mubr.msk.bf16.mxu0 %vm297_vm2, %v4503_v41 }
  0xa6   : > { %3573 = vmatmul.mubr.msk.bf16.gmra.mrb[8].mxu1 %vm297_vm2, %v4302_v7 }
  0xa7   : > { %3725 = vmatmul.mubr.msk.bf16.gmra.mrb[24].mxu0 %vm297_vm2, %v4517_v61  ;;  %3576 = vmatprep.mubr.msk.bf16.mxu1 %vm297_vm2, %v4322_v18 }
  0xa8   : > { %3728 = vmatprep.mubr.msk.bf16.mxu0 %vm297_vm2, %v4546_v63 }
  0xae   : > { %3577 = vmatmul.mubr.msk.bf16.gmra.mrb[12].mxu1 %vm297_vm2, %v4326_v20 }
  0xaf   : > { %3729 = vmatmul.mubr.msk.bf16.gmra.mrb[28].mxu0 %vm297_vm2, %v1955_v14  ;;  %3580 = vmatprep.mubr.msk.bf16.mxu1 %vm297_vm2, %v4346_v35 }
  0xb0   : > { %3734 = vmatprep.mubr.msk.bf16.mxu0 %vm297_vm2, %v4189_v21  ;;  %v3268_v21 = vld [vmem:[%s4175_s27 + $0x189] sm:$0xff] }
  0xb6   : > { %3581 = vmatmul.mubr.msk.bf16.gmra.mrb[16].mxu1 %vm297_vm2, %v4348_v39 }
  0xb7   : > { %3735 = vmatmul.mubr.msk.bf16.vlgmr.msra.gmra.mrb[0].mxu0 %vm297_vm2, %v4194_v24  ;;  %3584 = vmatprep.mubr.msk.bf16.mxu1 %vm297_vm2, %v4370_v52 }
  0xb8   : > { %3767 = vmatpush3.bf16.msra.mxu0 %v4469_v9  ;;  %3738 = vmatprep.mubr.msk.bf16.mxu0 %vm297_vm2, %v4213_v31  ;;  %v3269_v31 = vld [vmem:[%s4175_s27 + $0x199] sm:$0xff] }
  0xbe   : > { %3585 = vmatmul.mubr.msk.bf16.gmra.mrb[20].mxu1 %vm297_vm2, %v4374_v59 }
  0xbf   : > { %3739 = vmatmul.mubr.msk.bf16.gmra.mrb[4].mxu0 %vm297_vm2, %v4215_v32  ;;  %3588 = vmatprep.mubr.msk.bf16.mxu1 %vm297_vm2, %v4399_v11  ;;  %v3270_v32 = vld [vmem:[%s4175_s27 + $0x1a1] sm:$0xff] }
  0xc0   : > { %3742 = vmatprep.mubr.msk.bf16.mxu0 %vm297_vm2, %v4229_v37  ;;  %v2249_v37 = vpack.c.bf16 %v3270_v32, %v3269_v31 }
  0xc6   : > { %3589 = vmatmul.mubr.msk.bf16.gmra.mrb[24].mxu1 %vm297_vm2, %v4403_v13 }
  0xc7   : > { %3743 = vmatmul.mubr.msk.bf16.gmra.mrb[8].mxu0 %vm297_vm2, %v4231_v38  ;;  %3592 = vmatprep.mubr.msk.bf16.mxu1 %vm297_vm2, %v4423_v30  ;;  %v3318_v38 = vld [vmem:[%s4175_s27 + $0x19a] sm:$0xff] }
  0xc8   : > { %3746 = vmatprep.mubr.msk.bf16.mxu0 %vm297_vm2, %v4245_v43  ;;  %v3319_v43 = vld [vmem:[%s4175_s27 + $0x1a2] sm:$0xff] }
  0xce   : > { %3593 = vmatmul.mubr.msk.bf16.gmra.mrb[28].mxu1 %vm297_vm2, %v4427_v36 }
  0xcf   : > { %3747 = vmatmul.mubr.msk.bf16.gmra.mrb[12].mxu0 %vm297_vm2, %v4265_v53  ;;  %3598 = vmatprep.mubr.msk.bf16.mxu1 %vm297_vm2, %v4365_v50 }
  0xd0   : > { %3750 = vmatprep.mubr.msk.bf16.mxu0 %vm297_vm2, %v4272_v56 }
  0xd6   : > { %3599 = vmatmul.mubr.msk.bf16.vlgmr.msra.gmra.mrb[0].mxu1 %vm297_vm2, %v4372_v54 }
  0xd7   : > { %3801 = vmatpush3.bf16.msra.mxu1 %v4165_v8  ;;  %3751 = vmatmul.mubr.msk.bf16.gmra.mrb[16].mxu0 %vm297_vm2, %v4296_v3  ;;  %v3267_v8 = vld [vmem:[%s4175_s27 + $0x181] sm:$0xff] }
  0xd8   : > { %3602 = vmatprep.mubr.msk.bf16.mxu1 %vm297_vm2, %v4397_v10  ;;  %3754 = vmatprep.mubr.msk.bf16.mxu0 %vm297_vm2, %v4300_v6  ;;  %v2248_v24 = vpack.c.bf16 %v3268_v21, %v3267_v8 }
  0xde   : > { %3603 = vmatmul.mubr.msk.bf16.gmra.mrb[4].mxu1 %vm297_vm2, %v4401_v12 }
  0xdf   : > { %3755 = vmatmul.mubr.msk.bf16.gmra.mrb[20].mxu0 %vm297_vm2, %v4320_v17  ;;  %3606 = vmatprep.mubr.msk.bf16.mxu1 %vm297_vm2, %v4421_v29 }
  0xe0   : > { %3758 = vmatprep.mubr.msk.bf16.mxu0 %vm297_vm2, %v4324_v19 }
  0xe6   : > { %3607 = vmatmul.mubr.msk.bf16.gmra.mrb[8].mxu1 %vm297_vm2, %v4425_v33 }
  0xe7   : > { %3759 = vmatmul.mubr.msk.bf16.gmra.mrb[24].mxu0 %vm297_vm2, %v4344_v34  ;;  %3610 = vmatprep.mubr.msk.bf16.mxu1 %vm297_vm2, %v4443_v48 }
  0xe8   : > { %3762 = vmatprep.mubr.msk.bf16.mxu0 %vm297_vm2, %v2248_v24 }
  0xee   : > { %3611 = vmatmul.mubr.msk.bf16.gmra.mrb[12].mxu1 %vm297_vm2, %v4447_v51 }
  0xef   : > { %3763 = vmatmul.mubr.msk.bf16.gmra.mrb[28].mxu0 %vm297_vm2, %v2249_v37  ;;  %3614 = vmatprep.mubr.msk.bf16.mxu1 %vm297_vm2, %v4461_v1 }
  0xf0   : > { %3768 = vmatprep.mubr.msk.bf16.mxu0 %vm297_vm2, %v4270_v55 }
  0xf6   : > { %3615 = vmatmul.mubr.msk.bf16.gmra.mrb[16].mxu1 %vm297_vm2, %v4466_v26 }
  0xf7   : > { %3769 = vmatmul.mubr.msk.bf16.vlgmr.msra.gmra.mrb[0].mxu0 %vm297_vm2, %v4274_v57  ;;  %3618 = vmatprep.mubr.msk.bf16.mxu1 %vm297_vm2, %v4485_v22 }
  0xf8   : > { %3772 = vmatprep.mubr.msk.bf16.mxu0 %vm297_vm2, %v4298_v4 }
  0xfe   : > { %3619 = vmatmul.mubr.msk.bf16.gmra.mrb[20].mxu1 %vm297_vm2, %v4487_v23 }
  0xff   : > { %3773 = vmatmul.mubr.msk.bf16.gmra.mrb[4].mxu0 %vm297_vm2, %v4302_v7  ;;  %3622 = vmatprep.mubr.msk.bf16.mxu1 %vm297_vm2, %v4501_v40 }
 0x100   : > { %3776 = vmatprep.mubr.msk.bf16.mxu0 %vm297_vm2, %v4322_v18 }
 0x106   : > { %3623 = vmatmul.mubr.msk.bf16.gmra.mrb[24].mxu1 %vm297_vm2, %v4503_v41 }
 0x107   : > { %3777 = vmatmul.mubr.msk.bf16.gmra.mrb[8].mxu0 %vm297_vm2, %v4326_v20  ;;  %3626 = vmatprep.mubr.msk.bf16.mxu1 %vm297_vm2, %v4517_v61 }
 0x108   : > { %3780 = vmatprep.mubr.msk.bf16.mxu0 %vm297_vm2, %v4346_v35 }
 0x10e   : > { %3627 = vmatmul.mubr.msk.bf16.gmra.mrb[28].mxu1 %vm297_vm2, %v4546_v63 }
 0x10f   : > { %3781 = vmatmul.mubr.msk.bf16.gmra.mrb[12].mxu0 %vm297_vm2, %v4348_v39  ;;  %3648 = vmatprep.mubr.msk.bf16.mxu1 %vm297_vm2, %v4265_v53  ;;  %v2543_v53 = vpack.c.bf16 %v3319_v43, %v3318_v38 }
 0x110   : > { %3784 = vmatprep.mubr.msk.bf16.mxu0 %vm297_vm2, %v4370_v52 }
 0x116   : > { %3649 = vmatmul.mubr.msk.bf16.vlgmr.msra.gmra.mrb[16].mxu1 %vm297_vm2, %v4272_v56 }
 0x117   : > { %3785 = vmatmul.mubr.msk.bf16.gmra.mrb[16].mxu0 %vm297_vm2, %v4374_v59  ;;  %3652 = vmatprep.mubr.msk.bf16.mxu1 %vm297_vm2, %v4296_v3  ;;  %v4704_v59 = vld [vmem:[%s4823_s2] ss:$0 sm:$0xff] }
 0x118   : > { %3788 = vmatprep.mubr.msk.bf16.mxu0 %vm297_vm2, %v4399_v11 }
 0x11e   : > { %3653 = vmatmul.mubr.msk.bf16.gmra.mrb[20].mxu1 %vm297_vm2, %v4300_v6 }
 0x11f   : > { %3789 = vmatmul.mubr.msk.bf16.gmra.mrb[20].mxu0 %vm297_vm2, %v4403_v13  ;;  %3656 = vmatprep.mubr.msk.bf16.mxu1 %vm297_vm2, %v4320_v17 }
 0x120   : > { %3792 = vmatprep.mubr.msk.bf16.mxu0 %vm297_vm2, %v4423_v30 }
 0x126   : > { %3657 = vmatmul.mubr.msk.bf16.gmra.mrb[24].mxu1 %vm297_vm2, %v4324_v19 }
 0x127   : > { %3793 = vmatmul.mubr.msk.bf16.gmra.mrb[24].mxu0 %vm297_vm2, %v4427_v36  ;;  %3660 = vmatprep.mubr.msk.bf16.mxu1 %vm297_vm2, %v4344_v34 }
 0x128   : > { %3796 = vmatprep.mubr.msk.bf16.mxu0 %vm297_vm2, %v4445_v49 }
 0x12e   : > { %3661 = vmatmul.mubr.msk.bf16.gmra.mrb[28].mxu1 %vm297_vm2, %v2248_v24 }
 0x12f   : > { %3797 = vmatmul.mubr.msk.bf16.gmra.mrb[28].mxu0 %vm297_vm2, %v2543_v53 }
 0x1a9   : > { %v3600_v55 = vpop.f32.mrb[0].mxu1 }
 0x1aa   : > { %v1158_v56 = vpop.f32.mrb[1].mxu1 }
 0x1ab   : > { %v3601_v57 = vpop.f32.mrb[2].mxu1 }
 0x1ac   : > { %v1161_v3 = vpop.f32.mrb[3].mxu1 }
 0x1b1   : > { %v3604_v4 = vpop.f32.mrb[4].mxu1 }
 0x1b2   : > { %v1174_v6 = vpop.f32.mrb[5].mxu1 }
 0x1b3   : > { %v3605_v7 = vpop.f32.mrb[6].mxu1 }
 0x1b4   : > { %v1177_v17 = vpop.f32.mrb[7].mxu1 }
 0x1b9   : > { %v3608_v18 = vpop.f32.mrb[8].mxu1 }
 0x1ba   : > { %v1190_v19 = vpop.f32.mrb[9].mxu1 }
 0x1bb   : > { %v3609_v20 = vpop.f32.mrb[10].mxu1 }
 0x1bc   : > { %v1193_v34 = vpop.f32.mrb[11].mxu1 }
 0x1c1   : > { %v4693_v35 = vpop.f32.mrb[12].mxu1 }
 0x1c2   : > { %v4695_v39 = vpop.f32.mrb[13].mxu1 }
 0x1c3   : > { %v4697_v50 = vpop.f32.mrb[14].mxu1 }
 0x1c4   : > { %v4699_v52 = vpop.f32.mrb[15].mxu1 }
 0x1ca   : > { %v3770_v54 = vpop.f32.mrb[0].mxu0 }
 0x1cb   : > { %v3802_v10 = vadd.f32 %v3770_v54, %v3600_v55  ;;  %v2631_v11 = vpop.f32.mrb[1].mxu0 }
 0x1cc   : > { %v3803_v12 = vadd.f32 %v2631_v11, %v1158_v56  ;;  %v3771_v13 = vpop.f32.mrb[2].mxu0 }
 0x1cd   : > { %v2799_v29 = vadd.f32 %v3802_v10, %v4704_v59  ;;  %v3804_v30 = vadd.f32 %v3771_v13, %v3601_v57  ;;  %v2634_v33 = vpop.f32.mrb[3].mxu0 }
 0x1ce   : > { %v2797_v36 = vadd.f32 %v3803_v12, %v4704_v59  ;;  %v3805_v48 = vadd.f32 %v2634_v33, %v1161_v3 }
 0x1cf   : > { %v2831_v49 = vmax.f32 %v2799_v29, 0.0  ;;  %v2800_v51 = vadd.f32 %v3804_v30, %v4704_v59 }
 0x1d0   : > { %v2829_v1 = vmax.f32 %v2797_v36, 0.0  ;;  %v2798_v26 = vadd.f32 %v3805_v48, %v4704_v59 }
 0x1d1   : > { %2864 = vst.msk [vmem:[%s4711_s20 + $0x10] sm:$0xff] %vm2861_vm3, %v2831_v49  ;;  %v2832_v9 = vmax.f32 %v2800_v51, 0.0 }
 0x1d2   : > { %2862 = vst.msk [vmem:[%s4711_s20] sm:$0xff] %vm2861_vm3, %v2829_v1  ;;  %v2830_v15 = vmax.f32 %v2798_v26, 0.0  ;;  %v3774_v5 = vpop.f32.mrb[4].mxu0 }
 0x1d3   : > { %2865 = vst.msk [vmem:[%s4711_s20 + $0x18] sm:$0xff] %vm2861_vm3, %v2832_v9  ;;  %v3806_v16 = vadd.f32 %v3774_v5, %v3604_v4  ;;  %v2647_v22 = vpop.f32.mrb[5].mxu0 }
 0x1d4   : > { %2863 = vst.msk [vmem:[%s4711_s20 + $0x8] sm:$0xff] %vm2861_vm3, %v2830_v15  ;;  %v3807_v23 = vadd.f32 %v2647_v22, %v1174_v6  ;;  %v3775_v58 = vpop.f32.mrb[6].mxu0 }
 0x1d5   : > { %v2803_v25 = vadd.f32 %v3806_v16, %v4704_v59  ;;  %v3808_v27 = vadd.f32 %v3775_v58, %v3605_v7  ;;  %v2650_v28 = vpop.f32.mrb[7].mxu0 }
 0x1d6   : > { %v2801_v40 = vadd.f32 %v3807_v23, %v4704_v59  ;;  %v3809_v41 = vadd.f32 %v2650_v28, %v1177_v17 }
 0x1d7   : > { %v2835_v42 = vmax.f32 %v2803_v25, 0.0  ;;  %v2804_v45 = vadd.f32 %v3808_v27, %v4704_v59 }
 0x1d8   : > { %v2833_v46 = vmax.f32 %v2801_v40, 0.0  ;;  %v2802_v47 = vadd.f32 %v3809_v41, %v4704_v59 }
 0x1d9   : > { %2868 = vst.msk [vmem:[%s4711_s20 + $0x30] sm:$0xff] %vm2861_vm3, %v2835_v42  ;;  %v2836_v61 = vmax.f32 %v2804_v45, 0.0 }
 0x1da   : > { %2866 = vst.msk [vmem:[%s4711_s20 + $0x20] sm:$0xff] %vm2861_vm3, %v2833_v46  ;;  %v2834_v62 = vmax.f32 %v2802_v47, 0.0  ;;  %v3778_v44 = vpop.f32.mrb[8].mxu0 }
 0x1db   : > { %2869 = vst.msk [vmem:[%s4711_s20 + $0x38] sm:$0xff] %vm2861_vm3, %v2836_v61  ;;  %v3810_v60 = vadd.f32 %v3778_v44, %v3608_v18  ;;  %v2663_v63 = vpop.f32.mrb[9].mxu0 }
 0x1dc   : > { %2867 = vst.msk [vmem:[%s4711_s20 + $0x28] sm:$0xff] %vm2861_vm3, %v2834_v62  ;;  %v3811_v0 = vadd.f32 %v2663_v63, %v1190_v19  ;;  %v3779_v2 = vpop.f32.mrb[10].mxu0 }
 0x1dd   : > { %v2807_v14 = vadd.f32 %v3810_v60, %v4704_v59  ;;  %v3812_v8 = vadd.f32 %v3779_v2, %v3609_v20  ;;  %v2666_v21 = vpop.f32.mrb[11].mxu0 }
 0x1de   : > { %v2805_v24 = vadd.f32 %v3811_v0, %v4704_v59  ;;  %v3813_v31 = vadd.f32 %v2666_v21, %v1193_v34 }
 0x1df   : > { %v2839_v32 = vmax.f32 %v2807_v14, 0.0  ;;  %v2808_v37 = vadd.f32 %v3812_v8, %v4704_v59 }
 0x1e0   : > { %v2837_v38 = vmax.f32 %v2805_v24, 0.0  ;;  %v2806_v43 = vadd.f32 %v3813_v31, %v4704_v59 }
 0x1e1   : > { %2872 = vst.msk [vmem:[%s4711_s20 + $0x50] sm:$0xff] %vm2861_vm3, %v2839_v32  ;;  %v2840_v53 = vmax.f32 %v2808_v37, 0.0 }
 0x1e2   : > { %2870 = vst.msk [vmem:[%s4711_s20 + $0x40] sm:$0xff] %vm2861_vm3, %v2837_v38  ;;  %v2838_v55 = vmax.f32 %v2806_v43, 0.0  ;;  %v3782_v56 = vpop.f32.mrb[12].mxu0 }
 0x1e3   : > { %2873 = vst.msk [vmem:[%s4711_s20 + $0x58] sm:$0xff] %vm2861_vm3, %v2840_v53  ;;  %v3814_v57 = vadd.f32 %v3782_v56, %v4693_v35  ;;  %v2679_v3 = vpop.f32.mrb[13].mxu0 }
 0x1e4   : > { %2871 = vst.msk [vmem:[%s4711_s20 + $0x48] sm:$0xff] %vm2861_vm3, %v2838_v55  ;;  %v3815_v4 = vadd.f32 %v2679_v3, %v4695_v39  ;;  %v3783_v6 = vpop.f32.mrb[14].mxu0 }
 0x1e5   : > { %v2811_v7 = vadd.f32 %v3814_v57, %v4704_v59  ;;  %v3816_v17 = vadd.f32 %v3783_v6, %v4697_v50  ;;  %v2682_v18 = vpop.f32.mrb[15].mxu0 }
 0x1e6   : > { %v2809_v19 = vadd.f32 %v3815_v4, %v4704_v59  ;;  %v3817_v20 = vadd.f32 %v2682_v18, %v4699_v52 }
 0x1e7   : > { %v2843_v34 = vmax.f32 %v2811_v7, 0.0  ;;  %v2812_v35 = vadd.f32 %v3816_v17, %v4704_v59 }
 0x1e8   : > { %v2841_v54 = vmax.f32 %v2809_v19, 0.0  ;;  %v2810_v10 = vadd.f32 %v3817_v20, %v4704_v59 }
 0x1e9   : > { %2876 = vst.msk [vmem:[%s4711_s20 + $0x70] sm:$0xff] %vm2861_vm3, %v2843_v34  ;;  %v2844_v39 = vmax.f32 %v2812_v35, 0.0  ;;  %v3650_v11 = vpop.f32.mrb[16].mxu1 }
 0x1ea   : > { %2874 = vst.msk [vmem:[%s4711_s20 + $0x60] sm:$0xff] %vm2861_vm3, %v2841_v54  ;;  %v2842_v12 = vmax.f32 %v2810_v10, 0.0  ;;  %v3786_v50 = vpop.f32.mrb[16].mxu0  ;;  %v1516_v13 = vpop.f32.mrb[17].mxu1 }
 0x1eb   : > { %2877 = vst.msk [vmem:[%s4711_s20 + $0x78] sm:$0xff] %vm2861_vm3, %v2844_v39  ;;  %v3818_v29 = vadd.f32 %v3786_v50, %v3650_v11  ;;  %v2695_v52 = vpop.f32.mrb[17].mxu0  ;;  %v3651_v30 = vpop.f32.mrb[18].mxu1 }
 0x1ec   : > { %2875 = vst.msk [vmem:[%s4711_s20 + $0x68] sm:$0xff] %vm2861_vm3, %v2842_v12  ;;  %v3819_v33 = vadd.f32 %v2695_v52, %v1516_v13  ;;  %v3787_v36 = vpop.f32.mrb[18].mxu0  ;;  %v1519_v48 = vpop.f32.mrb[19].mxu1 }
 0x1ed   : > { %v2815_v49 = vadd.f32 %v3818_v29, %v4704_v59  ;;  %v3820_v51 = vadd.f32 %v3787_v36, %v3651_v30  ;;  %v2698_v1 = vpop.f32.mrb[19].mxu0 }
 0x1ee   : > { %v2813_v26 = vadd.f32 %v3819_v33, %v4704_v59  ;;  %v3821_v9 = vadd.f32 %v2698_v1, %v1519_v48 }
 0x1ef   : > { %v2847_v15 = vmax.f32 %v2815_v49, 0.0  ;;  %v2816_v5 = vadd.f32 %v3820_v51, %v4704_v59 }
 0x1f0   : > { %v2845_v16 = vmax.f32 %v2813_v26, 0.0  ;;  %v2814_v22 = vadd.f32 %v3821_v9, %v4704_v59 }
 0x1f1   : > { %2880 = vst.msk [vmem:[%s4711_s20 + $0x90] sm:$0xff] %vm2861_vm3, %v2847_v15  ;;  %v2848_v23 = vmax.f32 %v2816_v5, 0.0  ;;  %v3654_v58 = vpop.f32.mrb[20].mxu1 }
 0x1f2   : > { %2878 = vst.msk [vmem:[%s4711_s20 + $0x80] sm:$0xff] %vm2861_vm3, %v2845_v16  ;;  %v2846_v25 = vmax.f32 %v2814_v22, 0.0  ;;  %v3790_v27 = vpop.f32.mrb[20].mxu0  ;;  %v1532_v28 = vpop.f32.mrb[21].mxu1 }
 0x1f3   : > { %2881 = vst.msk [vmem:[%s4711_s20 + $0x98] sm:$0xff] %vm2861_vm3, %v2848_v23  ;;  %v3822_v40 = vadd.f32 %v3790_v27, %v3654_v58  ;;  %v2711_v41 = vpop.f32.mrb[21].mxu0  ;;  %v3655_v42 = vpop.f32.mrb[22].mxu1 }
 0x1f4   : > { %2879 = vst.msk [vmem:[%s4711_s20 + $0x88] sm:$0xff] %vm2861_vm3, %v2846_v25  ;;  %v3823_v45 = vadd.f32 %v2711_v41, %v1532_v28  ;;  %v3791_v46 = vpop.f32.mrb[22].mxu0  ;;  %v1535_v47 = vpop.f32.mrb[23].mxu1 }
 0x1f5   : > { %v2819_v61 = vadd.f32 %v3822_v40, %v4704_v59  ;;  %v3824_v62 = vadd.f32 %v3791_v46, %v3655_v42  ;;  %v2714_v44 = vpop.f32.mrb[23].mxu0 }
 0x1f6   : > { %v2817_v60 = vadd.f32 %v3823_v45, %v4704_v59  ;;  %v3825_v63 = vadd.f32 %v2714_v44, %v1535_v47 }
 0x1f7   : > { %v2851_v0 = vmax.f32 %v2819_v61, 0.0  ;;  %v2820_v2 = vadd.f32 %v3824_v62, %v4704_v59 }
 0x1f8   : > { %v2849_v14 = vmax.f32 %v2817_v60, 0.0  ;;  %v2818_v8 = vadd.f32 %v3825_v63, %v4704_v59 }
 0x1f9   : > { %2884 = vst.msk [vmem:[%s4711_s20 + $0xb0] sm:$0xff] %vm2861_vm3, %v2851_v0  ;;  %v2852_v21 = vmax.f32 %v2820_v2, 0.0  ;;  %v3658_v24 = vpop.f32.mrb[24].mxu1 }
 0x1fa   : > { %2882 = vst.msk [vmem:[%s4711_s20 + $0xa0] sm:$0xff] %vm2861_vm3, %v2849_v14  ;;  %v2850_v31 = vmax.f32 %v2818_v8, 0.0  ;;  %v3794_v32 = vpop.f32.mrb[24].mxu0  ;;  %v1548_v37 = vpop.f32.mrb[25].mxu1 }
 0x1fb   : > { %2885 = vst.msk [vmem:[%s4711_s20 + $0xb8] sm:$0xff] %vm2861_vm3, %v2852_v21  ;;  %v3826_v38 = vadd.f32 %v3794_v32, %v3658_v24  ;;  %v2727_v43 = vpop.f32.mrb[25].mxu0  ;;  %v3659_v53 = vpop.f32.mrb[26].mxu1 }
 0x1fc   : > { %2883 = vst.msk [vmem:[%s4711_s20 + $0xa8] sm:$0xff] %vm2861_vm3, %v2850_v31  ;;  %v3827_v55 = vadd.f32 %v2727_v43, %v1548_v37  ;;  %v3795_v56 = vpop.f32.mrb[26].mxu0  ;;  %v1551_v57 = vpop.f32.mrb[27].mxu1 }
 0x1fd   : > { %v2823_v3 = vadd.f32 %v3826_v38, %v4704_v59  ;;  %v3828_v4 = vadd.f32 %v3795_v56, %v3659_v53  ;;  %v2730_v6 = vpop.f32.mrb[27].mxu0 }
 0x1fe   : > { %v2821_v7 = vadd.f32 %v3827_v55, %v4704_v59  ;;  %v3829_v17 = vadd.f32 %v2730_v6, %v1551_v57 }
 0x1ff   : > { %v2855_v18 = vmax.f32 %v2823_v3, 0.0  ;;  %v2824_v19 = vadd.f32 %v3828_v4, %v4704_v59 }
 0x200   : > { %v2853_v20 = vmax.f32 %v2821_v7, 0.0  ;;  %v2822_v34 = vadd.f32 %v3829_v17, %v4704_v59 }
 0x201   : > { %2888 = vst.msk [vmem:[%s4711_s20 + $0xd0] sm:$0xff] %vm2861_vm3, %v2855_v18  ;;  %v2856_v35 = vmax.f32 %v2824_v19, 0.0  ;;  %v3662_v54 = vpop.f32.mrb[28].mxu1 }
 0x202   : > { %2886 = vst.msk [vmem:[%s4711_s20 + $0xc0] sm:$0xff] %vm2861_vm3, %v2853_v20  ;;  %v2854_v10 = vmax.f32 %v2822_v34, 0.0  ;;  %v3798_v39 = vpop.f32.mrb[28].mxu0  ;;  %v1564_v11 = vpop.f32.mrb[29].mxu1 }
 0x203   : > { %2889 = vst.msk [vmem:[%s4711_s20 + $0xd8] sm:$0xff] %vm2861_vm3, %v2856_v35  ;;  %v3830_v12 = vadd.f32 %v3798_v39, %v3662_v54  ;;  %v2743_v50 = vpop.f32.mrb[29].mxu0  ;;  %v3663_v13 = vpop.f32.mrb[30].mxu1 }
 0x204   : > { %2887 = vst.msk [vmem:[%s4711_s20 + $0xc8] sm:$0xff] %vm2861_vm3, %v2854_v10  ;;  %v3831_v29 = vadd.f32 %v2743_v50, %v1564_v11  ;;  %v3799_v52 = vpop.f32.mrb[30].mxu0  ;;  %v1567_v30 = vpop.f32.mrb[31].mxu1 }
 0x205   : > { %v2827_v33 = vadd.f32 %v3830_v12, %v4704_v59  ;;  %v3832_v36 = vadd.f32 %v3799_v52, %v3663_v13  ;;  %v2746_v48 = vpop.f32.mrb[31].mxu0 }
 0x206   : > { %v2825_v49 = vadd.f32 %v3831_v29, %v4704_v59  ;;  %v3833_v51 = vadd.f32 %v2746_v48, %v1567_v30 }
 0x207   : > { %v2859_v1 = vmax.f32 %v2827_v33, 0.0  ;;  %v2828_v26 = vadd.f32 %v3832_v36, %v4704_v59 }
 0x208   : > { %v2857_v9 = vmax.f32 %v2825_v49, 0.0  ;;  %v2826_v15 = vadd.f32 %v3833_v51, %v4704_v59 }
 0x209   : > { %2892 = vst.msk [vmem:[%s4711_s20 + $0xf0] sm:$0xff] %vm2861_vm3, %v2859_v1  ;;  %v2860_v5 = vmax.f32 %v2828_v26, 0.0 }
 0x20a   : > { %2890 = vst.msk [vmem:[%s4711_s20 + $0xe0] sm:$0xff] %vm2861_vm3, %v2857_v9  ;;  %v2858_v16 = vmax.f32 %v2826_v15, 0.0 }
 0x20b   : > { %2893 = vst.msk [vmem:[%s4711_s20 + $0xf8] sm:$0xff] %vm2861_vm3, %v2860_v5 }
 0x20c   : > { %2891 = vst.msk [vmem:[%s4711_s20 + $0xe8] sm:$0xff] %vm2861_vm3, %v2858_v16 }
 0x20d PF: > { %s13_s14 = sadd.s32 1, %s4106_s14   ;;  %s4825_s12 = smov %s4102_s13 }
 0x20e   : > { %p10_p5 = scmp.ge.s32.totalorder %s13_s14, 6   ;;  %s4826_s13 = smov %s4828_s15 }
 0x210   :  { %12 = sbr.rel (!%p10_p5) target bundleno = 2 (0x2), region = 73 }

// kernel: perceptual_loss.10
= control target key start
LH: loop header
LB: loop body
LE: loop exit
PB: predicated region body
PF: predicated region fallthrough
CT: control target
= control target key end

     0   :  { %s445_s6 = smov 0   ;;  %s447_s7 = smov 0   ;;  %s550_s0 = inlined_call_operand.vmem [shape: f32[4,16,8,128], index: 0, kind: input, shape index: {}]   ;;  %s551_s1 = inlined_call_operand.vmem [shape: f32[4,64,64], index: 1, kind: output, shape index: {}]  }
   0x1   :  { %s449_s8 = smov 0  }
   0x2 LB: > { %s23_s9 = sadd.s32 1, %s428_s7  ;;  %p376_p0 = scmp.ge.s32.totalorder %s432_s8, 1  ;;  %s432_s8 = sphi %s449_s8, %s11_s8   ;;  %s428_s7 = sphi %s447_s7, %s553_s7   ;;  %s424_s6 = sphi %s445_s6, %s552_s6  }
   0x3   : > { %p25_p1 = scmp.ge.s32.totalorder %s23_s9, 4  ;;  %p108_p2 = scmp.lt.s32.totalorder %s432_s8, 5 }
   0x5   : > { %s555_s9 = smov (%p25_p1, %s23_s9), 0  ;;  %p109_p3 = pnand %p376_p0, %p108_p2 }
   0x6   : > { %p137_p4 = scmp.lt.s32.totalorder (!%p109_p3), %s424_s6, 3  ;;  %s434_s14 = smov (!%p109_p3), 64   ;;  %vm252_vm0 = vcmask (!%p109_p3), 523264  }
   0x7   : > { %112 = sbr.rel (%p109_p3) target bundleno = 167 (0xa7), region = 24 }
   0xe   : > { %s557_s6 = smov (!%p137_p4, %s424_s6), 3 }
   0xf   : > { %s383_s10 = sshll.u32 %s557_s6, 7  ;;  %s384_s15 = sshll.u32 %s557_s6, 6 }
  0x10   : > { %s469_s13 = scalar_lea.vmem %s550_s0, %s383_s10  ;;  %s505_s18 = scalar_lea.vmem %s551_s1, %s384_s15 }
  0x11   : > { %v158_v0 = vld [vmem:[%s469_s13 + $0x10] sm:$0xff]  ;;  %v156_v1 = vld [vmem:[%s469_s13] sm:$0xff]  ;;  %v159_v2 = vld [vmem:[%s469_s13 + $0x18] sm:$0xff] }
  0x12   : > { %192 = vrot.lane.b32.xlu1 %v158_v0, %s434_s14  ;;  %188 = vrot.lane.b32.xlu0 %v156_v1, %s434_s14  ;;  %v157_v3 = vld [vmem:[%s469_s13 + $0x8] sm:$0xff]  ;;  %v160_v5 = vld [vmem:[%s469_s13 + $0x20] sm:$0xff] }
  0x13   : > { %v161_v4 = vld [vmem:[%s469_s13 + $0x28] sm:$0xff]  ;;  %v163_v6 = vld [vmem:[%s469_s13 + $0x38] sm:$0xff]  ;;  %v162_v7 = vld [vmem:[%s469_s13 + $0x30] sm:$0xff] }
  0x14   : > { %v165_v8 = vld [vmem:[%s469_s13 + $0x48] sm:$0xff]  ;;  %v164_v9 = vld [vmem:[%s469_s13 + $0x40] sm:$0xff]  ;;  %v167_v10 = vld [vmem:[%s469_s13 + $0x58] sm:$0xff] }
  0x15   : > { %v166_v11 = vld [vmem:[%s469_s13 + $0x50] sm:$0xff]  ;;  %v484_v12 = vld [vmem:[%s469_s13 + $0x68] sm:$0xff]  ;;  %v487_v13 = vld [vmem:[%s469_s13 + $0x60] sm:$0xff] }
  0x16   : > { %194 = vrot.lane.b32.xlu1 %v159_v2, %s434_s14  ;;  %190 = vrot.lane.b32.xlu0 %v157_v3, %s434_s14  ;;  %v492_v14 = vld [vmem:[%s469_s13 + $0x78] sm:$0xff]  ;;  %v495_v15 = vld [vmem:[%s469_s13 + $0x70] sm:$0xff] }
  0x1a   : > { %198 = vrot.lane.b32.xlu1 %v161_v4, %s434_s14  ;;  %196 = vrot.lane.b32.xlu0 %v160_v5, %s434_s14 }
  0x1e   : > { %202 = vrot.lane.b32.xlu1 %v163_v6, %s434_s14  ;;  %200 = vrot.lane.b32.xlu0 %v162_v7, %s434_s14 }
  0x22   : > { %206 = vrot.lane.b32.xlu1 %v165_v8, %s434_s14  ;;  %204 = vrot.lane.b32.xlu0 %v164_v9, %s434_s14 }
  0x26   : > { %210 = vrot.lane.b32.xlu1 %v167_v10, %s434_s14  ;;  %208 = vrot.lane.b32.xlu0 %v166_v11, %s434_s14 }
  0x2a   : > { %214 = vrot.lane.b32.xlu1 %v484_v12, %s434_s14  ;;  %212 = vrot.lane.b32.xlu0 %v487_v13, %s434_s14 }
  0x2e   : > { %218 = vrot.lane.b32.xlu1 %v492_v14, %s434_s14  ;;  %216 = vrot.lane.b32.xlu0 %v495_v15, %s434_s14 }
  0x84   : > { %v193_v16 = vpop.permute.xlu1 %192  ;;  %v189_v17 = vpop.permute.xlu0 %188 }
  0x85   : > { %v238_v18 = vmax.f32 %v158_v0, %v193_v16  ;;  %v236_v19 = vmax.f32 %v156_v1, %v189_v17 }
  0x87   : > { %v256_v24 = vsel %vm252_vm0, %v238_v18, -inf  ;;  %v253_v25 = vsel %vm252_vm0, %v236_v19, -inf }
  0x88   : > { %v195_v20 = vpop.permute.xlu1 %194  ;;  %v191_v21 = vpop.permute.xlu0 %190 }
  0x89   : > { %v239_v22 = vmax.f32 %v159_v2, %v195_v20  ;;  %v237_v23 = vmax.f32 %v157_v3, %v191_v21 }
  0x8b   : > { %v257_v26 = vsel %vm252_vm0, %v239_v22, -inf  ;;  %v254_v27 = vsel %vm252_vm0, %v237_v23, -inf }
  0x8c   : > { %v258_v28 = vmax.f32 %v256_v24, %v257_v26  ;;  %v255_v29 = vmax.f32 %v253_v25, %v254_v27  ;;  %v199_v30 = vpop.permute.xlu1 %198  ;;  %v197_v31 = vpop.permute.xlu0 %196 }
  0x8d   : > { %v241_v32 = vmax.f32 %v161_v4, %v199_v30  ;;  %v240_v33 = vmax.f32 %v160_v5, %v197_v31 }
  0x8e   : > { %278 = vst.msk [vmem:[%s505_s18 + $0x8] sm:$0xff] %vm252_vm0, %v258_v28  ;;  %277 = vst.msk [vmem:[%s505_s18] sm:$0xff] %vm252_vm0, %v255_v29 }
  0x8f   : > { %v260_v34 = vsel %vm252_vm0, %v241_v32, -inf  ;;  %v259_v35 = vsel %vm252_vm0, %v240_v33, -inf }
  0x90   : > { %v261_v36 = vmax.f32 %v259_v35, %v260_v34  ;;  %v203_v37 = vpop.permute.xlu1 %202  ;;  %v201_v38 = vpop.permute.xlu0 %200 }
  0x91   : > { %v243_v39 = vmax.f32 %v163_v6, %v203_v37  ;;  %v242_v40 = vmax.f32 %v162_v7, %v201_v38 }
  0x92   : > { %279 = vst.msk [vmem:[%s505_s18 + $0x10] sm:$0xff] %vm252_vm0, %v261_v36 }
  0x93   : > { %v263_v41 = vsel %vm252_vm0, %v243_v39, -inf  ;;  %v262_v42 = vsel %vm252_vm0, %v242_v40, -inf }
  0x94   : > { %v264_v43 = vmax.f32 %v262_v42, %v263_v41  ;;  %v207_v44 = vpop.permute.xlu1 %206  ;;  %v205_v45 = vpop.permute.xlu0 %204 }
  0x95   : > { %v245_v46 = vmax.f32 %v165_v8, %v207_v44  ;;  %v244_v47 = vmax.f32 %v164_v9, %v205_v45 }
  0x96   : > { %280 = vst.msk [vmem:[%s505_s18 + $0x18] sm:$0xff] %vm252_vm0, %v264_v43 }
  0x97   : > { %v266_v48 = vsel %vm252_vm0, %v245_v46, -inf  ;;  %v265_v49 = vsel %vm252_vm0, %v244_v47, -inf }
  0x98   : > { %v267_v50 = vmax.f32 %v265_v49, %v266_v48  ;;  %v211_v51 = vpop.permute.xlu1 %210  ;;  %v209_v52 = vpop.permute.xlu0 %208 }
  0x99   : > { %v247_v53 = vmax.f32 %v167_v10, %v211_v51  ;;  %v246_v54 = vmax.f32 %v166_v11, %v209_v52 }
  0x9a   : > { %281 = vst.msk [vmem:[%s505_s18 + $0x20] sm:$0xff] %vm252_vm0, %v267_v50 }
  0x9b   : > { %v269_v55 = vsel %vm252_vm0, %v247_v53, -inf  ;;  %v268_v56 = vsel %vm252_vm0, %v246_v54, -inf }
  0x9c   : > { %v270_v57 = vmax.f32 %v268_v56, %v269_v55  ;;  %v215_v58 = vpop.permute.xlu1 %214  ;;  %v213_v59 = vpop.permute.xlu0 %212 }
  0x9d   : > { %v249_v60 = vmax.f32 %v484_v12, %v215_v58  ;;  %v248_v61 = vmax.f32 %v487_v13, %v213_v59 }
  0x9e   : > { %282 = vst.msk [vmem:[%s505_s18 + $0x28] sm:$0xff] %vm252_vm0, %v270_v57 }
  0x9f   : > { %v272_v62 = vsel %vm252_vm0, %v249_v60, -inf  ;;  %v271_v63 = vsel %vm252_vm0, %v248_v61, -inf }
  0xa0   : > { %v273_v0 = vmax.f32 %v271_v63, %v272_v62  ;;  %v219_v1 = vpop.permute.xlu1 %218  ;;  %v217_v2 = vpop.permute.xlu0 %216 }
  0xa1   : > { %v251_v3 = vmax.f32 %v492_v14, %v219_v1  ;;  %v250_v4 = vmax.f32 %v495_v15, %v217_v2 }
  0xa2   : > { %283 = vst.msk [vmem:[%s505_s18 + $0x30] sm:$0xff] %vm252_vm0, %v273_v0 }
  0xa3   : > { %v275_v5 = vsel %vm252_vm0, %v251_v3, -inf  ;;  %v274_v6 = vsel %vm252_vm0, %v250_v4, -inf }
  0xa4   : > { %v276_v7 = vmax.f32 %v274_v6, %v275_v5 }
  0xa6   : > { %284 = vst.msk [vmem:[%s505_s18 + $0x38] sm:$0xff] %vm252_vm0, %v276_v7 }
  0xa7 PF: > { %s11_s8 = sadd.s32 1, %s432_s8   ;;  %s552_s6 = smov %s428_s7 }
  0xa8   : > { %p8_p5 = scmp.ge.s32.totalorder %s11_s8, 6   ;;  %s553_s7 = smov %s555_s9 }
  0xaa   :  { %10 = sbr.rel (!%p8_p5) target bundleno = 2 (0x2), region = 54 }

// kernel: perceptual_loss.9
= control target key start
LH: loop header
LB: loop body
LE: loop exit
PB: predicated region body
PF: predicated region fallthrough
CT: control target
= control target key end

     0   :  { %7 = vsyncpa [#allocation3], 0  ;;  %vm16_vm0 = vcmask 0   ;;  %v464_v0 = vmov 0.0   ;;  %vm275_vm1 = vcmask 523264   ;;  %s944_s0 = inlined_call_operand.vmem [shape: f32[512,64], index: 0, kind: input, shape index: {}]   ;;  %s945_s1 = inlined_call_operand.vmem [shape: f32[512,64], index: 1, kind: input, shape index: {}]   ;;  %s946_s2 = inlined_call_operand.hbm [shape: f32[1,1], index: 2, kind: output, shape index: {}]  }
   0x1   :  { %17 = vst.msk [vmem:[#allocation2] sm:$0x1] %vm16_vm0, %v464_v0  ;;  %v18_v1 = vld [vmem:[%s944_s0] sm:$0xff]  ;;  %v19_v2 = vld [vmem:[%s944_s0 + $0x8] sm:$0xff]  ;;  %v20_v3 = vld [vmem:[%s944_s0 + $0x10] sm:$0xff] }
   0x2   :  { %v82_v4 = vld [vmem:[%s945_s1] sm:$0xff]  ;;  %v83_v5 = vld [vmem:[%s945_s1 + $0x8] sm:$0xff]  ;;  %v84_v6 = vld [vmem:[%s945_s1 + $0x10] sm:$0xff] }
   0x3   :  { %v21_v7 = vld [vmem:[%s944_s0 + $0x18] sm:$0xff]  ;;  %v146_v9 = vsub.f32 %v18_v1, %v82_v4  ;;  %v147_v10 = vsub.f32 %v19_v2, %v83_v5  ;;  %v148_v11 = vsub.f32 %v20_v3, %v84_v6  ;;  %v22_v12 = vld [vmem:[%s944_s0 + $0x20] sm:$0xff]  ;;  %v23_v15 = vld [vmem:[%s944_s0 + $0x28] sm:$0xff] }
   0x4   :  { %v85_v8 = vld [vmem:[%s945_s1 + $0x18] sm:$0xff]  ;;  %v86_v13 = vld [vmem:[%s945_s1 + $0x20] sm:$0xff]  ;;  %v87_v16 = vld [vmem:[%s945_s1 + $0x28] sm:$0xff] }
   0x5   :  { %v149_v14 = vsub.f32 %v21_v7, %v85_v8  ;;  %v24_v17 = vld [vmem:[%s944_s0 + $0x30] sm:$0xff]  ;;  %v150_v19 = vsub.f32 %v22_v12, %v86_v13  ;;  %v211_v20 = vmul.f32 %v146_v9, %v146_v9  ;;  %v212_v21 = vmul.f32 %v147_v10, %v147_v10  ;;  %v25_v25 = vld [vmem:[%s944_s0 + $0x38] sm:$0xff]  ;;  %v26_v32 = vld [vmem:[%s944_s0 + $0x40] sm:$0xff] }
   0x6   :  { %v88_v18 = vld [vmem:[%s945_s1 + $0x30] sm:$0xff]  ;;  %v213_v22 = vmul.f32 %v148_v11, %v148_v11  ;;  %v151_v23 = vsub.f32 %v23_v15, %v87_v16  ;;  %v89_v26 = vld [vmem:[%s945_s1 + $0x38] sm:$0xff]  ;;  %v90_v33 = vld [vmem:[%s945_s1 + $0x40] sm:$0xff] }
   0x7   :  { %v214_v24 = vmul.f32 %v149_v14, %v149_v14  ;;  %v152_v27 = vsub.f32 %v24_v17, %v88_v18  ;;  %v215_v28 = vmul.f32 %v150_v19, %v150_v19  ;;  %v276_v29 = vsel %vm275_vm1, %v211_v20, 0.0  ;;  %v27_v38 = vld [vmem:[%s944_s0 + $0x48] sm:$0xff]  ;;  %v28_v44 = vld [vmem:[%s944_s0 + $0x50] sm:$0xff]  ;;  %v29_v50 = vld [vmem:[%s944_s0 + $0x58] sm:$0xff] }
   0x8   :  { %v277_v30 = vsel %vm275_vm1, %v212_v21, 0.0  ;;  %v279_v31 = vsel %vm275_vm1, %v213_v22, 0.0  ;;  %v153_v35 = vsub.f32 %v25_v25, %v89_v26  ;;  %v216_v36 = vmul.f32 %v151_v23, %v151_v23  ;;  %v91_v39 = vld [vmem:[%s945_s1 + $0x48] sm:$0xff]  ;;  %v92_v45 = vld [vmem:[%s945_s1 + $0x50] sm:$0xff]  ;;  %v93_v51 = vld [vmem:[%s945_s1 + $0x58] sm:$0xff] }
   0x9   :  { %v278_v34 = vadd.f32 %v277_v30, %v276_v29  ;;  %v281_v37 = vsel %vm275_vm1, %v214_v24, 0.0  ;;  %v154_v41 = vsub.f32 %v26_v32, %v90_v33  ;;  %v217_v42 = vmul.f32 %v152_v27, %v152_v27  ;;  %v30_v56 = vld [vmem:[%s944_s0 + $0x60] sm:$0xff]  ;;  %v31_v62 = vld [vmem:[%s944_s0 + $0x68] sm:$0xff]  ;;  %v32_v4 = vld [vmem:[%s944_s0 + $0x70] sm:$0xff] }
   0xa   :  { %v283_v43 = vsel %vm275_vm1, %v215_v28, 0.0  ;;  %v155_v47 = vsub.f32 %v27_v38, %v91_v39  ;;  %v218_v48 = vmul.f32 %v153_v35, %v153_v35  ;;  %v285_v49 = vsel %vm275_vm1, %v216_v36, 0.0  ;;  %v94_v57 = vld [vmem:[%s945_s1 + $0x60] sm:$0xff]  ;;  %v95_v63 = vld [vmem:[%s945_s1 + $0x68] sm:$0xff]  ;;  %v96_v5 = vld [vmem:[%s945_s1 + $0x70] sm:$0xff] }
   0xb   :  { %v280_v40 = vadd.f32 %v279_v31, %v278_v34  ;;  %v156_v53 = vsub.f32 %v28_v44, %v92_v45  ;;  %v219_v54 = vmul.f32 %v154_v41, %v154_v41  ;;  %v287_v55 = vsel %vm275_vm1, %v217_v42, 0.0  ;;  %v33_v10 = vld [vmem:[%s944_s0 + $0x78] sm:$0xff]  ;;  %v34_v16 = vld [vmem:[%s944_s0 + $0x80] sm:$0xff]  ;;  %v35_v22 = vld [vmem:[%s944_s0 + $0x88] sm:$0xff] }
   0xc   :  { %v157_v59 = vsub.f32 %v29_v50, %v93_v51  ;;  %v220_v60 = vmul.f32 %v155_v47, %v155_v47  ;;  %v289_v61 = vsel %vm275_vm1, %v218_v48, 0.0  ;;  %v158_v1 = vsub.f32 %v30_v56, %v94_v57  ;;  %v97_v11 = vld [vmem:[%s945_s1 + $0x78] sm:$0xff]  ;;  %v98_v17 = vld [vmem:[%s945_s1 + $0x80] sm:$0xff]  ;;  %v99_v23 = vld [vmem:[%s945_s1 + $0x88] sm:$0xff] }
   0xd   :  { %v282_v46 = vadd.f32 %v281_v37, %v280_v40  ;;  %v221_v2 = vmul.f32 %v156_v53, %v156_v53  ;;  %v291_v3 = vsel %vm275_vm1, %v219_v54, 0.0  ;;  %v159_v7 = vsub.f32 %v31_v62, %v95_v63  ;;  %v36_v28 = vld [vmem:[%s944_s0 + $0x90] sm:$0xff]  ;;  %v37_v34 = vld [vmem:[%s944_s0 + $0x98] sm:$0xff]  ;;  %v38_v40 = vld [vmem:[%s944_s0 + $0xa0] sm:$0xff] }
   0xe   :  { %v222_v8 = vmul.f32 %v157_v59, %v157_v59  ;;  %v293_v9 = vsel %vm275_vm1, %v220_v60, 0.0  ;;  %v160_v13 = vsub.f32 %v32_v4, %v96_v5  ;;  %v223_v14 = vmul.f32 %v158_v1, %v158_v1  ;;  %v100_v29 = vld [vmem:[%s945_s1 + $0x90] sm:$0xff]  ;;  %v101_v35 = vld [vmem:[%s945_s1 + $0x98] sm:$0xff]  ;;  %v102_v41 = vld [vmem:[%s945_s1 + $0xa0] sm:$0xff] }
   0xf   :  { %v284_v52 = vadd.f32 %v283_v43, %v282_v46  ;;  %v295_v15 = vsel %vm275_vm1, %v221_v2, 0.0  ;;  %v161_v19 = vsub.f32 %v33_v10, %v97_v11  ;;  %v224_v20 = vmul.f32 %v159_v7, %v159_v7  ;;  %v39_v46 = vld [vmem:[%s944_s0 + $0xa8] sm:$0xff]  ;;  %v104_v53 = vld [vmem:[%s945_s1 + $0xb0] sm:$0xff]  ;;  %v105_v59 = vld [vmem:[%s945_s1 + $0xb8] sm:$0xff] }
  0x10   :  { %v297_v21 = vsel %vm275_vm1, %v222_v8, 0.0  ;;  %v162_v25 = vsub.f32 %v34_v16, %v98_v17  ;;  %v225_v26 = vmul.f32 %v160_v13, %v160_v13  ;;  %v299_v27 = vsel %vm275_vm1, %v223_v14, 0.0  ;;  %v103_v47 = vld [vmem:[%s945_s1 + $0xa8] sm:$0xff]  ;;  %v106_v1 = vld [vmem:[%s945_s1 + $0xc0] sm:$0xff]  ;;  %v108_v13 = vld [vmem:[%s945_s1 + $0xd0] sm:$0xff] }
  0x11   :  { %v286_v58 = vadd.f32 %v285_v49, %v284_v52  ;;  %v163_v31 = vsub.f32 %v35_v22, %v99_v23  ;;  %v226_v32 = vmul.f32 %v161_v19, %v161_v19  ;;  %v301_v33 = vsel %vm275_vm1, %v224_v20, 0.0  ;;  %v40_v52 = vld [vmem:[%s944_s0 + $0xb0] sm:$0xff]  ;;  %v107_v7 = vld [vmem:[%s945_s1 + $0xc8] sm:$0xff]  ;;  %v109_v19 = vld [vmem:[%s945_s1 + $0xd8] sm:$0xff] }
  0x12   :  { %v164_v37 = vsub.f32 %v36_v28, %v100_v29  ;;  %v227_v38 = vmul.f32 %v162_v25, %v162_v25  ;;  %v303_v39 = vsel %vm275_vm1, %v225_v26, 0.0  ;;  %v165_v43 = vsub.f32 %v37_v34, %v101_v35  ;;  %v110_v25 = vld [vmem:[%s945_s1 + $0xe0] sm:$0xff] }
  0x13   :  { %v288_v0 = vadd.f32 %v287_v55, %v286_v58  ;;  %v228_v44 = vmul.f32 %v163_v31, %v163_v31  ;;  %v305_v45 = vsel %vm275_vm1, %v226_v32, 0.0  ;;  %v166_v49 = vsub.f32 %v38_v40, %v102_v41  ;;  %v41_v58 = vld [vmem:[%s944_s0 + $0xb8] sm:$0xff]  ;;  %v111_v31 = vld [vmem:[%s945_s1 + $0xe8] sm:$0xff] }
  0x14   :  { %v229_v50 = vmul.f32 %v164_v37, %v164_v37  ;;  %v307_v51 = vsel %vm275_vm1, %v227_v38, 0.0  ;;  %v167_v55 = vsub.f32 %v39_v46, %v103_v47  ;;  %v230_v56 = vmul.f32 %v165_v43, %v165_v43  ;;  %v112_v37 = vld [vmem:[%s945_s1 + $0xf0] sm:$0xff]  ;;  %v113_v43 = vld [vmem:[%s945_s1 + $0xf8] sm:$0xff] }
  0x15   :  { %v290_v6 = vadd.f32 %v289_v61, %v288_v0  ;;  %v309_v57 = vsel %vm275_vm1, %v228_v44, 0.0  ;;  %v168_v61 = vsub.f32 %v40_v52, %v104_v53  ;;  %v231_v62 = vmul.f32 %v166_v49, %v166_v49  ;;  %v42_v0 = vld [vmem:[%s944_s0 + $0xc0] sm:$0xff] }
  0x16   :  { %v311_v63 = vsel %vm275_vm1, %v229_v50, 0.0  ;;  %v232_v4 = vmul.f32 %v167_v55, %v167_v55  ;;  %v313_v5 = vsel %vm275_vm1, %v230_v56, 0.0  ;;  %v114_v49 = vld [vmem:[%s945_s1 + $0x100] sm:$0xff]  ;;  %v115_v55 = vld [vmem:[%s945_s1 + $0x108] sm:$0xff] }
  0x17   :  { %v292_v12 = vadd.f32 %v291_v3, %v290_v6  ;;  %v169_v3 = vsub.f32 %v41_v58, %v105_v59  ;;  %v43_v6 = vld [vmem:[%s944_s0 + $0xc8] sm:$0xff]  ;;  %v233_v10 = vmul.f32 %v168_v61, %v168_v61  ;;  %v315_v11 = vsel %vm275_vm1, %v231_v62, 0.0  ;;  %v116_v61 = vld [vmem:[%s945_s1 + $0x110] sm:$0xff] }
  0x18   :  { %v317_v17 = vsel %vm275_vm1, %v232_v4, 0.0 }
  0x19   :  { %v294_v18 = vadd.f32 %v293_v9, %v292_v12  ;;  %v170_v9 = vsub.f32 %v42_v0, %v106_v1  ;;  %v44_v12 = vld [vmem:[%s944_s0 + $0xd0] sm:$0xff]  ;;  %v234_v16 = vmul.f32 %v169_v3, %v169_v3  ;;  %v319_v23 = vsel %vm275_vm1, %v233_v10, 0.0  ;;  %v117_v3 = vld [vmem:[%s945_s1 + $0x118] sm:$0xff] }
  0x1b   :  { %v296_v24 = vadd.f32 %v295_v15, %v294_v18  ;;  %v171_v15 = vsub.f32 %v43_v6, %v107_v7  ;;  %v45_v18 = vld [vmem:[%s944_s0 + $0xd8] sm:$0xff]  ;;  %v235_v22 = vmul.f32 %v170_v9, %v170_v9  ;;  %v321_v29 = vsel %vm275_vm1, %v234_v16, 0.0  ;;  %v118_v9 = vld [vmem:[%s945_s1 + $0x120] sm:$0xff] }
  0x1d   :  { %v298_v30 = vadd.f32 %v297_v21, %v296_v24  ;;  %v172_v21 = vsub.f32 %v44_v12, %v108_v13  ;;  %v46_v24 = vld [vmem:[%s944_s0 + $0xe0] sm:$0xff]  ;;  %v236_v28 = vmul.f32 %v171_v15, %v171_v15  ;;  %v323_v35 = vsel %vm275_vm1, %v235_v22, 0.0  ;;  %v119_v15 = vld [vmem:[%s945_s1 + $0x128] sm:$0xff] }
  0x1f   :  { %v300_v36 = vadd.f32 %v299_v27, %v298_v30  ;;  %v173_v27 = vsub.f32 %v45_v18, %v109_v19  ;;  %v47_v30 = vld [vmem:[%s944_s0 + $0xe8] sm:$0xff]  ;;  %v237_v34 = vmul.f32 %v172_v21, %v172_v21  ;;  %v325_v41 = vsel %vm275_vm1, %v236_v28, 0.0  ;;  %v120_v21 = vld [vmem:[%s945_s1 + $0x130] sm:$0xff] }
  0x21   :  { %v302_v42 = vadd.f32 %v301_v33, %v300_v36  ;;  %v174_v33 = vsub.f32 %v46_v24, %v110_v25  ;;  %v48_v36 = vld [vmem:[%s944_s0 + $0xf0] sm:$0xff]  ;;  %v238_v40 = vmul.f32 %v173_v27, %v173_v27  ;;  %v327_v47 = vsel %vm275_vm1, %v237_v34, 0.0  ;;  %v121_v27 = vld [vmem:[%s945_s1 + $0x138] sm:$0xff] }
  0x23   :  { %v304_v48 = vadd.f32 %v303_v39, %v302_v42  ;;  %v175_v39 = vsub.f32 %v47_v30, %v111_v31  ;;  %v49_v42 = vld [vmem:[%s944_s0 + $0xf8] sm:$0xff]  ;;  %v239_v46 = vmul.f32 %v174_v33, %v174_v33  ;;  %v329_v53 = vsel %vm275_vm1, %v238_v40, 0.0  ;;  %v122_v33 = vld [vmem:[%s945_s1 + $0x140] sm:$0xff] }
  0x25   :  { %v306_v54 = vadd.f32 %v305_v45, %v304_v48  ;;  %v176_v45 = vsub.f32 %v48_v36, %v112_v37  ;;  %v50_v48 = vld [vmem:[%s944_s0 + $0x100] sm:$0xff]  ;;  %v240_v52 = vmul.f32 %v175_v39, %v175_v39  ;;  %v331_v59 = vsel %vm275_vm1, %v239_v46, 0.0  ;;  %v123_v39 = vld [vmem:[%s945_s1 + $0x148] sm:$0xff] }
  0x27   :  { %v308_v60 = vadd.f32 %v307_v51, %v306_v54  ;;  %v177_v51 = vsub.f32 %v49_v42, %v113_v43  ;;  %v51_v54 = vld [vmem:[%s944_s0 + $0x108] sm:$0xff]  ;;  %v241_v58 = vmul.f32 %v176_v45, %v176_v45  ;;  %v333_v1 = vsel %vm275_vm1, %v240_v52, 0.0  ;;  %v124_v45 = vld [vmem:[%s945_s1 + $0x150] sm:$0xff] }
  0x29   :  { %v310_v2 = vadd.f32 %v309_v57, %v308_v60  ;;  %v178_v57 = vsub.f32 %v50_v48, %v114_v49  ;;  %v52_v60 = vld [vmem:[%s944_s0 + $0x110] sm:$0xff]  ;;  %v242_v0 = vmul.f32 %v177_v51, %v177_v51  ;;  %v335_v7 = vsel %vm275_vm1, %v241_v58, 0.0  ;;  %v125_v51 = vld [vmem:[%s945_s1 + $0x158] sm:$0xff] }
  0x2b   :  { %v312_v8 = vadd.f32 %v311_v63, %v310_v2  ;;  %v179_v63 = vsub.f32 %v51_v54, %v115_v55  ;;  %v53_v2 = vld [vmem:[%s944_s0 + $0x118] sm:$0xff]  ;;  %v243_v6 = vmul.f32 %v178_v57, %v178_v57  ;;  %v337_v13 = vsel %vm275_vm1, %v242_v0, 0.0  ;;  %v126_v57 = vld [vmem:[%s945_s1 + $0x160] sm:$0xff] }
  0x2d   :  { %v314_v14 = vadd.f32 %v313_v5, %v312_v8  ;;  %v180_v5 = vsub.f32 %v52_v60, %v116_v61  ;;  %v54_v8 = vld [vmem:[%s944_s0 + $0x120] sm:$0xff]  ;;  %v244_v12 = vmul.f32 %v179_v63, %v179_v63  ;;  %v339_v19 = vsel %vm275_vm1, %v243_v6, 0.0  ;;  %v127_v63 = vld [vmem:[%s945_s1 + $0x168] sm:$0xff] }
  0x2f   :  { %v316_v20 = vadd.f32 %v315_v11, %v314_v14  ;;  %v181_v11 = vsub.f32 %v53_v2, %v117_v3  ;;  %v55_v14 = vld [vmem:[%s944_s0 + $0x128] sm:$0xff]  ;;  %v245_v18 = vmul.f32 %v180_v5, %v180_v5  ;;  %v341_v25 = vsel %vm275_vm1, %v244_v12, 0.0  ;;  %v128_v5 = vld [vmem:[%s945_s1 + $0x170] sm:$0xff] }
  0x31   :  { %v318_v26 = vadd.f32 %v317_v17, %v316_v20  ;;  %v182_v17 = vsub.f32 %v54_v8, %v118_v9  ;;  %v56_v20 = vld [vmem:[%s944_s0 + $0x130] sm:$0xff]  ;;  %v246_v24 = vmul.f32 %v181_v11, %v181_v11  ;;  %v343_v31 = vsel %vm275_vm1, %v245_v18, 0.0  ;;  %v129_v11 = vld [vmem:[%s945_s1 + $0x178] sm:$0xff] }
  0x33   :  { %v320_v32 = vadd.f32 %v319_v23, %v318_v26  ;;  %v183_v23 = vsub.f32 %v55_v14, %v119_v15  ;;  %v57_v26 = vld [vmem:[%s944_s0 + $0x138] sm:$0xff]  ;;  %v247_v30 = vmul.f32 %v182_v17, %v182_v17  ;;  %v345_v37 = vsel %vm275_vm1, %v246_v24, 0.0  ;;  %v130_v17 = vld [vmem:[%s945_s1 + $0x180] sm:$0xff] }
  0x35   :  { %v322_v38 = vadd.f32 %v321_v29, %v320_v32  ;;  %v184_v29 = vsub.f32 %v56_v20, %v120_v21  ;;  %v58_v32 = vld [vmem:[%s944_s0 + $0x140] sm:$0xff]  ;;  %v248_v36 = vmul.f32 %v183_v23, %v183_v23  ;;  %v347_v43 = vsel %vm275_vm1, %v247_v30, 0.0  ;;  %v131_v23 = vld [vmem:[%s945_s1 + $0x188] sm:$0xff] }
  0x37   :  { %v324_v44 = vadd.f32 %v323_v35, %v322_v38  ;;  %v185_v35 = vsub.f32 %v57_v26, %v121_v27  ;;  %v59_v38 = vld [vmem:[%s944_s0 + $0x148] sm:$0xff]  ;;  %v249_v42 = vmul.f32 %v184_v29, %v184_v29  ;;  %v349_v49 = vsel %vm275_vm1, %v248_v36, 0.0  ;;  %v132_v29 = vld [vmem:[%s945_s1 + $0x190] sm:$0xff] }
  0x39   :  { %v326_v50 = vadd.f32 %v325_v41, %v324_v44  ;;  %v186_v41 = vsub.f32 %v58_v32, %v122_v33  ;;  %v60_v44 = vld [vmem:[%s944_s0 + $0x150] sm:$0xff]  ;;  %v250_v48 = vmul.f32 %v185_v35, %v185_v35  ;;  %v351_v55 = vsel %vm275_vm1, %v249_v42, 0.0  ;;  %v133_v35 = vld [vmem:[%s945_s1 + $0x198] sm:$0xff] }
  0x3b   :  { %v328_v56 = vadd.f32 %v327_v47, %v326_v50  ;;  %v187_v47 = vsub.f32 %v59_v38, %v123_v39  ;;  %v61_v50 = vld [vmem:[%s944_s0 + $0x158] sm:$0xff]  ;;  %v251_v54 = vmul.f32 %v186_v41, %v186_v41  ;;  %v353_v61 = vsel %vm275_vm1, %v250_v48, 0.0  ;;  %v134_v41 = vld [vmem:[%s945_s1 + $0x1a0] sm:$0xff] }
  0x3d   :  { %v330_v62 = vadd.f32 %v329_v53, %v328_v56  ;;  %v188_v53 = vsub.f32 %v60_v44, %v124_v45  ;;  %v62_v56 = vld [vmem:[%s944_s0 + $0x160] sm:$0xff]  ;;  %v252_v60 = vmul.f32 %v187_v47, %v187_v47  ;;  %v355_v3 = vsel %vm275_vm1, %v251_v54, 0.0  ;;  %v135_v47 = vld [vmem:[%s945_s1 + $0x1a8] sm:$0xff] }
  0x3f   :  { %v332_v4 = vadd.f32 %v331_v59, %v330_v62  ;;  %v189_v59 = vsub.f32 %v61_v50, %v125_v51  ;;  %v63_v62 = vld [vmem:[%s944_s0 + $0x168] sm:$0xff]  ;;  %v253_v2 = vmul.f32 %v188_v53, %v188_v53  ;;  %v357_v9 = vsel %vm275_vm1, %v252_v60, 0.0  ;;  %v136_v53 = vld [vmem:[%s945_s1 + $0x1b0] sm:$0xff] }
  0x41   :  { %v334_v10 = vadd.f32 %v333_v1, %v332_v4  ;;  %v190_v1 = vsub.f32 %v62_v56, %v126_v57  ;;  %v64_v4 = vld [vmem:[%s944_s0 + $0x170] sm:$0xff]  ;;  %v254_v8 = vmul.f32 %v189_v59, %v189_v59  ;;  %v359_v15 = vsel %vm275_vm1, %v253_v2, 0.0  ;;  %v137_v59 = vld [vmem:[%s945_s1 + $0x1b8] sm:$0xff] }
  0x43   :  { %v336_v16 = vadd.f32 %v335_v7, %v334_v10  ;;  %v191_v7 = vsub.f32 %v63_v62, %v127_v63  ;;  %v65_v10 = vld [vmem:[%s944_s0 + $0x178] sm:$0xff]  ;;  %v255_v14 = vmul.f32 %v190_v1, %v190_v1  ;;  %v361_v21 = vsel %vm275_vm1, %v254_v8, 0.0  ;;  %v138_v1 = vld [vmem:[%s945_s1 + $0x1c0] sm:$0xff] }
  0x45   :  { %v338_v22 = vadd.f32 %v337_v13, %v336_v16  ;;  %v192_v13 = vsub.f32 %v64_v4, %v128_v5  ;;  %v66_v16 = vld [vmem:[%s944_s0 + $0x180] sm:$0xff]  ;;  %v256_v20 = vmul.f32 %v191_v7, %v191_v7  ;;  %v363_v27 = vsel %vm275_vm1, %v255_v14, 0.0  ;;  %v139_v7 = vld [vmem:[%s945_s1 + $0x1c8] sm:$0xff] }
  0x47   :  { %v340_v28 = vadd.f32 %v339_v19, %v338_v22  ;;  %v193_v19 = vsub.f32 %v65_v10, %v129_v11  ;;  %v67_v22 = vld [vmem:[%s944_s0 + $0x188] sm:$0xff]  ;;  %v257_v26 = vmul.f32 %v192_v13, %v192_v13  ;;  %v365_v33 = vsel %vm275_vm1, %v256_v20, 0.0  ;;  %v140_v13 = vld [vmem:[%s945_s1 + $0x1d0] sm:$0xff] }
  0x49   :  { %v342_v34 = vadd.f32 %v341_v25, %v340_v28  ;;  %v194_v25 = vsub.f32 %v66_v16, %v130_v17  ;;  %v68_v28 = vld [vmem:[%s944_s0 + $0x190] sm:$0xff]  ;;  %v258_v32 = vmul.f32 %v193_v19, %v193_v19  ;;  %v367_v39 = vsel %vm275_vm1, %v257_v26, 0.0  ;;  %v141_v19 = vld [vmem:[%s945_s1 + $0x1d8] sm:$0xff] }
  0x4b   :  { %v344_v40 = vadd.f32 %v343_v31, %v342_v34  ;;  %v195_v31 = vsub.f32 %v67_v22, %v131_v23  ;;  %v69_v34 = vld [vmem:[%s944_s0 + $0x198] sm:$0xff]  ;;  %v259_v38 = vmul.f32 %v194_v25, %v194_v25  ;;  %v369_v45 = vsel %vm275_vm1, %v258_v32, 0.0  ;;  %v142_v25 = vld [vmem:[%s945_s1 + $0x1e0] sm:$0xff] }
  0x4d   :  { %v346_v46 = vadd.f32 %v345_v37, %v344_v40  ;;  %v196_v37 = vsub.f32 %v68_v28, %v132_v29  ;;  %v70_v40 = vld [vmem:[%s944_s0 + $0x1a0] sm:$0xff]  ;;  %v260_v44 = vmul.f32 %v195_v31, %v195_v31  ;;  %v371_v51 = vsel %vm275_vm1, %v259_v38, 0.0  ;;  %v143_v31 = vld [vmem:[%s945_s1 + $0x1e8] sm:$0xff] }
  0x4f   :  { %v348_v52 = vadd.f32 %v347_v43, %v346_v46  ;;  %v197_v43 = vsub.f32 %v69_v34, %v133_v35  ;;  %v71_v46 = vld [vmem:[%s944_s0 + $0x1a8] sm:$0xff]  ;;  %v261_v50 = vmul.f32 %v196_v37, %v196_v37  ;;  %v373_v57 = vsel %vm275_vm1, %v260_v44, 0.0  ;;  %v144_v37 = vld [vmem:[%s945_s1 + $0x1f0] sm:$0xff] }
  0x51   :  { %v350_v58 = vadd.f32 %v349_v49, %v348_v52  ;;  %v198_v49 = vsub.f32 %v70_v40, %v134_v41  ;;  %v72_v52 = vld [vmem:[%s944_s0 + $0x1b0] sm:$0xff]  ;;  %v262_v56 = vmul.f32 %v197_v43, %v197_v43  ;;  %v375_v63 = vsel %vm275_vm1, %v261_v50, 0.0  ;;  %v145_v43 = vld [vmem:[%s945_s1 + $0x1f8] sm:$0xff]  ;;  %s465_s1 = smov [#allocation2]  }
  0x52   :  { %s428_s13 = sshll.u32 %s465_s1, 4  ;;  %s429_s13 = int_to_ptr.vmem [resolvable:$true] %s428_s13 }
  0x53   :  { %v352_v0 = vadd.f32 %v351_v55, %v350_v58  ;;  %v199_v55 = vsub.f32 %v71_v46, %v135_v47  ;;  %v73_v58 = vld [vmem:[%s944_s0 + $0x1b8] sm:$0xff]  ;;  %v263_v62 = vmul.f32 %v198_v49, %v198_v49  ;;  %v377_v5 = vsel %vm275_vm1, %v262_v56, 0.0  ;;  %s440_s14 = scalar_lea.vmem %s429_s13, 16  ;;  %s444_s15 = scalar_lea.vmem %s429_s13, 32 }
  0x54   :  { %p441_p0 = scmp.ne.s32.totalorder %s429_s13, %s440_s14  ;;  %p445_p1 = scmp.lt.s32.totalorder %s429_s13, %s429_s13 }
  0x55   :  { %v354_v6 = vadd.f32 %v353_v61, %v352_v0  ;;  %v200_v61 = vsub.f32 %v72_v52, %v136_v53  ;;  %v74_v0 = vld [vmem:[%s944_s0 + $0x1c0] sm:$0xff]  ;;  %v264_v4 = vmul.f32 %v199_v55, %v199_v55  ;;  %v379_v11 = vsel %vm275_vm1, %v263_v62, 0.0  ;;  %p446_p2 = scmp.lt.s32.totalorder %s444_s15, %s440_s14 }
  0x57   :  { %v356_v12 = vadd.f32 %v355_v3, %v354_v6  ;;  %v201_v3 = vsub.f32 %v73_v58, %v137_v59  ;;  %v75_v6 = vld [vmem:[%s944_s0 + $0x1c8] sm:$0xff]  ;;  %v265_v10 = vmul.f32 %v200_v61, %v200_v61  ;;  %v381_v17 = vsel %vm275_vm1, %v264_v4, 0.0  ;;  %p447_p3 = por %p446_p2, %p445_p1 }
  0x59   :  { %v358_v18 = vadd.f32 %v357_v9, %v356_v12  ;;  %v202_v9 = vsub.f32 %v74_v0, %v138_v1  ;;  %v76_v12 = vld [vmem:[%s944_s0 + $0x1d0] sm:$0xff]  ;;  %v266_v16 = vmul.f32 %v201_v3, %v201_v3  ;;  %v383_v23 = vsel %vm275_vm1, %v265_v10, 0.0  ;;  %p448_p4 = pnand %p447_p3, %p441_p0 }
  0x5b   :  { %v360_v24 = vadd.f32 %v359_v15, %v358_v18  ;;  %v203_v15 = vsub.f32 %v75_v6, %v139_v7  ;;  %v77_v18 = vld [vmem:[%s944_s0 + $0x1d8] sm:$0xff]  ;;  %v267_v22 = vmul.f32 %v202_v9, %v202_v9  ;;  %v385_v29 = vsel %vm275_vm1, %v266_v16, 0.0  ;;  %v210_v7 = vld [vmem:[#allocation2] sm:$0x1] }
  0x5d   :  { %v362_v30 = vadd.f32 %v361_v21, %v360_v24  ;;  %v204_v21 = vsub.f32 %v76_v12, %v140_v13  ;;  %v78_v24 = vld [vmem:[%s944_s0 + $0x1e0] sm:$0xff]  ;;  %v268_v28 = vmul.f32 %v203_v15, %v203_v15  ;;  %v387_v35 = vsel %vm275_vm1, %v267_v22, 0.0 }
  0x5f   :  { %v364_v36 = vadd.f32 %v363_v27, %v362_v30  ;;  %v205_v27 = vsub.f32 %v77_v18, %v141_v19  ;;  %v79_v30 = vld [vmem:[%s944_s0 + $0x1e8] sm:$0xff]  ;;  %v269_v34 = vmul.f32 %v204_v21, %v204_v21  ;;  %v389_v41 = vsel %vm275_vm1, %v268_v28, 0.0 }
  0x61   :  { %v366_v42 = vadd.f32 %v365_v33, %v364_v36  ;;  %v206_v33 = vsub.f32 %v78_v24, %v142_v25  ;;  %v80_v36 = vld [vmem:[%s944_s0 + $0x1f0] sm:$0xff]  ;;  %v270_v40 = vmul.f32 %v205_v27, %v205_v27  ;;  %v391_v47 = vsel %vm275_vm1, %v269_v34, 0.0 }
  0x63   :  { %v368_v48 = vadd.f32 %v367_v39, %v366_v42  ;;  %v207_v39 = vsub.f32 %v79_v30, %v143_v31  ;;  %v81_v42 = vld [vmem:[%s944_s0 + $0x1f8] sm:$0xff]  ;;  %v271_v46 = vmul.f32 %v206_v33, %v206_v33 }
  0x64   :  { %v209_v49 = vsub.f32 %v81_v42, %v145_v43 }
  0x65   :  { %v370_v54 = vadd.f32 %v369_v45, %v368_v48  ;;  %v208_v45 = vsub.f32 %v80_v36, %v144_v37  ;;  %v272_v50 = vmul.f32 %v207_v39, %v207_v39 }
  0x66   :  { %v274_v56 = vmul.f32 %v209_v49, %v209_v49 }
  0x67   :  { %v372_v60 = vadd.f32 %v371_v51, %v370_v54  ;;  %v393_v51 = vsel %vm275_vm1, %v270_v40, 0.0  ;;  %v273_v53 = vmul.f32 %v208_v45, %v208_v45  ;;  %v395_v54 = vsel %vm275_vm1, %v271_v46, 0.0 }
  0x68   :  { %v401_v61 = vsel %vm275_vm1, %v274_v56, 0.0 }
  0x69   :  { %v374_v2 = vadd.f32 %v373_v57, %v372_v60  ;;  %v397_v57 = vsel %vm275_vm1, %v272_v50, 0.0  ;;  %v399_v59 = vsel %vm275_vm1, %v273_v53, 0.0 }
  0x6b   :  { %v376_v8 = vadd.f32 %v375_v63, %v374_v2 }
  0x6d   :  { %v378_v14 = vadd.f32 %v377_v5, %v376_v8 }
  0x6f   :  { %v380_v20 = vadd.f32 %v379_v11, %v378_v14 }
  0x71   :  { %v382_v26 = vadd.f32 %v381_v17, %v380_v20 }
  0x73   :  { %v384_v32 = vadd.f32 %v383_v23, %v382_v26 }
  0x75   :  { %v386_v38 = vadd.f32 %v385_v29, %v384_v32 }
  0x77   :  { %v388_v44 = vadd.f32 %v387_v35, %v386_v38 }
  0x79   :  { %v390_v48 = vadd.f32 %v389_v41, %v388_v44 }
  0x7b   :  { %v392_v52 = vadd.f32 %v391_v47, %v390_v48 }
  0x7d   :  { %v394_v55 = vadd.f32 %v393_v51, %v392_v52 }
  0x7f   :  { %v396_v58 = vadd.f32 %v395_v54, %v394_v55 }
  0x81   :  { %v398_v60 = vadd.f32 %v397_v57, %v396_v58 }
  0x83   :  { %v400_v62 = vadd.f32 %v399_v59, %v398_v60 }
  0x85   :  { %v402_v63 = vadd.f32 %v401_v61, %v400_v62 }
  0x87   :  { %403 = vadd.xlane.f32.xlu0 %v402_v63 }
 0x114   :  { %v404_v0 = vpop.xlane.xlu0 %403 }
 0x115   :  { %v405_v1 = vrot.slane %v404_v0, 4 }
 0x117   :  { %v406_v2 = vadd.f32 %v405_v1, %v404_v0 }
 0x119   :  { %v407_v3 = vrot.slane %v406_v2, 2 }
 0x11b   :  { %v408_v4 = vadd.f32 %v407_v3, %v406_v2 }
 0x11d   :  { %v409_v5 = vrot.slane %v408_v4, 1 }
 0x11f   :  { %v410_v6 = vadd.f32 %v409_v5, %v408_v4 }
 0x121   :  { %436 = vpush %v410_v6 }
 0x152   :  { %s437_s0 = spop %436 }
 0x153   :  { %v412_v8 = vstv %s437_s0 }
 0x154   :  { %v413_v9 = vadd.f32 %v412_v8, %v210_v7 }
 0x156   :  { %415 = vst.msk [vmem:[#allocation2] sm:$0x1] %vm16_vm0, %v413_v9 }
 0x15d   :  { %v419_v10 = vld [vmem:[#allocation2] sm:$0x1] }
 0x15e   :  { %v420_v11 = vmul.f32 3.0517578e-05, %v419_v10 }
 0x160   :  { %421 = vst.msk [vmem:[#allocation2] sm:$0x1] %vm16_vm0, %v420_v11 }
 0x161   :  { %451 = shalt.err (!%p448_p4)
}
 0x162   :  { %s452_s18 = scalar_lea.hbm %s946_s2, 16 }
 0x163   :  { %p453_p5 = scmp.ne.s32.totalorder %s946_s2, %s452_s18  ;;  %p456_p6 = scmp.lt.u32.totalorder %s452_s18, %s946_s2 }
 0x165   :  { %p458_p7 = pnand %p456_p6, %p453_p5 }
 0x167   :  { %461 = shalt.err (!%p458_p7)
}
 0x168   :  { %431 = dma.vmem_to_hbm [thread:$0]  %s429_s13, 16, %s946_s2, [#allocation3]  }
 0x169   :  { %462 = dma.done.wait [#allocation3], 16  }
 0x16a   :  { %463 = vsyncadd [#allocation3], 4294967280 }
 0x16b   :  { %435 = vsyncpa [#allocation3], 1 }

// kernel: perceptual_loss.8
= control target key start
LH: loop header
LB: loop body
LE: loop exit
PB: predicated region body
PF: predicated region fallthrough
CT: control target
= control target key end

     0   :  { %s4589_s12 = smov 0   ;;  %s4591_s13 = smov 0   ;;  %s5376_s0 = inlined_call_operand.vmem [shape: f32[4,18,18,64], index: 0, kind: input, shape index: {}]   ;;  %s5377_s1 = inlined_call_operand.vmem [shape: bf16[9,64,64], index: 1, kind: input, shape index: {}]   ;;  %s5378_s2 = inlined_call_operand.vmem [shape: f32[1,64], index: 2, kind: input, shape index: {}]   ;;  %s5379_s3 = inlined_call_operand.vmem [shape: f32[4,256,64], index: 3, kind: output, shape index: {}]  }
   0x1   :  { %s4593_s14 = smov 0  }
   0x2 LB: > { %s25_s15 = sadd.s32 1, %s4563_s13  ;;  %p3236_p0 = scmp.ge.s32.totalorder %s4567_s14, 1  ;;  %s4567_s14 = sphi %s4593_s14, %s13_s14   ;;  %s4563_s13 = sphi %s4591_s13, %s5381_s13   ;;  %s4559_s12 = sphi %s4589_s12, %s5380_s12  }
   0x3   : > { %p27_p1 = scmp.ge.s32.totalorder %s25_s15, 4  ;;  %p151_p2 = scmp.lt.s32.totalorder %s4567_s14, 5 }
   0x5   : > { %s5383_s15 = smov (%p27_p1, %s25_s15), 0  ;;  %p152_p3 = pnand %p3236_p0, %p151_p2 }
   0x6   : > { %v4509_v0 = vld [vmem:[%s5377_s1 + $0x20] sm:$0xff] (!%p152_p3)   ;;  %p179_p4 = scmp.lt.s32.totalorder (!%p152_p3), %s4559_s12, 3  ;;  %v4511_v2 = vld [vmem:[%s5377_s1 + $0x28] sm:$0xff] (!%p152_p3)   ;;  %v4513_v4 = vld [vmem:[%s5377_s1 + $0x30] sm:$0xff] (!%p152_p3)   ;;  %vm335_vm0 = vcmask (!%p152_p3), 523264  }
   0x7   : > { %155 = sbr.rel (%p152_p3) target bundleno = 526 (0x20e), region = 32  ;;  %v4613_v1 = vld [vmem:[%s5377_s1 + $0x80] sm:$0xff] (!%p152_p3)   ;;  %3860 = vmatprep.subr.bf16.mxu1 (!%p152_p3), %v4509_v0  ;;  %v4624_v3 = vld [vmem:[%s5377_s1 + $0x88] sm:$0xff] (!%p152_p3)   ;;  %v4635_v5 = vld [vmem:[%s5377_s1 + $0x90] sm:$0xff] (!%p152_p3)  }
   0x8   : > { %4020 = vmatprep.subr.bf16.mxu0 (!%p152_p3), %v4613_v1  ;;  %3861 = vmatpush3.bf16.msra.mxu1 (!%p152_p3), %v4509_v0  ;;  %v4515_v6 = vld [vmem:[%s5377_s1 + $0x38] sm:$0xff] (!%p152_p3)   ;;  %v4517_v14 = vld [vmem:[%s5377_s1] sm:$0xff] (!%p152_p3)   ;;  %v4519_v22 = vld [vmem:[%s5377_s1 + $0xa8] sm:$0xff] (!%p152_p3)  }
   0x9   : > { %4021 = vmatpush3.bf16.msra.mxu0 (!%p152_p3), %v4613_v1  ;;  %3862 = vmatprep.subr.bf16.mxu1 (!%p152_p3), %v4511_v2  ;;  %v4648_v7 = vld [vmem:[%s5377_s1 + $0x98] sm:$0xff] (!%p152_p3)   ;;  %v4518_v17 = vld [vmem:[%s5377_s1 + $0xa0] sm:$0xff] (!%p152_p3)   ;;  %v4520_v23 = vld [vmem:[%s5377_s1 + $0x8] sm:$0xff] (!%p152_p3)  }
   0xa   : > { %4022 = vmatprep.subr.bf16.mxu0 (!%p152_p3), %v4624_v3  ;;  %v4521_v28 = vld [vmem:[%s5377_s1 + $0xb0] sm:$0xff] (!%p152_p3)   ;;  %v4522_v32 = vld [vmem:[%s5377_s1 + $0xb8] sm:$0xff] (!%p152_p3)   ;;  %v4524_v37 = vld [vmem:[%s5377_s1 + $0xc0] sm:$0xff] (!%p152_p3)  }
   0xb   : > { %v4523_v29 = vld [vmem:[%s5377_s1 + $0x10] sm:$0xff] (!%p152_p3)   ;;  %v4525_v38 = vld [vmem:[%s5377_s1 + $0x18] sm:$0xff] (!%p152_p3)   ;;  %v4740_v43 = vld [vmem:[%s5377_s1 + $0x40] sm:$0xff] (!%p152_p3)  }
   0xc   : > { %3863 = vmatpush3.bf16.msra.mxu1 (!%p152_p3), %v4511_v2  ;;  %v4526_v61 = vld [vmem:[%s5377_s1 + $0xc8] sm:$0xff] (!%p152_p3)  }
   0xd   : > { %4023 = vmatpush3.bf16.msra.mxu0 (!%p152_p3), %v4624_v3  ;;  %3864 = vmatprep.subr.bf16.mxu1 (!%p152_p3), %v4513_v4 }
   0xe   : > { %s5385_s12 = smov (!%p179_p4, %s4559_s12), 3  ;;  %4024 = vmatprep.subr.bf16.mxu0 %v4635_v5 }
   0xf   : > { %s4484_s26 = smul.u32 432, %s5385_s12 }
  0x10   : > { %3865 = vmatpush3.bf16.msra.mxu1 %v4513_v4 }
  0x11   : > { %s4643_s6 = scalar_lea.vmem %s5376_s0, %s4484_s26  ;;  %4025 = vmatpush3.bf16.msra.mxu0 %v4635_v5  ;;  %3866 = vmatprep.subr.bf16.mxu1 %v4515_v6  ;;  %s3679_s26 = sshll.u32 %s5385_s12, 8 }
  0x12   : > { %v254_v8 = vld [vmem:[%s4643_s6 + $0x1] sm:$0xff]  ;;  %v255_v9 = vld [vmem:[%s4643_s6 + $0x9] sm:$0xff]  ;;  %v3376_v10 = vld [vmem:[%s4643_s6 + $0x19] sm:$0xff]  ;;  %4026 = vmatprep.subr.bf16.mxu0 %v4648_v7  ;;  %s5266_s29 = scalar_lea.vmem %s5379_s3, %s3679_s26 }
  0x13   : > { %v286_v11 = vpack.c.bf16 %v255_v9, %v254_v8  ;;  %v3377_v12 = vld [vmem:[%s4643_s6 + $0x21] sm:$0xff]  ;;  %v3378_v15 = vld [vmem:[%s4643_s6 + $0x31] sm:$0xff]  ;;  %v3379_v16 = vld [vmem:[%s4643_s6 + $0x39] sm:$0xff] }
  0x14   : > { %v1457_v13 = vpack.c.bf16 %v3377_v12, %v3376_v10  ;;  %v3380_v18 = vld [vmem:[%s4643_s6 + $0x49] sm:$0xff]  ;;  %v3381_v19 = vld [vmem:[%s4643_s6 + $0x51] sm:$0xff]  ;;  %3867 = vmatpush3.bf16.msra.mxu1 %v4515_v6  ;;  %v4670_v20 = vpack.c.bf16 %v3379_v16, %v3378_v15  ;;  %v3382_v24 = vld [vmem:[%s4643_s6 + $0x61] sm:$0xff] }
  0x15   : > { %3868 = vmatprep.mubr.msk.bf16.mxu1 %vm335_vm0, %v286_v11  ;;  %4027 = vmatpush3.bf16.msra.mxu0 %v4648_v7  ;;  %v4673_v21 = vpack.c.bf16 %v3381_v19, %v3380_v18  ;;  %v3383_v25 = vld [vmem:[%s4643_s6 + $0x69] sm:$0xff]  ;;  %v3384_v26 = vld [vmem:[%s4643_s6 + $0x79] sm:$0xff]  ;;  %v3385_v27 = vld [vmem:[%s4643_s6 + $0x81] sm:$0xff] }
  0x16   : > { %4028 = vmatprep.mubr.msk.bf16.mxu0 %vm335_vm0, %v1457_v13  ;;  %3900 = vmatprep.subr.bf16.mxu1 %v4517_v14  ;;  %v4698_v30 = vpack.c.bf16 %v3383_v25, %v3382_v24  ;;  %v4700_v31 = vpack.c.bf16 %v3385_v27, %v3384_v26  ;;  %v3386_v33 = vld [vmem:[%s4643_s6 + $0x91] sm:$0xff]  ;;  %v3387_v34 = vld [vmem:[%s4643_s6 + $0x99] sm:$0xff]  ;;  %v3388_v35 = vld [vmem:[%s4643_s6 + $0xa9] sm:$0xff] }
  0x17   : > { %4060 = vmatprep.subr.bf16.mxu0 %v4518_v17  ;;  %3869 = vmatmul.mubr.msk.bf16.vlgmr.msra.gmra.mrb[0].mxu1 %vm335_vm0, %v1457_v13  ;;  %v3389_v36 = vld [vmem:[%s4643_s6 + $0xb1] sm:$0xff]  ;;  %v4723_v39 = vpack.c.bf16 %v3387_v34, %v3386_v33  ;;  %v3390_v41 = vld [vmem:[%s4643_s6 + $0xc1] sm:$0xff]  ;;  %v3391_v42 = vld [vmem:[%s4643_s6 + $0xc9] sm:$0xff] }
  0x18   : > { %4029 = vmatmul.mubr.msk.bf16.vlgmr.msra.gmra.mrb[0].mxu0 %vm335_vm0, %v4670_v20  ;;  %3901 = vmatpush3.bf16.msra.mxu1 %v4517_v14  ;;  %v4725_v40 = vpack.c.bf16 %v3389_v36, %v3388_v35  ;;  %v3436_v44 = vld [vmem:[%s4643_s6 + $0x1a] sm:$0xff]  ;;  %v3437_v45 = vld [vmem:[%s4643_s6 + $0x22] sm:$0xff]  ;;  %v4745_v46 = vpack.c.bf16 %v3391_v42, %v3390_v41  ;;  %v3438_v50 = vld [vmem:[%s4643_s6 + $0x32] sm:$0xff] }
  0x19   : > { %4061 = vmatpush3.bf16.msra.mxu0 %v4518_v17  ;;  %3872 = vmatprep.mubr.msk.bf16.mxu1 %vm335_vm0, %v4670_v20  ;;  %v4747_v47 = vpack.c.bf16 %v3437_v45, %v3436_v44  ;;  %v272_v48 = vld [vmem:[%s4643_s6 + $0xd9] sm:$0xff]  ;;  %v273_v49 = vld [vmem:[%s4643_s6 + $0xe1] sm:$0xff]  ;;  %v274_v52 = vld [vmem:[%s4643_s6 + $0xf1] sm:$0xff] }
  0x1a   : > { %4032 = vmatprep.mubr.msk.bf16.mxu0 %vm335_vm0, %v4673_v21  ;;  %4062 = vmatprep.subr.bf16.mxu0 %v4519_v22  ;;  %v3439_v51 = vld [vmem:[%s4643_s6 + $0x3a] sm:$0xff]  ;;  %v3440_v54 = vld [vmem:[%s4643_s6 + $0x4a] sm:$0xff]  ;;  %v3441_v55 = vld [vmem:[%s4643_s6 + $0x52] sm:$0xff]  ;;  %v4765_v56 = vpack.c.bf16 %v273_v49, %v272_v48 }
  0x1b   : > { %3902 = vmatprep.subr.bf16.mxu1 %v4520_v23  ;;  %v275_v53 = vld [vmem:[%s4643_s6 + $0xf9] sm:$0xff]  ;;  %v4767_v57 = vpack.c.bf16 %v3439_v51, %v3438_v50  ;;  %v4771_v59 = vpack.c.bf16 %v3441_v55, %v3440_v54  ;;  %v276_v60 = vld [vmem:[%s4643_s6 + $0x109] sm:$0xff]  ;;  %v277_v62 = vld [vmem:[%s4643_s6 + $0x111] sm:$0xff] }
  0x1c   : > { %3903 = vmatpush3.bf16.msra.mxu1 %v4520_v23  ;;  %v4769_v58 = vpack.c.bf16 %v275_v53, %v274_v52  ;;  %v3442_v63 = vld [vmem:[%s4643_s6 + $0x62] sm:$0xff]  ;;  %v3443_v0 = vld [vmem:[%s4643_s6 + $0x6a] sm:$0xff]  ;;  %v3444_v6 = vld [vmem:[%s4643_s6 + $0x7a] sm:$0xff]  ;;  %v4795_v10 = vpack.c.bf16 %v277_v62, %v276_v60 }
  0x1d   : > { %4063 = vmatpush3.bf16.msra.mxu0 %v4519_v22  ;;  %3904 = vmatprep.subr.bf16.mxu1 %v4523_v29  ;;  %v278_v2 = vld [vmem:[%s4643_s6 + $0x121] sm:$0xff]  ;;  %v279_v4 = vld [vmem:[%s4643_s6 + $0x129] sm:$0xff]  ;;  %v4797_v11 = vpack.c.bf16 %v3443_v0, %v3442_v63  ;;  %v280_v14 = vld [vmem:[%s4643_s6 + $0x139] sm:$0xff] }
  0x1e   : > { %4064 = vmatprep.subr.bf16.mxu0 %v4521_v28  ;;  %v3445_v8 = vld [vmem:[%s4643_s6 + $0x82] sm:$0xff]  ;;  %v4528_v9 = vld [vmem:[%s5377_s1 + $0xd0] sm:$0xff]   ;;  %v4799_v12 = vpack.c.bf16 %v279_v4, %v278_v2  ;;  %v4530_v16 = vld [vmem:[%s5377_s1 + $0xd8] sm:$0xff]  }
  0x1f   : > { %3873 = vmatmul.mubr.msk.bf16.gmra.mrb[4].mxu1 %vm335_vm0, %v4673_v21  ;;  %v4801_v13 = vpack.c.bf16 %v3445_v8, %v3444_v6  ;;  %v281_v15 = vld [vmem:[%s4643_s6 + $0x141] sm:$0xff]  ;;  %v3446_v17 = vld [vmem:[%s4643_s6 + $0x92] sm:$0xff]  ;;  %v3448_v23 = vld [vmem:[%s4643_s6 + $0xaa] sm:$0xff] }
  0x20   : > { %4033 = vmatmul.mubr.msk.bf16.gmra.mrb[4].mxu0 %vm335_vm0, %v4698_v30  ;;  %3876 = vmatprep.mubr.msk.bf16.mxu1 %vm335_vm0, %v4698_v30  ;;  %v3447_v18 = vld [vmem:[%s4643_s6 + $0x9a] sm:$0xff]  ;;  %v282_v19 = vld [vmem:[%s4643_s6 + $0x151] sm:$0xff]  ;;  %v4827_v26 = vpack.c.bf16 %v281_v15, %v280_v14  ;;  %v3450_v34 = vld [vmem:[%s4643_s6 + $0xc2] sm:$0xff] }
  0x21   : > { %4036 = vmatprep.mubr.msk.bf16.mxu0 %vm335_vm0, %v4700_v31  ;;  %4065 = vmatpush3.bf16.msra.mxu0 %v4521_v28  ;;  %v283_v22 = vld [vmem:[%s4643_s6 + $0x159] sm:$0xff]  ;;  %v4829_v27 = vpack.c.bf16 %v3447_v18, %v3446_v17  ;;  %v285_v33 = vld [vmem:[%s4643_s6 + $0x171] sm:$0xff]  ;;  %v3453_v41 = vld [vmem:[%s4643_s6 + $0xe2] sm:$0xff] }
  0x22   : > { %4066 = vmatprep.subr.bf16.mxu0 %v4522_v32  ;;  %3905 = vmatpush3.bf16.msra.mxu1 %v4523_v29  ;;  %v3449_v24 = vld [vmem:[%s4643_s6 + $0xb2] sm:$0xff]  ;;  %v4825_v25 = vld [vmem:[%s5377_s1 + $0xe0] sm:$0xff]   ;;  %v4831_v28 = vpack.c.bf16 %v283_v22, %v282_v19  ;;  %v3451_v35 = vld [vmem:[%s4643_s6 + $0xca] sm:$0xff] }
  0x23   : > { %3906 = vmatprep.subr.bf16.mxu1 %v4525_v38  ;;  %v4833_v29 = vpack.c.bf16 %v3449_v24, %v3448_v23  ;;  %v198_v36 = vld [vmem:[%s4643_s6] sm:$0xff]  ;;  %v4854_v44 = vpack.c.bf16 %v3451_v35, %v3450_v34  ;;  %v200_v49 = vld [vmem:[%s4643_s6 + $0x18] sm:$0xff]  ;;  %v202_v53 = vld [vmem:[%s4643_s6 + $0x30] sm:$0xff] }
  0x24   : > { %v201_v50 = vld [vmem:[%s4643_s6 + $0x20] sm:$0xff]  ;;  %v3454_v51 = vld [vmem:[%s4643_s6 + $0xf2] sm:$0xff]  ;;  %v3456_v55 = vld [vmem:[%s4643_s6 + $0x10a] sm:$0xff] }
  0x25   : > { %4067 = vmatpush3.bf16.msra.mxu0 %v4522_v32  ;;  %v284_v32 = vld [vmem:[%s4643_s6 + $0x169] sm:$0xff]  ;;  %v3455_v52 = vld [vmem:[%s4643_s6 + $0xfa] sm:$0xff]  ;;  %v3457_v60 = vld [vmem:[%s4643_s6 + $0x112] sm:$0xff] }
  0x26   : > { %4100 = vmatprep.subr.bf16.mxu0 %v4524_v37  ;;  %3907 = vmatpush3.bf16.msra.mxu1 %v4525_v38  ;;  %v3452_v38 = vld [vmem:[%s4643_s6 + $0xda] sm:$0xff]  ;;  %v4852_v42 = vpack.c.bf16 %v285_v33, %v284_v32  ;;  %v4875_v62 = vpack.c.bf16 %v3455_v52, %v3454_v51  ;;  %v4879_v0 = vpack.c.bf16 %v3457_v60, %v3456_v55  ;;  %v4529_v2 = vld [vmem:[%s5377_s1 + $0x48] sm:$0xff]   ;;  %v205_v6 = vld [vmem:[%s4643_s6 + $0x50] sm:$0xff] }
  0x27   : > { %3877 = vmatmul.mubr.msk.bf16.gmra.mrb[8].mxu1 %vm335_vm0, %v4700_v31  ;;  %3940 = vmatprep.subr.bf16.mxu1 %v4740_v43  ;;  %v4856_v48 = vpack.c.bf16 %v3453_v41, %v3452_v38  ;;  %v203_v54 = vld [vmem:[%s4643_s6 + $0x38] sm:$0xff]  ;;  %v204_v4 = vld [vmem:[%s4643_s6 + $0x48] sm:$0xff]  ;;  %v206_v14 = vld [vmem:[%s4643_s6 + $0x60] sm:$0xff] }
  0x28   : > { %4037 = vmatmul.mubr.msk.bf16.gmra.mrb[8].mxu0 %vm335_vm0, %v4723_v39  ;;  %3880 = vmatprep.mubr.msk.bf16.mxu1 %vm335_vm0, %v4723_v39  ;;  %v4877_v63 = vpack.c.bf16 %v203_v54, %v202_v53  ;;  %v3458_v8 = vld [vmem:[%s4643_s6 + $0x122] sm:$0xff]  ;;  %v3460_v17 = vld [vmem:[%s4643_s6 + $0x13a] sm:$0xff]  ;;  %v4904_v18 = vpack.c.bf16 %v205_v6, %v204_v4  ;;  %v3462_v34 = vld [vmem:[%s4643_s6 + $0x152] sm:$0xff] }
  0x29   : > { %4040 = vmatprep.mubr.msk.bf16.mxu0 %vm335_vm0, %v4725_v40  ;;  %v207_v15 = vld [vmem:[%s4643_s6 + $0x68] sm:$0xff]  ;;  %v4533_v24 = vld [vmem:[%s5377_s1 + $0x58] sm:$0xff]   ;;  %v209_v33 = vld [vmem:[%s4643_s6 + $0x80] sm:$0xff] }
  0x2a   : > { %v4908_v22 = vpack.c.bf16 %v207_v15, %v206_v14  ;;  %v208_v32 = vld [vmem:[%s4643_s6 + $0x78] sm:$0xff]  ;;  %v3464_v38 = vld [vmem:[%s4643_s6 + $0x16a] sm:$0xff]  ;;  %v3466_v55 = vld [vmem:[%s4643_s6 + $0x182] sm:$0xff] }
  0x2b   : > { %v3463_v35 = vld [vmem:[%s4643_s6 + $0x15a] sm:$0xff]  ;;  %v3465_v41 = vld [vmem:[%s4643_s6 + $0x172] sm:$0xff]  ;;  %v212_v53 = vld [vmem:[%s4643_s6 + $0xa8] sm:$0xff] }
  0x2c   : > { %v4942_v52 = vpack.c.bf16 %v3465_v41, %v3464_v38  ;;  %v213_v54 = vld [vmem:[%s4643_s6 + $0xb0] sm:$0xff]  ;;  %v215_v4 = vld [vmem:[%s4643_s6 + $0xc8] sm:$0xff]  ;;  %v216_v14 = vld [vmem:[%s4643_s6 + $0xd8] sm:$0xff] }
  0x2d   : > { %v3467_v60 = vld [vmem:[%s4643_s6 + $0x18a] sm:$0xff]  ;;  %v4959_v6 = vpack.c.bf16 %v213_v54, %v212_v53  ;;  %v217_v15 = vld [vmem:[%s4643_s6 + $0xe0] sm:$0xff]  ;;  %v224_v53 = vld [vmem:[%s4643_s6 + $0x138] sm:$0xff] }
  0x2e   : > { %v225_v54 = vld [vmem:[%s4643_s6 + $0x140] sm:$0xff] }
  0x2f   : > { %3881 = vmatmul.mubr.msk.bf16.gmra.mrb[12].mxu1 %vm335_vm0, %v4725_v40 }
  0x30   : > { %4041 = vmatmul.mubr.msk.bf16.gmra.mrb[12].mxu0 %vm335_vm0, %v4745_v46  ;;  %3884 = vmatprep.mubr.msk.bf16.mxu1 %vm335_vm0, %v4745_v46 }
  0x31   : > { %4068 = vmatprep.mubr.msk.bf16.mxu0 %vm335_vm0, %v4747_v47 }
  0x37   : > { %3885 = vmatmul.mubr.msk.bf16.gmra.mrb[16].mxu1 %vm335_vm0, %v4765_v56 }
  0x38   : > { %4069 = vmatmul.mubr.msk.bf16.vlgmr.msra.gmra.mrb[0].mxu0 %vm335_vm0, %v4767_v57  ;;  %3888 = vmatprep.mubr.msk.bf16.mxu1 %vm335_vm0, %v4769_v58 }
  0x39   : > { %4101 = vmatpush3.bf16.msra.mxu0 %v4524_v37  ;;  %4072 = vmatprep.mubr.msk.bf16.mxu0 %vm335_vm0, %v4771_v59  ;;  %v199_v37 = vld [vmem:[%s4643_s6 + $0x8] sm:$0xff] }
  0x3a   : > { %4102 = vmatprep.subr.bf16.mxu0 %v4526_v61  ;;  %v230_v45 = vpack.c.bf16 %v199_v37, %v198_v36  ;;  %v210_v36 = vld [vmem:[%s4643_s6 + $0x90] sm:$0xff]  ;;  %v211_v37 = vld [vmem:[%s4643_s6 + $0x98] sm:$0xff] }
  0x3b   : > { %v4940_v51 = vpack.c.bf16 %v211_v37, %v210_v36  ;;  %v223_v36 = vld [vmem:[%s4643_s6 + $0x128] sm:$0xff]  ;;  %v4536_v37 = vld [vmem:[%s5377_s1 + $0xf0] sm:$0xff]  }
  0x3d   : > { %4103 = vmatpush3.bf16.msra.mxu0 %v4526_v61  ;;  %v4873_v61 = vpack.c.bf16 %v201_v50, %v200_v49  ;;  %v4936_v49 = vpack.c.bf16 %v209_v33, %v208_v32  ;;  %v4938_v50 = vpack.c.bf16 %v3463_v35, %v3462_v34  ;;  %v4534_v32 = vld [vmem:[%s5377_s1 + $0xe8] sm:$0xff]   ;;  %v221_v34 = vld [vmem:[%s4643_s6 + $0x110] sm:$0xff]  ;;  %v222_v35 = vld [vmem:[%s4643_s6 + $0x120] sm:$0xff] }
  0x3e   : > { %4104 = vmatprep.subr.bf16.mxu0 %v4528_v9  ;;  %v220_v33 = vld [vmem:[%s4643_s6 + $0x108] sm:$0xff]  ;;  %v5002_v41 = vpack.c.bf16 %v223_v36, %v222_v35  ;;  %v4539_v36 = vld [vmem:[%s5377_s1 + $0x70] sm:$0xff]  }
  0x3f   : > { %3889 = vmatmul.mubr.msk.bf16.gmra.mrb[20].mxu1 %vm335_vm0, %v4795_v10  ;;  %v5000_v38 = vpack.c.bf16 %v221_v34, %v220_v33  ;;  %v4537_v35 = vld [vmem:[%s5377_s1 + $0x68] sm:$0xff]  }
  0x40   : > { %4073 = vmatmul.mubr.msk.bf16.gmra.mrb[4].mxu0 %vm335_vm0, %v4797_v11  ;;  %3892 = vmatprep.mubr.msk.bf16.mxu1 %vm335_vm0, %v4799_v12 }
  0x41   : > { %4076 = vmatprep.mubr.msk.bf16.mxu0 %vm335_vm0, %v4801_v13  ;;  %4105 = vmatpush3.bf16.msra.mxu0 %v4528_v9  ;;  %v3459_v9 = vld [vmem:[%s4643_s6 + $0x12a] sm:$0xff] }
  0x42   : > { %4106 = vmatprep.subr.bf16.mxu0 %v4530_v16  ;;  %v4906_v19 = vpack.c.bf16 %v3459_v9, %v3458_v8  ;;  %v4961_v8 = vpack.c.bf16 %v3467_v60, %v3466_v55  ;;  %v226_v55 = vld [vmem:[%s4643_s6 + $0x150] sm:$0xff]  ;;  %v227_v60 = vld [vmem:[%s4643_s6 + $0x158] sm:$0xff] }
  0x45   : > { %4107 = vmatpush3.bf16.msra.mxu0 %v4530_v16  ;;  %v4531_v16 = vld [vmem:[%s5377_s1 + $0x50] sm:$0xff]  }
  0x46   : > { %4140 = vmatprep.subr.bf16.mxu0 %v4825_v25 }
  0x47   : > { %3893 = vmatmul.mubr.msk.bf16.gmra.mrb[24].mxu1 %vm335_vm0, %v4827_v26 }
  0x48   : > { %4077 = vmatmul.mubr.msk.bf16.gmra.mrb[8].mxu0 %vm335_vm0, %v4829_v27  ;;  %3896 = vmatprep.mubr.msk.bf16.mxu1 %vm335_vm0, %v4831_v28 }
  0x49   : > { %4080 = vmatprep.mubr.msk.bf16.mxu0 %vm335_vm0, %v4833_v29 }
  0x4f   : > { %3897 = vmatmul.mubr.msk.bf16.gmra.mrb[28].mxu1 %vm335_vm0, %v4852_v42 }
  0x50   : > { %4081 = vmatmul.mubr.msk.bf16.gmra.mrb[12].mxu0 %vm335_vm0, %v4854_v44  ;;  %3908 = vmatprep.mubr.msk.bf16.mxu1 %vm335_vm0, %v230_v45  ;;  %v4934_v45 = vld [vmem:[%s5377_s1 + $0x60] sm:$0xff]  }
  0x51   : > { %4084 = vmatprep.mubr.msk.bf16.mxu0 %vm335_vm0, %v4856_v48 }
  0x57   : > { %3909 = vmatmul.mubr.msk.bf16.vlgmr.msra.gmra.mrb[0].mxu1 %vm335_vm0, %v4873_v61 }
  0x58   : > { %4085 = vmatmul.mubr.msk.bf16.gmra.mrb[16].mxu0 %vm335_vm0, %v4875_v62  ;;  %3941 = vmatpush3.bf16.msra.mxu1 %v4740_v43  ;;  %v3461_v43 = vld [vmem:[%s4643_s6 + $0x142] sm:$0xff] }
  0x59   : > { %3912 = vmatprep.mubr.msk.bf16.mxu1 %vm335_vm0, %v4877_v63  ;;  %4088 = vmatprep.mubr.msk.bf16.mxu0 %vm335_vm0, %v4879_v0  ;;  %v4910_v23 = vpack.c.bf16 %v3461_v43, %v3460_v17  ;;  %v219_v17 = vld [vmem:[%s4643_s6 + $0xf8] sm:$0xff]  ;;  %v4977_v43 = vpack.c.bf16 %v217_v15, %v216_v14  ;;  %v5024_v14 = vpack.c.bf16 %v227_v60, %v226_v55  ;;  %v228_v15 = vld [vmem:[%s4643_s6 + $0x168] sm:$0xff] }
  0x5a   : > { %3942 = vmatprep.subr.bf16.mxu1 %v4529_v2  ;;  %v4542_v60 = vld [vmem:[%s5377_s1 + $0x108] sm:$0xff]  }
  0x5c   : > { %3943 = vmatpush3.bf16.msra.mxu1 %v4529_v2  ;;  %v214_v2 = vld [vmem:[%s4643_s6 + $0xc0] sm:$0xff] }
  0x5d   : > { %3944 = vmatprep.subr.bf16.mxu1 %v4531_v16  ;;  %v4963_v9 = vpack.c.bf16 %v215_v4, %v214_v2  ;;  %v4540_v2 = vld [vmem:[%s5377_s1 + $0x100] sm:$0xff]   ;;  %v5022_v4 = vpack.c.bf16 %v225_v54, %v224_v53  ;;  %v3526_v53 = vld [vmem:[%s4643_s6 + $0x198] sm:$0xff] }
  0x5e   : > { %v3527_v54 = vld [vmem:[%s4643_s6 + $0x1a0] sm:$0xff] }
  0x5f   : > { %3913 = vmatmul.mubr.msk.bf16.gmra.mrb[4].mxu1 %vm335_vm0, %v4904_v18  ;;  %v2119_v55 = vpack.c.bf16 %v3527_v54, %v3526_v53 }
  0x60   : > { %4089 = vmatmul.mubr.msk.bf16.gmra.mrb[20].mxu0 %vm335_vm0, %v4906_v19  ;;  %3916 = vmatprep.mubr.msk.bf16.mxu1 %vm335_vm0, %v4908_v22 }
  0x61   : > { %4092 = vmatprep.mubr.msk.bf16.mxu0 %vm335_vm0, %v4910_v23  ;;  %3945 = vmatpush3.bf16.msra.mxu1 %v4531_v16  ;;  %v218_v16 = vld [vmem:[%s4643_s6 + $0xf0] sm:$0xff] }
  0x62   : > { %3946 = vmatprep.subr.bf16.mxu1 %v4533_v24 }
  0x65   : > { %3947 = vmatpush3.bf16.msra.mxu1 %v4533_v24  ;;  %v4979_v24 = vpack.c.bf16 %v219_v17, %v218_v16  ;;  %v229_v16 = vld [vmem:[%s4643_s6 + $0x170] sm:$0xff]  ;;  %v778_v17 = vld [vmem:[%s4643_s6 + $0x2] sm:$0xff] }
  0x66   : > { %3980 = vmatprep.subr.bf16.mxu1 %v4934_v45  ;;  %v5038_v33 = vpack.c.bf16 %v229_v16, %v228_v15  ;;  %v4544_v15 = vld [vmem:[%s5377_s1 + $0x118] sm:$0xff]   ;;  %v5259_v16 = vld [vmem:[%s5378_s2] ss:$0 sm:$0xff] }
  0x67   : > { %3917 = vmatmul.mubr.msk.bf16.gmra.mrb[8].mxu1 %vm335_vm0, %v4936_v49 }
  0x68   : > { %4093 = vmatmul.mubr.msk.bf16.gmra.mrb[24].mxu0 %vm335_vm0, %v4938_v50  ;;  %3920 = vmatprep.mubr.msk.bf16.mxu1 %vm335_vm0, %v4940_v51 }
  0x69   : > { %4096 = vmatprep.mubr.msk.bf16.mxu0 %vm335_vm0, %v4942_v52 }
  0x6f   : > { %3921 = vmatmul.mubr.msk.bf16.gmra.mrb[12].mxu1 %vm335_vm0, %v4959_v6 }
  0x70   : > { %4097 = vmatmul.mubr.msk.bf16.gmra.mrb[28].mxu0 %vm335_vm0, %v4961_v8  ;;  %3924 = vmatprep.mubr.msk.bf16.mxu1 %vm335_vm0, %v4963_v9 }
  0x71   : > { %4108 = vmatprep.mubr.msk.bf16.mxu0 %vm335_vm0, %v4877_v63 }
  0x77   : > { %3925 = vmatmul.mubr.msk.bf16.gmra.mrb[16].mxu1 %vm335_vm0, %v4977_v43 }
  0x78   : > { %4109 = vmatmul.mubr.msk.bf16.vlgmr.msra.gmra.mrb[0].mxu0 %vm335_vm0, %v4904_v18  ;;  %3928 = vmatprep.mubr.msk.bf16.mxu1 %vm335_vm0, %v4979_v24 }
  0x79   : > { %4141 = vmatpush3.bf16.msra.mxu0 %v4825_v25  ;;  %4112 = vmatprep.mubr.msk.bf16.mxu0 %vm335_vm0, %v4908_v22  ;;  %v4538_v25 = vld [vmem:[%s5377_s1 + $0xf8] sm:$0xff]  }
  0x7a   : > { %4142 = vmatprep.subr.bf16.mxu0 %v4534_v32 }
  0x7d   : > { %4143 = vmatpush3.bf16.msra.mxu0 %v4534_v32  ;;  %v779_v32 = vld [vmem:[%s4643_s6 + $0xa] sm:$0xff] }
  0x7e   : > { %4144 = vmatprep.subr.bf16.mxu0 %v4536_v37  ;;  %v810_v34 = vpack.c.bf16 %v779_v32, %v778_v17 }
  0x7f   : > { %3929 = vmatmul.mubr.msk.bf16.gmra.mrb[20].mxu1 %vm335_vm0, %v5000_v38 }
  0x80   : > { %4113 = vmatmul.mubr.msk.bf16.gmra.mrb[4].mxu0 %vm335_vm0, %v4936_v49  ;;  %3932 = vmatprep.mubr.msk.bf16.mxu1 %vm335_vm0, %v5002_v41 }
  0x81   : > { %4116 = vmatprep.mubr.msk.bf16.mxu0 %vm335_vm0, %v4940_v51  ;;  %4145 = vmatpush3.bf16.msra.mxu0 %v4536_v37  ;;  %v3525_v37 = vld [vmem:[%s4643_s6 + $0x188] sm:$0xff] }
  0x82   : > { %4146 = vmatprep.subr.bf16.mxu0 %v4538_v25 }
  0x85   : > { %4147 = vmatpush3.bf16.msra.mxu0 %v4538_v25 }
  0x86   : > { %4180 = vmatprep.subr.bf16.mxu0 %v4540_v2 }
  0x87   : > { %3933 = vmatmul.mubr.msk.bf16.gmra.mrb[24].mxu1 %vm335_vm0, %v5022_v4 }
  0x88   : > { %4117 = vmatmul.mubr.msk.bf16.gmra.mrb[8].mxu0 %vm335_vm0, %v4959_v6  ;;  %3936 = vmatprep.mubr.msk.bf16.mxu1 %vm335_vm0, %v5024_v14 }
  0x89   : > { %4120 = vmatprep.mubr.msk.bf16.mxu0 %vm335_vm0, %v4963_v9 }
  0x8f   : > { %3937 = vmatmul.mubr.msk.bf16.gmra.mrb[28].mxu1 %vm335_vm0, %v5038_v33 }
  0x90   : > { %4121 = vmatmul.mubr.msk.bf16.gmra.mrb[12].mxu0 %vm335_vm0, %v4977_v43  ;;  %3948 = vmatprep.mubr.msk.bf16.mxu1 %vm335_vm0, %v810_v34 }
  0x91   : > { %4124 = vmatprep.mubr.msk.bf16.mxu0 %vm335_vm0, %v4979_v24 }
  0x97   : > { %3949 = vmatmul.mubr.msk.bf16.vlgmr.msra.gmra.mrb[0].mxu1 %vm335_vm0, %v4747_v47  ;;  %v4541_v47 = vld [vmem:[%s5377_s1 + $0x78] sm:$0xff]  }
  0x98   : > { %4125 = vmatmul.mubr.msk.bf16.gmra.mrb[16].mxu0 %vm335_vm0, %v5000_v38  ;;  %3981 = vmatpush3.bf16.msra.mxu1 %v4934_v45  ;;  %v3524_v45 = vld [vmem:[%s4643_s6 + $0x180] sm:$0xff] }
  0x99   : > { %3952 = vmatprep.mubr.msk.bf16.mxu1 %vm335_vm0, %v4767_v57  ;;  %4128 = vmatprep.mubr.msk.bf16.mxu0 %vm335_vm0, %v5002_v41  ;;  %v5075_v25 = vpack.c.bf16 %v3525_v37, %v3524_v45 }
  0x9a   : > { %3982 = vmatprep.subr.bf16.mxu1 %v4537_v35 }
  0x9c   : > { %3983 = vmatpush3.bf16.msra.mxu1 %v4537_v35 }
  0x9d   : > { %3984 = vmatprep.subr.bf16.mxu1 %v4539_v36 }
  0x9f   : > { %3953 = vmatmul.mubr.msk.bf16.gmra.mrb[4].mxu1 %vm335_vm0, %v4771_v59 }
  0xa0   : > { %4129 = vmatmul.mubr.msk.bf16.gmra.mrb[20].mxu0 %vm335_vm0, %v5022_v4  ;;  %3956 = vmatprep.mubr.msk.bf16.mxu1 %vm335_vm0, %v4797_v11 }
  0xa1   : > { %4132 = vmatprep.mubr.msk.bf16.mxu0 %vm335_vm0, %v5024_v14  ;;  %3985 = vmatpush3.bf16.msra.mxu1 %v4539_v36 }
  0xa2   : > { %3986 = vmatprep.subr.bf16.mxu1 %v4541_v47 }
  0xa5   : > { %3987 = vmatpush3.bf16.msra.mxu1 %v4541_v47 }
  0xa6   : > { %4220 = vmatprep.subr.bf16.mxu1 %v4613_v1 }
  0xa7   : > { %3957 = vmatmul.mubr.msk.bf16.gmra.mrb[8].mxu1 %vm335_vm0, %v4801_v13 }
  0xa8   : > { %4133 = vmatmul.mubr.msk.bf16.gmra.mrb[24].mxu0 %vm335_vm0, %v5038_v33  ;;  %3960 = vmatprep.mubr.msk.bf16.mxu1 %vm335_vm0, %v4829_v27 }
  0xa9   : > { %4136 = vmatprep.mubr.msk.bf16.mxu0 %vm335_vm0, %v5075_v25 }
  0xaf   : > { %3961 = vmatmul.mubr.msk.bf16.gmra.mrb[12].mxu1 %vm335_vm0, %v4833_v29 }
  0xb0   : > { %4137 = vmatmul.mubr.msk.bf16.gmra.mrb[28].mxu0 %vm335_vm0, %v2119_v55  ;;  %3964 = vmatprep.mubr.msk.bf16.mxu1 %vm335_vm0, %v4854_v44 }
  0xb1   : > { %4148 = vmatprep.mubr.msk.bf16.mxu0 %vm335_vm0, %v4670_v20  ;;  %v4543_v20 = vld [vmem:[%s5377_s1 + $0x110] sm:$0xff]  }
  0xb7   : > { %3965 = vmatmul.mubr.msk.bf16.gmra.mrb[16].mxu1 %vm335_vm0, %v4856_v48 }
  0xb8   : > { %4149 = vmatmul.mubr.msk.bf16.vlgmr.msra.gmra.mrb[0].mxu0 %vm335_vm0, %v4673_v21  ;;  %3968 = vmatprep.mubr.msk.bf16.mxu1 %vm335_vm0, %v4875_v62 }
  0xb9   : > { %4181 = vmatpush3.bf16.msra.mxu0 %v4540_v2  ;;  %4152 = vmatprep.mubr.msk.bf16.mxu0 %vm335_vm0, %v4698_v30  ;;  %v3587_v30 = vld [vmem:[%s4643_s6 + $0x1a1] sm:$0xff] }
  0xba   : > { %4182 = vmatprep.subr.bf16.mxu0 %v4542_v60 }
  0xbd   : > { %4183 = vmatpush3.bf16.msra.mxu0 %v4542_v60 }
  0xbe   : > { %4184 = vmatprep.subr.bf16.mxu0 %v4543_v20 }
  0xbf   : > { %3969 = vmatmul.mubr.msk.bf16.gmra.mrb[20].mxu1 %vm335_vm0, %v4879_v0 }
  0xc0   : > { %4153 = vmatmul.mubr.msk.bf16.gmra.mrb[4].mxu0 %vm335_vm0, %v4700_v31  ;;  %3972 = vmatprep.mubr.msk.bf16.mxu1 %vm335_vm0, %v4906_v19 }
  0xc1   : > { %4156 = vmatprep.mubr.msk.bf16.mxu0 %vm335_vm0, %v4723_v39  ;;  %4185 = vmatpush3.bf16.msra.mxu0 %v4543_v20  ;;  %v3393_v39 = vld [vmem:[%s4643_s6 + $0xe1] sm:$0xff] }
  0xc2   : > { %4186 = vmatprep.subr.bf16.mxu0 %v4544_v15 }
  0xc5   : > { %4187 = vmatpush3.bf16.msra.mxu0 %v4544_v15 }
  0xc7   : > { %3973 = vmatmul.mubr.msk.bf16.gmra.mrb[24].mxu1 %vm335_vm0, %v4910_v23 }
  0xc8   : > { %4157 = vmatmul.mubr.msk.bf16.gmra.mrb[8].mxu0 %vm335_vm0, %v4725_v40  ;;  %3976 = vmatprep.mubr.msk.bf16.mxu1 %vm335_vm0, %v4938_v50 }
  0xc9   : > { %4160 = vmatprep.mubr.msk.bf16.mxu0 %vm335_vm0, %v4745_v46  ;;  %v3394_v46 = vld [vmem:[%s4643_s6 + $0xf1] sm:$0xff] }
  0xcf   : > { %3977 = vmatmul.mubr.msk.bf16.gmra.mrb[28].mxu1 %vm335_vm0, %v4942_v52 }
  0xd0   : > { %4161 = vmatmul.mubr.msk.bf16.gmra.mrb[12].mxu0 %vm335_vm0, %v4765_v56  ;;  %3988 = vmatprep.mubr.msk.bf16.mxu1 %vm335_vm0, %v4873_v61  ;;  %v3395_v56 = vld [vmem:[%s4643_s6 + $0xf9] sm:$0xff] }
  0xd1   : > { %4164 = vmatprep.mubr.msk.bf16.mxu0 %vm335_vm0, %v4769_v58  ;;  %v3397_v58 = vld [vmem:[%s4643_s6 + $0x111] sm:$0xff] }
  0xd7   : > { %3989 = vmatmul.mubr.msk.bf16.vlgmr.msra.gmra.mrb[0].mxu1 %vm335_vm0, %v4877_v63  ;;  %v3646_v63 = vld [vmem:[%s4643_s6 + $0x19a] sm:$0xff] }
  0xd8   : > { %4165 = vmatmul.mubr.msk.bf16.gmra.mrb[16].mxu0 %vm335_vm0, %v4795_v10  ;;  %4224 = vmatpush3.bf16.msra.mxu1 %v4613_v1  ;;  %v3584_v1 = vld [vmem:[%s4643_s6 + $0x181] sm:$0xff] }
  0xd9   : > { %3992 = vmatprep.mubr.msk.bf16.mxu1 %vm335_vm0, %v4904_v18  ;;  %4168 = vmatprep.mubr.msk.bf16.mxu0 %vm335_vm0, %v4799_v12  ;;  %v3399_v12 = vld [vmem:[%s4643_s6 + $0x129] sm:$0xff] }
  0xda   : > { %4221 = vmatprep.subr.bf16.mxu1 %v4624_v3 }
  0xdc   : > { %4225 = vmatpush3.bf16.msra.mxu1 %v4624_v3  ;;  %v3585_v3 = vld [vmem:[%s4643_s6 + $0x189] sm:$0xff] }
  0xdd   : > { %4222 = vmatprep.subr.bf16.mxu1 %v4635_v5  ;;  %v5160_v21 = vpack.c.bf16 %v3585_v3, %v3584_v1 }
  0xdf   : > { %3993 = vmatmul.mubr.msk.bf16.gmra.mrb[4].mxu1 %vm335_vm0, %v4908_v22 }
  0xe0   : > { %4169 = vmatmul.mubr.msk.bf16.gmra.mrb[20].mxu0 %vm335_vm0, %v4827_v26  ;;  %3996 = vmatprep.mubr.msk.bf16.mxu1 %vm335_vm0, %v4936_v49  ;;  %v3401_v26 = vld [vmem:[%s4643_s6 + $0x141] sm:$0xff] }
  0xe1   : > { %4172 = vmatprep.mubr.msk.bf16.mxu0 %vm335_vm0, %v4831_v28  ;;  %4226 = vmatpush3.bf16.msra.mxu1 %v4635_v5  ;;  %v3586_v5 = vld [vmem:[%s4643_s6 + $0x199] sm:$0xff] }
  0xe2   : > { %4223 = vmatprep.subr.bf16.mxu1 %v4648_v7  ;;  %v2441_v31 = vpack.c.bf16 %v3587_v30, %v3586_v5 }
  0xe5   : > { %4227 = vmatpush3.bf16.msra.mxu1 %v4648_v7  ;;  %v3392_v7 = vld [vmem:[%s4643_s6 + $0xd9] sm:$0xff] }
  0xe6   : > { %v1465_v40 = vpack.c.bf16 %v3393_v39, %v3392_v7 }
  0xe7   : > { %3997 = vmatmul.mubr.msk.bf16.gmra.mrb[8].mxu1 %vm335_vm0, %v4940_v51 }
  0xe8   : > { %4173 = vmatmul.mubr.msk.bf16.gmra.mrb[24].mxu0 %vm335_vm0, %v4852_v42  ;;  %4000 = vmatprep.mubr.msk.bf16.mxu1 %vm335_vm0, %v4959_v6  ;;  %v3403_v42 = vld [vmem:[%s4643_s6 + $0x159] sm:$0xff] }
  0xe9   : > { %4176 = vmatprep.mubr.msk.bf16.mxu0 %vm335_vm0, %v5160_v21 }
  0xef   : > { %4001 = vmatmul.mubr.msk.bf16.gmra.mrb[12].mxu1 %vm335_vm0, %v4963_v9 }
  0xf0   : > { %4177 = vmatmul.mubr.msk.bf16.gmra.mrb[28].mxu0 %vm335_vm0, %v2441_v31  ;;  %4004 = vmatprep.mubr.msk.bf16.mxu1 %vm335_vm0, %v4977_v43 }
  0xf1   : > { %4188 = vmatprep.mubr.msk.bf16.mxu0 %vm335_vm0, %v4767_v57  ;;  %v3396_v57 = vld [vmem:[%s4643_s6 + $0x109] sm:$0xff] }
  0xf2   : > { %v1467_v10 = vpack.c.bf16 %v3397_v58, %v3396_v57 }
  0xf7   : > { %4005 = vmatmul.mubr.msk.bf16.gmra.mrb[16].mxu1 %vm335_vm0, %v4979_v24 }
  0xf8   : > { %4189 = vmatmul.mubr.msk.bf16.vlgmr.msra.gmra.mrb[0].mxu0 %vm335_vm0, %v4771_v59  ;;  %4008 = vmatprep.mubr.msk.bf16.mxu1 %vm335_vm0, %v5000_v38  ;;  %v1466_v59 = vpack.c.bf16 %v3395_v56, %v3394_v46 }
  0xf9   : > { %4192 = vmatprep.mubr.msk.bf16.mxu0 %vm335_vm0, %v4797_v11  ;;  %v3398_v11 = vld [vmem:[%s4643_s6 + $0x121] sm:$0xff] }
  0xff   : > { %4009 = vmatmul.mubr.msk.bf16.gmra.mrb[20].mxu1 %vm335_vm0, %v5002_v41 }
 0x100   : > { %4193 = vmatmul.mubr.msk.bf16.gmra.mrb[4].mxu0 %vm335_vm0, %v4801_v13  ;;  %4012 = vmatprep.mubr.msk.bf16.mxu1 %vm335_vm0, %v5022_v4  ;;  %v3400_v13 = vld [vmem:[%s4643_s6 + $0x139] sm:$0xff] }
 0x101   : > { %4196 = vmatprep.mubr.msk.bf16.mxu0 %vm335_vm0, %v4829_v27  ;;  %v1468_v27 = vpack.c.bf16 %v3399_v12, %v3398_v11  ;;  %v1469_v28 = vpack.c.bf16 %v3401_v26, %v3400_v13 }
 0x107   : > { %4013 = vmatmul.mubr.msk.bf16.gmra.mrb[24].mxu1 %vm335_vm0, %v5024_v14 }
 0x108   : > { %4197 = vmatmul.mubr.msk.bf16.gmra.mrb[8].mxu0 %vm335_vm0, %v4833_v29  ;;  %4016 = vmatprep.mubr.msk.bf16.mxu1 %vm335_vm0, %v5038_v33  ;;  %v3402_v29 = vld [vmem:[%s4643_s6 + $0x151] sm:$0xff] }
 0x109   : > { %4200 = vmatprep.mubr.msk.bf16.mxu0 %vm335_vm0, %v4854_v44  ;;  %v3404_v44 = vld [vmem:[%s4643_s6 + $0x169] sm:$0xff]  ;;  %v1470_v61 = vpack.c.bf16 %v3403_v42, %v3402_v29 }
 0x10f   : > { %4017 = vmatmul.mubr.msk.bf16.gmra.mrb[28].mxu1 %vm335_vm0, %v5075_v25 }
 0x110   : > { %4201 = vmatmul.mubr.msk.bf16.gmra.mrb[12].mxu0 %vm335_vm0, %v4856_v48  ;;  %4044 = vmatprep.mubr.msk.bf16.mxu1 %vm335_vm0, %v1465_v40  ;;  %v3405_v48 = vld [vmem:[%s4643_s6 + $0x171] sm:$0xff] }
 0x111   : > { %4204 = vmatprep.mubr.msk.bf16.mxu0 %vm335_vm0, %v4875_v62  ;;  %v1471_v62 = vpack.c.bf16 %v3405_v48, %v3404_v44 }
 0x117   : > { %4045 = vmatmul.mubr.msk.bf16.vlgmr.msra.gmra.mrb[16].mxu1 %vm335_vm0, %v1466_v59 }
 0x118   : > { %4205 = vmatmul.mubr.msk.bf16.gmra.mrb[16].mxu0 %vm335_vm0, %v4879_v0  ;;  %4048 = vmatprep.mubr.msk.bf16.mxu1 %vm335_vm0, %v1467_v10  ;;  %v3647_v0 = vld [vmem:[%s4643_s6 + $0x1a2] sm:$0xff] }
 0x119   : > { %4208 = vmatprep.mubr.msk.bf16.mxu0 %vm335_vm0, %v4906_v19  ;;  %v2763_v18 = vpack.c.bf16 %v3647_v0, %v3646_v63 }
 0x11f   : > { %4049 = vmatmul.mubr.msk.bf16.gmra.mrb[20].mxu1 %vm335_vm0, %v1468_v27 }
 0x120   : > { %4209 = vmatmul.mubr.msk.bf16.gmra.mrb[20].mxu0 %vm335_vm0, %v4910_v23  ;;  %4052 = vmatprep.mubr.msk.bf16.mxu1 %vm335_vm0, %v1469_v28 }
 0x121   : > { %4212 = vmatprep.mubr.msk.bf16.mxu0 %vm335_vm0, %v4938_v50 }
 0x127   : > { %4053 = vmatmul.mubr.msk.bf16.gmra.mrb[24].mxu1 %vm335_vm0, %v1470_v61 }
 0x128   : > { %4213 = vmatmul.mubr.msk.bf16.gmra.mrb[24].mxu0 %vm335_vm0, %v4942_v52  ;;  %4056 = vmatprep.mubr.msk.bf16.mxu1 %vm335_vm0, %v1471_v62 }
 0x129   : > { %4216 = vmatprep.mubr.msk.bf16.mxu0 %vm335_vm0, %v4961_v8 }
 0x12f   : > { %4057 = vmatmul.mubr.msk.bf16.gmra.mrb[28].mxu1 %vm335_vm0, %v5160_v21 }
 0x130   : > { %4217 = vmatmul.mubr.msk.bf16.gmra.mrb[28].mxu0 %vm335_vm0, %v2763_v18 }
 0x1aa   : > { %v3990_v19 = vpop.f32.mrb[0].mxu1 }
 0x1ab   : > { %v1266_v22 = vpop.f32.mrb[1].mxu1 }
 0x1ac   : > { %v3991_v23 = vpop.f32.mrb[2].mxu1 }
 0x1ad   : > { %v1269_v49 = vpop.f32.mrb[3].mxu1 }
 0x1b2   : > { %v3994_v50 = vpop.f32.mrb[4].mxu1 }
 0x1b3   : > { %v1282_v51 = vpop.f32.mrb[5].mxu1 }
 0x1b4   : > { %v3995_v52 = vpop.f32.mrb[6].mxu1 }
 0x1b5   : > { %v1285_v6 = vpop.f32.mrb[7].mxu1 }
 0x1ba   : > { %v3998_v9 = vpop.f32.mrb[8].mxu1 }
 0x1bb   : > { %v1298_v43 = vpop.f32.mrb[9].mxu1 }
 0x1bc   : > { %v3999_v8 = vpop.f32.mrb[10].mxu1 }
 0x1bd   : > { %v1301_v24 = vpop.f32.mrb[11].mxu1 }
 0x1c2   : > { %v5248_v38 = vpop.f32.mrb[12].mxu1 }
 0x1c3   : > { %v5250_v41 = vpop.f32.mrb[13].mxu1 }
 0x1c4   : > { %v5252_v2 = vpop.f32.mrb[14].mxu1 }
 0x1c5   : > { %v5254_v4 = vpop.f32.mrb[15].mxu1 }
 0x1cb   : > { %v4190_v14 = vpop.f32.mrb[0].mxu0 }
 0x1cc   : > { %v4228_v17 = vadd.f32 %v4190_v14, %v3990_v19  ;;  %v2879_v32 = vpop.f32.mrb[1].mxu0 }
 0x1cd   : > { %v4229_v33 = vadd.f32 %v2879_v32, %v1266_v22  ;;  %v4191_v34 = vpop.f32.mrb[2].mxu0 }
 0x1ce   : > { %v3047_v35 = vadd.f32 %v4228_v17, %v5259_v16  ;;  %v4230_v36 = vadd.f32 %v4191_v34, %v3991_v23  ;;  %v2882_v47 = vpop.f32.mrb[3].mxu0 }
 0x1cf   : > { %v3045_v45 = vadd.f32 %v4229_v33, %v5259_v16  ;;  %v4231_v37 = vadd.f32 %v2882_v47, %v1269_v49 }
 0x1d0   : > { %v3079_v25 = vmax.f32 %v3047_v35, 0.0  ;;  %v3048_v53 = vadd.f32 %v4230_v36, %v5259_v16 }
 0x1d1   : > { %v3077_v54 = vmax.f32 %v3045_v45, 0.0  ;;  %v3046_v55 = vadd.f32 %v4231_v37, %v5259_v16 }
 0x1d2   : > { %3111 = vst.msk [vmem:[%s5266_s29 + $0x10] sm:$0xff] %vm335_vm0, %v3079_v25  ;;  %v3080_v60 = vmax.f32 %v3048_v53, 0.0 }
 0x1d3   : > { %3109 = vst.msk [vmem:[%s5266_s29] sm:$0xff] %vm335_vm0, %v3077_v54  ;;  %v3078_v20 = vmax.f32 %v3046_v55, 0.0  ;;  %v4194_v15 = vpop.f32.mrb[4].mxu0 }
 0x1d4   : > { %3112 = vst.msk [vmem:[%s5266_s29 + $0x18] sm:$0xff] %vm335_vm0, %v3080_v60  ;;  %v4232_v1 = vadd.f32 %v4194_v15, %v3994_v50  ;;  %v2895_v3 = vpop.f32.mrb[5].mxu0 }
 0x1d5   : > { %3110 = vst.msk [vmem:[%s5266_s29 + $0x8] sm:$0xff] %vm335_vm0, %v3078_v20  ;;  %v4233_v21 = vadd.f32 %v2895_v3, %v1282_v51  ;;  %v4195_v5 = vpop.f32.mrb[6].mxu0 }
 0x1d6   : > { %v3051_v30 = vadd.f32 %v4232_v1, %v5259_v16  ;;  %v4234_v31 = vadd.f32 %v4195_v5, %v3995_v52  ;;  %v2898_v7 = vpop.f32.mrb[7].mxu0 }
 0x1d7   : > { %v3049_v39 = vadd.f32 %v4233_v21, %v5259_v16  ;;  %v4235_v40 = vadd.f32 %v2898_v7, %v1285_v6 }
 0x1d8   : > { %v3083_v46 = vmax.f32 %v3051_v30, 0.0  ;;  %v3052_v56 = vadd.f32 %v4234_v31, %v5259_v16 }
 0x1d9   : > { %v3081_v57 = vmax.f32 %v3049_v39, 0.0  ;;  %v3050_v58 = vadd.f32 %v4235_v40, %v5259_v16 }
 0x1da   : > { %3115 = vst.msk [vmem:[%s5266_s29 + $0x30] sm:$0xff] %vm335_vm0, %v3083_v46  ;;  %v3084_v59 = vmax.f32 %v3052_v56, 0.0 }
 0x1db   : > { %3113 = vst.msk [vmem:[%s5266_s29 + $0x20] sm:$0xff] %vm335_vm0, %v3081_v57  ;;  %v3082_v10 = vmax.f32 %v3050_v58, 0.0  ;;  %v4198_v11 = vpop.f32.mrb[8].mxu0 }
 0x1dc   : > { %3116 = vst.msk [vmem:[%s5266_s29 + $0x38] sm:$0xff] %vm335_vm0, %v3084_v59  ;;  %v4236_v12 = vadd.f32 %v4198_v11, %v3998_v9  ;;  %v2911_v13 = vpop.f32.mrb[9].mxu0 }
 0x1dd   : > { %3114 = vst.msk [vmem:[%s5266_s29 + $0x28] sm:$0xff] %vm335_vm0, %v3082_v10  ;;  %v4237_v26 = vadd.f32 %v2911_v13, %v1298_v43  ;;  %v4199_v27 = vpop.f32.mrb[10].mxu0 }
 0x1de   : > { %v3055_v28 = vadd.f32 %v4236_v12, %v5259_v16  ;;  %v4238_v29 = vadd.f32 %v4199_v27, %v3999_v8  ;;  %v2914_v42 = vpop.f32.mrb[11].mxu0 }
 0x1df   : > { %v3053_v44 = vadd.f32 %v4237_v26, %v5259_v16  ;;  %v4239_v48 = vadd.f32 %v2914_v42, %v1301_v24 }
 0x1e0   : > { %v3087_v61 = vmax.f32 %v3055_v28, 0.0  ;;  %v3056_v62 = vadd.f32 %v4238_v29, %v5259_v16 }
 0x1e1   : > { %v3085_v63 = vmax.f32 %v3053_v44, 0.0  ;;  %v3054_v0 = vadd.f32 %v4239_v48, %v5259_v16 }
 0x1e2   : > { %3119 = vst.msk [vmem:[%s5266_s29 + $0x50] sm:$0xff] %vm335_vm0, %v3087_v61  ;;  %v3088_v18 = vmax.f32 %v3056_v62, 0.0 }
 0x1e3   : > { %3117 = vst.msk [vmem:[%s5266_s29 + $0x40] sm:$0xff] %vm335_vm0, %v3085_v63  ;;  %v3086_v19 = vmax.f32 %v3054_v0, 0.0  ;;  %v4202_v22 = vpop.f32.mrb[12].mxu0 }
 0x1e4   : > { %3120 = vst.msk [vmem:[%s5266_s29 + $0x58] sm:$0xff] %vm335_vm0, %v3088_v18  ;;  %v4240_v23 = vadd.f32 %v4202_v22, %v5248_v38  ;;  %v2927_v49 = vpop.f32.mrb[13].mxu0 }
 0x1e5   : > { %3118 = vst.msk [vmem:[%s5266_s29 + $0x48] sm:$0xff] %vm335_vm0, %v3086_v19  ;;  %v4241_v50 = vadd.f32 %v2927_v49, %v5250_v41  ;;  %v4203_v51 = vpop.f32.mrb[14].mxu0 }
 0x1e6   : > { %v3059_v52 = vadd.f32 %v4240_v23, %v5259_v16  ;;  %v4242_v6 = vadd.f32 %v4203_v51, %v5252_v2  ;;  %v2930_v9 = vpop.f32.mrb[15].mxu0 }
 0x1e7   : > { %v3057_v43 = vadd.f32 %v4241_v50, %v5259_v16  ;;  %v4243_v8 = vadd.f32 %v2930_v9, %v5254_v4 }
 0x1e8   : > { %v3091_v24 = vmax.f32 %v3059_v52, 0.0  ;;  %v3060_v38 = vadd.f32 %v4242_v6, %v5259_v16 }
 0x1e9   : > { %v3089_v14 = vmax.f32 %v3057_v43, 0.0  ;;  %v3058_v17 = vadd.f32 %v4243_v8, %v5259_v16 }
 0x1ea   : > { %3123 = vst.msk [vmem:[%s5266_s29 + $0x70] sm:$0xff] %vm335_vm0, %v3091_v24  ;;  %v3092_v41 = vmax.f32 %v3060_v38, 0.0  ;;  %v4046_v32 = vpop.f32.mrb[16].mxu1 }
 0x1eb   : > { %3121 = vst.msk [vmem:[%s5266_s29 + $0x60] sm:$0xff] %vm335_vm0, %v3089_v14  ;;  %v3090_v33 = vmax.f32 %v3058_v17, 0.0  ;;  %v4206_v2 = vpop.f32.mrb[16].mxu0  ;;  %v1652_v34 = vpop.f32.mrb[17].mxu1 }
 0x1ec   : > { %3124 = vst.msk [vmem:[%s5266_s29 + $0x78] sm:$0xff] %vm335_vm0, %v3092_v41  ;;  %v4244_v35 = vadd.f32 %v4206_v2, %v4046_v32  ;;  %v2943_v4 = vpop.f32.mrb[17].mxu0  ;;  %v4047_v36 = vpop.f32.mrb[18].mxu1 }
 0x1ed   : > { %3122 = vst.msk [vmem:[%s5266_s29 + $0x68] sm:$0xff] %vm335_vm0, %v3090_v33  ;;  %v4245_v47 = vadd.f32 %v2943_v4, %v1652_v34  ;;  %v4207_v45 = vpop.f32.mrb[18].mxu0  ;;  %v1655_v37 = vpop.f32.mrb[19].mxu1 }
 0x1ee   : > { %v3063_v25 = vadd.f32 %v4244_v35, %v5259_v16  ;;  %v4246_v53 = vadd.f32 %v4207_v45, %v4047_v36  ;;  %v2946_v54 = vpop.f32.mrb[19].mxu0 }
 0x1ef   : > { %v3061_v55 = vadd.f32 %v4245_v47, %v5259_v16  ;;  %v4247_v60 = vadd.f32 %v2946_v54, %v1655_v37 }
 0x1f0   : > { %v3095_v20 = vmax.f32 %v3063_v25, 0.0  ;;  %v3064_v15 = vadd.f32 %v4246_v53, %v5259_v16 }
 0x1f1   : > { %v3093_v1 = vmax.f32 %v3061_v55, 0.0  ;;  %v3062_v3 = vadd.f32 %v4247_v60, %v5259_v16 }
 0x1f2   : > { %3127 = vst.msk [vmem:[%s5266_s29 + $0x90] sm:$0xff] %vm335_vm0, %v3095_v20  ;;  %v3096_v21 = vmax.f32 %v3064_v15, 0.0  ;;  %v4050_v5 = vpop.f32.mrb[20].mxu1 }
 0x1f3   : > { %3125 = vst.msk [vmem:[%s5266_s29 + $0x80] sm:$0xff] %vm335_vm0, %v3093_v1  ;;  %v3094_v30 = vmax.f32 %v3062_v3, 0.0  ;;  %v4210_v31 = vpop.f32.mrb[20].mxu0  ;;  %v1668_v7 = vpop.f32.mrb[21].mxu1 }
 0x1f4   : > { %3128 = vst.msk [vmem:[%s5266_s29 + $0x98] sm:$0xff] %vm335_vm0, %v3096_v21  ;;  %v4248_v39 = vadd.f32 %v4210_v31, %v4050_v5  ;;  %v2959_v40 = vpop.f32.mrb[21].mxu0  ;;  %v4051_v46 = vpop.f32.mrb[22].mxu1 }
 0x1f5   : > { %3126 = vst.msk [vmem:[%s5266_s29 + $0x88] sm:$0xff] %vm335_vm0, %v3094_v30  ;;  %v4249_v56 = vadd.f32 %v2959_v40, %v1668_v7  ;;  %v4211_v57 = vpop.f32.mrb[22].mxu0  ;;  %v1671_v58 = vpop.f32.mrb[23].mxu1 }
 0x1f6   : > { %v3067_v59 = vadd.f32 %v4248_v39, %v5259_v16  ;;  %v4250_v10 = vadd.f32 %v4211_v57, %v4051_v46  ;;  %v2962_v11 = vpop.f32.mrb[23].mxu0 }
 0x1f7   : > { %v3065_v12 = vadd.f32 %v4249_v56, %v5259_v16  ;;  %v4251_v13 = vadd.f32 %v2962_v11, %v1671_v58 }
 0x1f8   : > { %v3099_v26 = vmax.f32 %v3067_v59, 0.0  ;;  %v3068_v27 = vadd.f32 %v4250_v10, %v5259_v16 }
 0x1f9   : > { %v3097_v28 = vmax.f32 %v3065_v12, 0.0  ;;  %v3066_v29 = vadd.f32 %v4251_v13, %v5259_v16 }
 0x1fa   : > { %3131 = vst.msk [vmem:[%s5266_s29 + $0xb0] sm:$0xff] %vm335_vm0, %v3099_v26  ;;  %v3100_v42 = vmax.f32 %v3068_v27, 0.0  ;;  %v4054_v44 = vpop.f32.mrb[24].mxu1 }
 0x1fb   : > { %3129 = vst.msk [vmem:[%s5266_s29 + $0xa0] sm:$0xff] %vm335_vm0, %v3097_v28  ;;  %v3098_v48 = vmax.f32 %v3066_v29, 0.0  ;;  %v4214_v61 = vpop.f32.mrb[24].mxu0  ;;  %v1684_v62 = vpop.f32.mrb[25].mxu1 }
 0x1fc   : > { %3132 = vst.msk [vmem:[%s5266_s29 + $0xb8] sm:$0xff] %vm335_vm0, %v3100_v42  ;;  %v4252_v63 = vadd.f32 %v4214_v61, %v4054_v44  ;;  %v2975_v0 = vpop.f32.mrb[25].mxu0  ;;  %v4055_v18 = vpop.f32.mrb[26].mxu1 }
 0x1fd   : > { %3130 = vst.msk [vmem:[%s5266_s29 + $0xa8] sm:$0xff] %vm335_vm0, %v3098_v48  ;;  %v4253_v19 = vadd.f32 %v2975_v0, %v1684_v62  ;;  %v4215_v22 = vpop.f32.mrb[26].mxu0  ;;  %v1687_v23 = vpop.f32.mrb[27].mxu1 }
 0x1fe   : > { %v3071_v49 = vadd.f32 %v4252_v63, %v5259_v16  ;;  %v4254_v50 = vadd.f32 %v4215_v22, %v4055_v18  ;;  %v2978_v51 = vpop.f32.mrb[27].mxu0 }
 0x1ff   : > { %v3069_v52 = vadd.f32 %v4253_v19, %v5259_v16  ;;  %v4255_v6 = vadd.f32 %v2978_v51, %v1687_v23 }
 0x200   : > { %v3103_v9 = vmax.f32 %v3071_v49, 0.0  ;;  %v3072_v43 = vadd.f32 %v4254_v50, %v5259_v16 }
 0x201   : > { %v3101_v8 = vmax.f32 %v3069_v52, 0.0  ;;  %v3070_v24 = vadd.f32 %v4255_v6, %v5259_v16 }
 0x202   : > { %3135 = vst.msk [vmem:[%s5266_s29 + $0xd0] sm:$0xff] %vm335_vm0, %v3103_v9  ;;  %v3104_v38 = vmax.f32 %v3072_v43, 0.0  ;;  %v4058_v14 = vpop.f32.mrb[28].mxu1 }
 0x203   : > { %3133 = vst.msk [vmem:[%s5266_s29 + $0xc0] sm:$0xff] %vm335_vm0, %v3101_v8  ;;  %v3102_v17 = vmax.f32 %v3070_v24, 0.0  ;;  %v4218_v41 = vpop.f32.mrb[28].mxu0  ;;  %v1700_v32 = vpop.f32.mrb[29].mxu1 }
 0x204   : > { %3136 = vst.msk [vmem:[%s5266_s29 + $0xd8] sm:$0xff] %vm335_vm0, %v3104_v38  ;;  %v4256_v33 = vadd.f32 %v4218_v41, %v4058_v14  ;;  %v2991_v2 = vpop.f32.mrb[29].mxu0  ;;  %v4059_v34 = vpop.f32.mrb[30].mxu1 }
 0x205   : > { %3134 = vst.msk [vmem:[%s5266_s29 + $0xc8] sm:$0xff] %vm335_vm0, %v3102_v17  ;;  %v4257_v35 = vadd.f32 %v2991_v2, %v1700_v32  ;;  %v4219_v4 = vpop.f32.mrb[30].mxu0  ;;  %v1703_v36 = vpop.f32.mrb[31].mxu1 }
 0x206   : > { %v3075_v47 = vadd.f32 %v4256_v33, %v5259_v16  ;;  %v4258_v45 = vadd.f32 %v4219_v4, %v4059_v34  ;;  %v2994_v37 = vpop.f32.mrb[31].mxu0 }
 0x207   : > { %v3073_v25 = vadd.f32 %v4257_v35, %v5259_v16  ;;  %v4259_v53 = vadd.f32 %v2994_v37, %v1703_v36 }
 0x208   : > { %v3107_v54 = vmax.f32 %v3075_v47, 0.0  ;;  %v3076_v55 = vadd.f32 %v4258_v45, %v5259_v16 }
 0x209   : > { %v3105_v60 = vmax.f32 %v3073_v25, 0.0  ;;  %v3074_v20 = vadd.f32 %v4259_v53, %v5259_v16 }
 0x20a   : > { %3139 = vst.msk [vmem:[%s5266_s29 + $0xf0] sm:$0xff] %vm335_vm0, %v3107_v54  ;;  %v3108_v15 = vmax.f32 %v3076_v55, 0.0 }
 0x20b   : > { %3137 = vst.msk [vmem:[%s5266_s29 + $0xe0] sm:$0xff] %vm335_vm0, %v3105_v60  ;;  %v3106_v1 = vmax.f32 %v3074_v20, 0.0 }
 0x20c   : > { %3140 = vst.msk [vmem:[%s5266_s29 + $0xf8] sm:$0xff] %vm335_vm0, %v3108_v15 }
 0x20d   : > { %3138 = vst.msk [vmem:[%s5266_s29 + $0xe8] sm:$0xff] %vm335_vm0, %v3106_v1 }
 0x20e PF: > { %s13_s14 = sadd.s32 1, %s4567_s14   ;;  %s5380_s12 = smov %s4563_s13 }
 0x20f   : > { %p10_p5 = scmp.ge.s32.totalorder %s13_s14, 6   ;;  %s5381_s13 = smov %s5383_s15 }
 0x211   :  { %12 = sbr.rel (!%p10_p5) target bundleno = 2 (0x2), region = 73 }

// kernel: perceptual_loss.11
= control target key start
LH: loop header
LB: loop body
LE: loop exit
PB: predicated region body
PF: predicated region fallthrough
CT: control target
= control target key end

     0   :  { %s2069_s12 = smov 0   ;;  %s2071_s13 = smov 0   ;;  %s2349_s0 = inlined_call_operand.vmem [shape: f32[4,10,10,64], index: 0, kind: input, shape index: {}]   ;;  %s2350_s1 = inlined_call_operand.vmem [shape: bf16[9,64,128], index: 1, kind: input, shape index: {}]   ;;  %s2351_s2 = inlined_call_operand.vmem [shape: f32[1,128], index: 2, kind: input, shape index: {}]   ;;  %s2352_s3 = inlined_call_operand.vmem [shape: f32[4,64,128], index: 3, kind: output, shape index: {}]  }
   0x1   :  { %s2073_s14 = smov 0  }
   0x2 LB: > { %s25_s15 = sadd.s32 1, %s2043_s13  ;;  %p1484_p0 = scmp.ge.s32.totalorder %s2047_s14, 1  ;;  %s2047_s14 = sphi %s2073_s14, %s13_s14   ;;  %s2043_s13 = sphi %s2071_s13, %s2354_s13   ;;  %s2039_s12 = sphi %s2069_s12, %s2353_s12  }
   0x3   : > { %p27_p1 = scmp.ge.s32.totalorder %s25_s15, 4  ;;  %p151_p2 = scmp.lt.s32.totalorder %s2047_s14, 5 }
   0x5   : > { %s2356_s15 = smov (%p27_p1, %s25_s15), 0  ;;  %p152_p3 = pnand %p1484_p0, %p151_p2 }
   0x6   : > { %v1989_v0 = vld [vmem:[%s2350_s1 + $0x20] sm:$0xff] (!%p152_p3)   ;;  %p179_p4 = scmp.lt.s32.totalorder (!%p152_p3), %s2039_s12, 3  ;;  %v1991_v2 = vld [vmem:[%s2350_s1 + $0x28] sm:$0xff] (!%p152_p3)   ;;  %v1993_v4 = vld [vmem:[%s2350_s1 + $0x30] sm:$0xff] (!%p152_p3)   ;;  %vm263_vm0 = vcmask (!%p152_p3), 523264  }
   0x7   : > { %155 = sbr.rel (%p152_p3) target bundleno = 310 (0x136), region = 32  ;;  %v1990_v1 = vld [vmem:[%s2350_s1 + $0x80] sm:$0xff] (!%p152_p3)   ;;  %1748 = vmatprep.subr.bf16.mxu1 (!%p152_p3), %v1989_v0  ;;  %v1992_v3 = vld [vmem:[%s2350_s1 + $0x88] sm:$0xff] (!%p152_p3)   ;;  %v1994_v5 = vld [vmem:[%s2350_s1 + $0x90] sm:$0xff] (!%p152_p3)  }
   0x8   : > { %1812 = vmatprep.subr.bf16.mxu0 (!%p152_p3), %v1990_v1  ;;  %1749 = vmatpush3.bf16.msra.mxu1 (!%p152_p3), %v1989_v0  ;;  %v1995_v6 = vld [vmem:[%s2350_s1 + $0x38] sm:$0xff] (!%p152_p3)   ;;  %v1997_v14 = vld [vmem:[%s2350_s1] sm:$0xff] (!%p152_p3)   ;;  %v1999_v21 = vld [vmem:[%s2350_s1 + $0x8] sm:$0xff] (!%p152_p3)  }
   0x9   : > { %1813 = vmatpush3.bf16.msra.mxu0 (!%p152_p3), %v1990_v1  ;;  %1750 = vmatprep.subr.bf16.mxu1 (!%p152_p3), %v1991_v2  ;;  %v1996_v10 = vld [vmem:[%s2350_s1 + $0x98] sm:$0xff] (!%p152_p3)   ;;  %v1998_v16 = vld [vmem:[%s2350_s1 + $0xa0] sm:$0xff] (!%p152_p3)   ;;  %v2000_v22 = vld [vmem:[%s2350_s1 + $0xa8] sm:$0xff] (!%p152_p3)  }
   0xa   : > { %1814 = vmatprep.subr.bf16.mxu0 (!%p152_p3), %v1992_v3  ;;  %v2001_v26 = vld [vmem:[%s2350_s1 + $0x10] sm:$0xff] (!%p152_p3)   ;;  %v2003_v35 = vld [vmem:[%s2350_s1 + $0x18] sm:$0xff] (!%p152_p3)   ;;  %v2005_v41 = vld [vmem:[%s2350_s1 + $0x40] sm:$0xff] (!%p152_p3)  }
   0xb   : > { %v2002_v28 = vld [vmem:[%s2350_s1 + $0xb0] sm:$0xff] (!%p152_p3)   ;;  %v2004_v36 = vld [vmem:[%s2350_s1 + $0xb8] sm:$0xff] (!%p152_p3)   ;;  %v2006_v44 = vld [vmem:[%s2350_s1 + $0xc0] sm:$0xff] (!%p152_p3)  }
   0xc   : > { %1751 = vmatpush3.bf16.msra.mxu1 (!%p152_p3), %v1991_v2  ;;  %v2007_v51 = vld [vmem:[%s2350_s1 + $0x48] sm:$0xff] (!%p152_p3)   ;;  %v2009_v57 = vld [vmem:[%s2350_s1 + $0x50] sm:$0xff] (!%p152_p3)   ;;  %v2011_v0 = vld [vmem:[%s2350_s1 + $0x58] sm:$0xff] (!%p152_p3)  }
   0xd   : > { %1815 = vmatpush3.bf16.msra.mxu0 (!%p152_p3), %v1992_v3  ;;  %1752 = vmatprep.subr.bf16.mxu1 (!%p152_p3), %v1993_v4  ;;  %v2008_v52 = vld [vmem:[%s2350_s1 + $0xc8] sm:$0xff] (!%p152_p3)   ;;  %v2010_v60 = vld [vmem:[%s2350_s1 + $0xd0] sm:$0xff] (!%p152_p3)   ;;  %v2012_v1 = vld [vmem:[%s2350_s1 + $0xd8] sm:$0xff] (!%p152_p3)  }
   0xe   : > { %s2358_s12 = smov (!%p179_p4, %s2039_s12), 3  ;;  %1816 = vmatprep.subr.bf16.mxu0 %v1994_v5  ;;  %v2013_v3 = vld [vmem:[%s2350_s1 + $0x60] sm:$0xff]  }
   0xf   : > { %s1964_s26 = smul.u32 160, %s2358_s12 }
  0x10   : > { %1753 = vmatpush3.bf16.msra.mxu1 %v1993_v4  ;;  %v2014_v4 = vld [vmem:[%s2350_s1 + $0xe0] sm:$0xff]  }
  0x11   : > { %s2111_s4 = scalar_lea.vmem %s2349_s0, %s1964_s26  ;;  %1817 = vmatpush3.bf16.msra.mxu0 %v1994_v5  ;;  %1754 = vmatprep.subr.bf16.mxu1 %v1995_v6  ;;  %s1675_s26 = sshll.u32 %s2358_s12, 6 }
  0x12   : > { %v218_v7 = vld [vmem:[%s2111_s4 + $0x1] sm:$0xff]  ;;  %v219_v8 = vld [vmem:[%s2111_s4 + $0x11] sm:$0xff]  ;;  %1818 = vmatprep.subr.bf16.mxu0 %v1996_v10  ;;  %s192_s29 = scalar_lea.vmem %s2352_s3, %s1675_s26 }
  0x13   : > { %v1553_v9 = vld [vmem:[%s2111_s4 + $0x21] sm:$0xff]  ;;  %v226_v11 = vpack.c.bf16 %v219_v8, %v218_v7  ;;  %v221_v13 = vld [vmem:[%s2111_s4 + $0x31] sm:$0xff] }
  0x14   : > { %v713_v12 = vpack.c.bf16 %v1553_v9, %v219_v8  ;;  %v1555_v15 = vld [vmem:[%s2111_s4 + $0x41] sm:$0xff]  ;;  %v2132_v17 = vpack.c.bf16 %v221_v13, %v1553_v9  ;;  %v223_v18 = vld [vmem:[%s2111_s4 + $0x51] sm:$0xff]  ;;  %1755 = vmatpush3.bf16.msra.mxu1 %v1995_v6 }
  0x15   : > { %1756 = vmatprep.mubr.msk.bf16.mxu1 %vm263_vm0, %v226_v11  ;;  %v714_v19 = vpack.c.bf16 %v1555_v15, %v221_v13  ;;  %v1557_v20 = vld [vmem:[%s2111_s4 + $0x61] sm:$0xff]  ;;  %1819 = vmatpush3.bf16.msra.mxu0 %v1996_v10  ;;  %v2142_v23 = vpack.c.bf16 %v223_v18, %v1555_v15  ;;  %v225_v25 = vld [vmem:[%s2111_s4 + $0x71] sm:$0xff] }
  0x16   : > { %1820 = vmatprep.mubr.msk.bf16.mxu0 %vm263_vm0, %v713_v12  ;;  %1764 = vmatprep.subr.bf16.mxu1 %v1997_v14  ;;  %v715_v24 = vpack.c.bf16 %v1557_v20, %v223_v18  ;;  %v2152_v27 = vld [vmem:[%s2111_s4 + $0x81] sm:$0xff]  ;;  %v2161_v30 = vpack.c.bf16 %v225_v25, %v1557_v20  ;;  %v2164_v31 = vld [vmem:[%s2111_s4 + $0x10] sm:$0xff]  ;;  %v2019_v15 = vld [vmem:[%s2350_s1 + $0x78] sm:$0xff]  }
  0x17   : > { %1828 = vmatprep.subr.bf16.mxu0 %v1998_v16  ;;  %1757 = vmatmul.mubr.msk.bf16.vlgmr.msra.gmra.mrb[0].mxu1 %vm263_vm0, %v2132_v17  ;;  %v198_v29 = vld [vmem:[%s2111_s4] sm:$0xff]  ;;  %v2167_v32 = vld [vmem:[%s2111_s4 + $0x12] sm:$0xff]  ;;  %v716_v33 = vpack.c.bf16 %v2152_v27, %v225_v25  ;;  %v2015_v6 = vld [vmem:[%s2350_s1 + $0x68] sm:$0xff]  }
  0x18   : > { %1821 = vmatmul.mubr.msk.bf16.vlgmr.msra.gmra.mrb[0].mxu0 %vm263_vm0, %v714_v19  ;;  %1765 = vmatpush3.bf16.msra.mxu1 %v1997_v14  ;;  %v2171_v34 = vld [vmem:[%s2111_s4 + $0x22] sm:$0xff]  ;;  %v206_v37 = vpack.c.bf16 %v2164_v31, %v198_v29  ;;  %v2188_v40 = vld [vmem:[%s2111_s4 + $0x30] sm:$0xff] }
  0x19   : > { %1829 = vmatpush3.bf16.msra.mxu0 %v1998_v16  ;;  %1766 = vmatprep.subr.bf16.mxu1 %v1999_v21  ;;  %v843_v38 = vpack.c.bf16 %v2171_v34, %v2167_v32  ;;  %v2185_v39 = vld [vmem:[%s2111_s4 + $0x20] sm:$0xff]  ;;  %v1578_v42 = vld [vmem:[%s2111_s4 + $0x32] sm:$0xff]  ;;  %v2016_v7 = vld [vmem:[%s2350_s1 + $0xe8] sm:$0xff]  }
  0x1a   : > { %1830 = vmatprep.subr.bf16.mxu0 %v2000_v22  ;;  %1760 = vmatprep.mubr.msk.bf16.mxu1 %vm263_vm0, %v2142_v23  ;;  %v1579_v43 = vld [vmem:[%s2111_s4 + $0x42] sm:$0xff]  ;;  %v2204_v46 = vld [vmem:[%s2111_s4 + $0x50] sm:$0xff]  ;;  %v207_v47 = vpack.c.bf16 %v2188_v40, %v2185_v39  ;;  %v2261_v5 = vpack.c.bf16 %v1578_v42, %v2171_v34  ;;  %v2020_v16 = vld [vmem:[%s2350_s1 + $0xf8] sm:$0xff]   ;;  %v583_v18 = vpack.c.bf16 %v2185_v39, %v2164_v31 }
  0x1b   : > { %1824 = vmatprep.mubr.msk.bf16.mxu0 %vm263_vm0, %v715_v24  ;;  %v2200_v45 = vld [vmem:[%s2111_s4 + $0x40] sm:$0xff]  ;;  %v1580_v48 = vld [vmem:[%s2111_s4 + $0x52] sm:$0xff]  ;;  %v844_v49 = vpack.c.bf16 %v1579_v43, %v1578_v42 }
  0x1c   : > { %1767 = vmatpush3.bf16.msra.mxu1 %v1999_v21  ;;  %v1581_v50 = vld [vmem:[%s2111_s4 + $0x62] sm:$0xff]  ;;  %v208_v53 = vpack.c.bf16 %v2204_v46, %v2200_v45  ;;  %v2223_v55 = vld [vmem:[%s2111_s4 + $0x70] sm:$0xff]  ;;  %v2269_v8 = vpack.c.bf16 %v1580_v48, %v1579_v43  ;;  %v584_v20 = vpack.c.bf16 %v2200_v45, %v2188_v40  ;;  %v1672_v45 = vld [vmem:[%s2351_s2] ss:$0 sm:$0xff] }
  0x1d   : > { %1831 = vmatpush3.bf16.msra.mxu0 %v2000_v22  ;;  %1768 = vmatprep.subr.bf16.mxu1 %v2001_v26  ;;  %v2220_v54 = vld [vmem:[%s2111_s4 + $0x60] sm:$0xff]  ;;  %v845_v56 = vpack.c.bf16 %v1581_v50, %v1580_v48  ;;  %v1582_v58 = vld [vmem:[%s2111_s4 + $0x72] sm:$0xff]  ;;  %v2022_v21 = vld [vmem:[%s2350_s1 + $0x108] sm:$0xff]  }
  0x1e   : > { %1832 = vmatprep.subr.bf16.mxu0 %v2002_v28  ;;  %v2232_v59 = vld [vmem:[%s2111_s4 + $0x82] sm:$0xff]  ;;  %v209_v61 = vpack.c.bf16 %v2223_v55, %v2220_v54  ;;  %v2017_v9 = vld [vmem:[%s2350_s1 + $0x70] sm:$0xff]   ;;  %v453_v13 = vpack.c.bf16 %v1582_v58, %v1581_v50  ;;  %v585_v22 = vpack.c.bf16 %v2220_v54, %v2204_v46 }
  0x1f   : > { %1761 = vmatmul.mubr.msk.bf16.gmra.mrb[4].mxu1 %vm263_vm0, %v2161_v30  ;;  %v442_v62 = vld [vmem:[%s2111_s4 + $0x2] sm:$0xff]  ;;  %v846_v63 = vpack.c.bf16 %v2232_v59, %v1582_v58  ;;  %v1607_v11 = vld [vmem:[%s2111_s4 + $0x90] sm:$0xff] }
  0x20   : > { %1825 = vmatmul.mubr.msk.bf16.gmra.mrb[4].mxu0 %vm263_vm0, %v716_v33  ;;  %1769 = vmatpush3.bf16.msra.mxu1 %v2001_v26  ;;  %v450_v2 = vpack.c.bf16 %v2167_v32, %v442_v62  ;;  %v1606_v10 = vld [vmem:[%s2111_s4 + $0x80] sm:$0xff]  ;;  %v2018_v12 = vld [vmem:[%s2350_s1 + $0xf0] sm:$0xff]   ;;  %v2024_v26 = vld [vmem:[%s2350_s1 + $0x118] sm:$0xff]  }
  0x21   : > { %1833 = vmatpush3.bf16.msra.mxu0 %v2002_v28  ;;  %1770 = vmatprep.subr.bf16.mxu1 %v2003_v35  ;;  %v979_v14 = vpack.c.bf16 %v1607_v11, %v1606_v10  ;;  %v2021_v19 = vld [vmem:[%s2350_s1 + $0x100] sm:$0xff]   ;;  %v2023_v24 = vld [vmem:[%s2350_s1 + $0x110] sm:$0xff]   ;;  %v586_v25 = vpack.c.bf16 %v1606_v10, %v2223_v55 }
  0x22   : > { %1834 = vmatprep.subr.bf16.mxu0 %v2004_v36  ;;  %1772 = vmatprep.mubr.msk.bf16.mxu1 %vm263_vm0, %v206_v37  ;;  %v1655_v28 = vld [vmem:[%s2111_s4 + $0x92] sm:$0xff] }
  0x23   : > { %1836 = vmatprep.mubr.msk.bf16.mxu0 %vm263_vm0, %v843_v38 }
  0x24   : > { %1771 = vmatpush3.bf16.msra.mxu1 %v2003_v35 }
  0x25   : > { %1835 = vmatpush3.bf16.msra.mxu0 %v2004_v36  ;;  %1780 = vmatprep.subr.bf16.mxu1 %v2005_v41 }
  0x26   : > { %1844 = vmatprep.subr.bf16.mxu0 %v2006_v44 }
  0x27   : > { %1773 = vmatmul.mubr.msk.bf16.vlgmr.msra.gmra.mrb[0].mxu1 %vm263_vm0, %v207_v47 }
  0x28   : > { %1837 = vmatmul.mubr.msk.bf16.vlgmr.msra.gmra.mrb[0].mxu0 %vm263_vm0, %v844_v49  ;;  %1781 = vmatpush3.bf16.msra.mxu1 %v2005_v41 }
  0x29   : > { %1845 = vmatpush3.bf16.msra.mxu0 %v2006_v44  ;;  %1782 = vmatprep.subr.bf16.mxu1 %v2007_v51 }
  0x2a   : > { %1846 = vmatprep.subr.bf16.mxu0 %v2008_v52  ;;  %1776 = vmatprep.mubr.msk.bf16.mxu1 %vm263_vm0, %v208_v53 }
  0x2b   : > { %1840 = vmatprep.mubr.msk.bf16.mxu0 %vm263_vm0, %v845_v56 }
  0x2c   : > { %1783 = vmatpush3.bf16.msra.mxu1 %v2007_v51 }
  0x2d   : > { %1847 = vmatpush3.bf16.msra.mxu0 %v2008_v52  ;;  %1784 = vmatprep.subr.bf16.mxu1 %v2009_v57 }
  0x2e   : > { %1848 = vmatprep.subr.bf16.mxu0 %v2010_v60 }
  0x2f   : > { %1777 = vmatmul.mubr.msk.bf16.gmra.mrb[4].mxu1 %vm263_vm0, %v209_v61 }
  0x30   : > { %1841 = vmatmul.mubr.msk.bf16.gmra.mrb[4].mxu0 %vm263_vm0, %v846_v63  ;;  %1785 = vmatpush3.bf16.msra.mxu1 %v2009_v57 }
  0x31   : > { %1849 = vmatpush3.bf16.msra.mxu0 %v2010_v60  ;;  %1786 = vmatprep.subr.bf16.mxu1 %v2011_v0 }
  0x32   : > { %1850 = vmatprep.subr.bf16.mxu0 %v2012_v1  ;;  %1788 = vmatprep.mubr.msk.bf16.mxu1 %vm263_vm0, %v450_v2 }
  0x33   : > { %1852 = vmatprep.mubr.msk.bf16.mxu0 %vm263_vm0, %v207_v47 }
  0x34   : > { %1787 = vmatpush3.bf16.msra.mxu1 %v2011_v0 }
  0x35   : > { %1851 = vmatpush3.bf16.msra.mxu0 %v2012_v1  ;;  %1796 = vmatprep.subr.bf16.mxu1 %v2013_v3 }
  0x36   : > { %1860 = vmatprep.subr.bf16.mxu0 %v2014_v4 }
  0x37   : > { %1789 = vmatmul.mubr.msk.bf16.vlgmr.msra.gmra.mrb[0].mxu1 %vm263_vm0, %v2261_v5 }
  0x38   : > { %1853 = vmatmul.mubr.msk.bf16.vlgmr.msra.gmra.mrb[0].mxu0 %vm263_vm0, %v208_v53  ;;  %1797 = vmatpush3.bf16.msra.mxu1 %v2013_v3 }
  0x39   : > { %1861 = vmatpush3.bf16.msra.mxu0 %v2014_v4  ;;  %1798 = vmatprep.subr.bf16.mxu1 %v2015_v6 }
  0x3a   : > { %1862 = vmatprep.subr.bf16.mxu0 %v2016_v7  ;;  %1792 = vmatprep.mubr.msk.bf16.mxu1 %vm263_vm0, %v2269_v8 }
  0x3b   : > { %1856 = vmatprep.mubr.msk.bf16.mxu0 %vm263_vm0, %v209_v61 }
  0x3c   : > { %1799 = vmatpush3.bf16.msra.mxu1 %v2015_v6 }
  0x3d   : > { %1863 = vmatpush3.bf16.msra.mxu0 %v2016_v7  ;;  %1800 = vmatprep.subr.bf16.mxu1 %v2017_v9 }
  0x3e   : > { %1864 = vmatprep.subr.bf16.mxu0 %v2018_v12 }
  0x3f   : > { %1793 = vmatmul.mubr.msk.bf16.gmra.mrb[4].mxu1 %vm263_vm0, %v453_v13 }
  0x40   : > { %1857 = vmatmul.mubr.msk.bf16.gmra.mrb[4].mxu0 %vm263_vm0, %v979_v14  ;;  %1801 = vmatpush3.bf16.msra.mxu1 %v2017_v9 }
  0x41   : > { %1865 = vmatpush3.bf16.msra.mxu0 %v2018_v12  ;;  %1802 = vmatprep.subr.bf16.mxu1 %v2019_v15 }
  0x42   : > { %1866 = vmatprep.subr.bf16.mxu0 %v2020_v16  ;;  %1804 = vmatprep.mubr.msk.bf16.mxu1 %vm263_vm0, %v583_v18 }
  0x43   : > { %1868 = vmatprep.mubr.msk.bf16.mxu0 %vm263_vm0, %v2132_v17  ;;  %v1631_v17 = vld [vmem:[%s2111_s4 + $0x91] sm:$0xff] }
  0x44   : > { %1803 = vmatpush3.bf16.msra.mxu1 %v2019_v15 }
  0x45   : > { %1867 = vmatpush3.bf16.msra.mxu0 %v2020_v16  ;;  %1892 = vmatprep.subr.bf16.mxu1 %v2021_v19 }
  0x46   : > { %1876 = vmatprep.subr.bf16.mxu0 %v2021_v19 }
  0x47   : > { %1805 = vmatmul.mubr.msk.bf16.vlgmr.msra.gmra.mrb[0].mxu1 %vm263_vm0, %v584_v20 }
  0x48   : > { %1869 = vmatmul.mubr.msk.bf16.vlgmr.msra.gmra.mrb[0].mxu0 %vm263_vm0, %v2142_v23  ;;  %1896 = vmatpush3.bf16.msra.mxu1 %v2021_v19  ;;  %v1109_v23 = vpack.c.bf16 %v1631_v17, %v2152_v27  ;;  %v1239_v27 = vpack.c.bf16 %v1655_v28, %v2232_v59 }
  0x49   : > { %1877 = vmatpush3.bf16.msra.mxu0 %v2021_v19  ;;  %1893 = vmatprep.subr.bf16.mxu1 %v2022_v21 }
  0x4a   : > { %1878 = vmatprep.subr.bf16.mxu0 %v2022_v21  ;;  %1808 = vmatprep.mubr.msk.bf16.mxu1 %vm263_vm0, %v585_v22 }
  0x4b   : > { %1872 = vmatprep.mubr.msk.bf16.mxu0 %vm263_vm0, %v2161_v30 }
  0x4c   : > { %1897 = vmatpush3.bf16.msra.mxu1 %v2022_v21 }
  0x4d   : > { %1879 = vmatpush3.bf16.msra.mxu0 %v2022_v21  ;;  %1894 = vmatprep.subr.bf16.mxu1 %v2023_v24 }
  0x4e   : > { %1880 = vmatprep.subr.bf16.mxu0 %v2023_v24 }
  0x4f   : > { %1809 = vmatmul.mubr.msk.bf16.gmra.mrb[4].mxu1 %vm263_vm0, %v586_v25 }
  0x50   : > { %1873 = vmatmul.mubr.msk.bf16.gmra.mrb[4].mxu0 %vm263_vm0, %v1109_v23  ;;  %1898 = vmatpush3.bf16.msra.mxu1 %v2023_v24 }
  0x51   : > { %1881 = vmatpush3.bf16.msra.mxu0 %v2023_v24  ;;  %1895 = vmatprep.subr.bf16.mxu1 %v2024_v26 }
  0x52   : > { %1882 = vmatprep.subr.bf16.mxu0 %v2024_v26  ;;  %1884 = vmatprep.mubr.msk.bf16.mxu0 %vm263_vm0, %v2261_v5 }
  0x53   : > { %1888 = vmatprep.mubr.msk.bf16.mxu1 %vm263_vm0, %v453_v13 }
  0x54   : > { %1899 = vmatpush3.bf16.msra.mxu1 %v2024_v26 }
  0x55   : > { %1883 = vmatpush3.bf16.msra.mxu0 %v2024_v26 }
  0x57   : > { %1889 = vmatmul.mubr.msk.bf16.vlgmr.msra.gmra.mrb[8].mxu1 %vm263_vm0, %v1239_v27 }
  0x58   : > { %1885 = vmatmul.mubr.msk.bf16.vlgmr.msra.gmra.mrb[0].mxu0 %vm263_vm0, %v2269_v8 }
 0x11a   : > { %v1806_v29 = vpop.f32.mrb[0].mxu1 }
 0x11b   : > { %v666_v30 = vpop.f32.mrb[1].mxu1 }
 0x11c   : > { %v1807_v31 = vpop.f32.mrb[2].mxu1 }
 0x11d   : > { %v669_v32 = vpop.f32.mrb[3].mxu1 }
 0x122   : > { %v1810_v33 = vpop.f32.mrb[4].mxu1 }
 0x123   : > { %v1874_v34 = vpop.f32.mrb[4].mxu0  ;;  %v682_v35 = vpop.f32.mrb[5].mxu1 }
 0x124   : > { %v1904_v36 = vadd.f32 %v1874_v34, %v1810_v33  ;;  %v1205_v37 = vpop.f32.mrb[5].mxu0  ;;  %v1811_v38 = vpop.f32.mrb[6].mxu1 }
 0x125   : > { %v1906_v39 = vadd.f32 %v1205_v37, %v682_v35  ;;  %v1875_v40 = vpop.f32.mrb[6].mxu0  ;;  %v685_v41 = vpop.f32.mrb[7].mxu1 }
 0x126   : > { %v1908_v42 = vadd.f32 %v1875_v40, %v1811_v38  ;;  %v1208_v43 = vpop.f32.mrb[7].mxu0 }
 0x127   : > { %v1910_v44 = vadd.f32 %v1208_v43, %v685_v41 }
 0x12a   : > { %v1890_v46 = vpop.f32.mrb[8].mxu1 }
 0x12b   : > { %v1886_v47 = vpop.f32.mrb[0].mxu0  ;;  %v1905_v48 = vadd.f32 %v1904_v36, %v1890_v46  ;;  %v1335_v49 = vpop.f32.mrb[9].mxu1 }
 0x12c   : > { %v1900_v50 = vadd.f32 %v1886_v47, %v1806_v29  ;;  %v1319_v51 = vpop.f32.mrb[1].mxu0  ;;  %v1907_v52 = vadd.f32 %v1906_v39, %v1335_v49  ;;  %v1891_v53 = vpop.f32.mrb[10].mxu1 }
 0x12d   : > { %v1371_v54 = vadd.f32 %v1905_v48, %v1672_v45  ;;  %v1901_v55 = vadd.f32 %v1319_v51, %v666_v30  ;;  %v1887_v56 = vpop.f32.mrb[2].mxu0  ;;  %v1909_v57 = vadd.f32 %v1908_v42, %v1891_v53  ;;  %v1338_v58 = vpop.f32.mrb[11].mxu1 }
 0x12e   : > { %v1367_v59 = vadd.f32 %v1900_v50, %v1672_v45  ;;  %v1369_v60 = vadd.f32 %v1907_v52, %v1672_v45  ;;  %v1902_v61 = vadd.f32 %v1887_v56, %v1807_v31  ;;  %v1322_v62 = vpop.f32.mrb[3].mxu0  ;;  %v1911_v63 = vadd.f32 %v1910_v44, %v1338_v58 }
 0x12f   : > { %v1379_v0 = vmax.f32 %v1371_v54, 0.0  ;;  %v1365_v1 = vadd.f32 %v1901_v55, %v1672_v45  ;;  %v1372_v2 = vadd.f32 %v1909_v57, %v1672_v45  ;;  %v1903_v3 = vadd.f32 %v1322_v62, %v669_v32 }
 0x130   : > { %v1375_v4 = vmax.f32 %v1367_v59, 0.0  ;;  %v1377_v5 = vmax.f32 %v1369_v60, 0.0  ;;  %v1368_v6 = vadd.f32 %v1902_v61, %v1672_v45  ;;  %v1370_v7 = vadd.f32 %v1911_v63, %v1672_v45 }
 0x131   : > { %1387 = vst [vmem:[%s192_s29 + $0x30] sm:$0xff] %v1379_v0  ;;  %v1373_v8 = vmax.f32 %v1365_v1, 0.0  ;;  %v1380_v9 = vmax.f32 %v1372_v2, 0.0  ;;  %v1366_v10 = vadd.f32 %v1903_v3, %v1672_v45 }
 0x132   : > { %1383 = vst [vmem:[%s192_s29 + $0x10] sm:$0xff] %v1375_v4  ;;  %1385 = vst [vmem:[%s192_s29 + $0x20] sm:$0xff] %v1377_v5  ;;  %v1376_v11 = vmax.f32 %v1368_v6, 0.0  ;;  %v1378_v12 = vmax.f32 %v1370_v7, 0.0 }
 0x133   : > { %1381 = vst [vmem:[%s192_s29] sm:$0xff] %v1373_v8  ;;  %1388 = vst [vmem:[%s192_s29 + $0x38] sm:$0xff] %v1380_v9  ;;  %v1374_v13 = vmax.f32 %v1366_v10, 0.0 }
 0x134   : > { %1384 = vst [vmem:[%s192_s29 + $0x18] sm:$0xff] %v1376_v11  ;;  %1386 = vst [vmem:[%s192_s29 + $0x28] sm:$0xff] %v1378_v12 }
 0x135   : > { %1382 = vst [vmem:[%s192_s29 + $0x8] sm:$0xff] %v1374_v13 }
 0x136 PF: > { %s13_s14 = sadd.s32 1, %s2047_s14   ;;  %s2353_s12 = smov %s2043_s13 }
 0x137   : > { %p10_p5 = scmp.ge.s32.totalorder %s13_s14, 6   ;;  %s2354_s13 = smov %s2356_s15 }
 0x139   :  { %12 = sbr.rel (!%p10_p5) target bundleno = 2 (0x2), region = 73 }

// kernel: perceptual_loss.13
= control target key start
LH: loop header
LB: loop body
LE: loop exit
PB: predicated region body
PF: predicated region fallthrough
CT: control target
= control target key end

     0   :  { %s287_s0 = inlined_call_operand.vmem [shape: f32[128,128], index: 0, kind: input, shape index: {}]   ;;  %s288_s1 = inlined_call_operand.vmem [shape: f32[128,128], index: 1, kind: input, shape index: {}]   ;;  %s289_s2 = inlined_call_operand.hbm [shape: f32[1,1], index: 2, kind: output, shape index: {}]  }
   0x1   :  { %v18_v0 = vld [vmem:[%s287_s0] sm:$0xff]  ;;  %v19_v1 = vld [vmem:[%s287_s0 + $0x8] sm:$0xff]  ;;  %v20_v2 = vld [vmem:[%s287_s0 + $0x10] sm:$0xff] }
   0x2   :  { %v34_v3 = vld [vmem:[%s288_s1] sm:$0xff]  ;;  %v35_v4 = vld [vmem:[%s288_s1 + $0x8] sm:$0xff]  ;;  %v36_v5 = vld [vmem:[%s288_s1 + $0x10] sm:$0xff] }
   0x3   :  { %v50_v6 = vsub.f32 %v18_v0, %v34_v3  ;;  %v51_v7 = vsub.f32 %v19_v1, %v35_v4  ;;  %v21_v8 = vld [vmem:[%s287_s0 + $0x18] sm:$0xff]  ;;  %v52_v10 = vsub.f32 %v20_v2, %v36_v5  ;;  %v22_v11 = vld [vmem:[%s287_s0 + $0x20] sm:$0xff] }
   0x4   :  { %v37_v9 = vld [vmem:[%s288_s1 + $0x18] sm:$0xff]  ;;  %v38_v12 = vld [vmem:[%s288_s1 + $0x20] sm:$0xff] }
   0x5   :  { %v53_v13 = vsub.f32 %v21_v8, %v37_v9  ;;  %v67_v14 = vmul.f32 %v50_v6, %v50_v6  ;;  %v68_v15 = vmul.f32 %v51_v7, %v51_v7 }
   0x6   :  { %7 = vsyncpa [#allocation3], 0  ;;  %v23_v16 = vld [vmem:[%s287_s0 + $0x28] sm:$0xff]  ;;  %v54_v18 = vsub.f32 %v22_v11, %v38_v12  ;;  %v69_v19 = vmul.f32 %v52_v10, %v52_v10  ;;  %v24_v20 = vld [vmem:[%s287_s0 + $0x30] sm:$0xff]  ;;  %vm16_vm0 = vcmask 0  }
   0x7   :  { %v39_v17 = vld [vmem:[%s288_s1 + $0x28] sm:$0xff]  ;;  %v40_v21 = vld [vmem:[%s288_s1 + $0x30] sm:$0xff]  ;;  %v70_v23 = vmul.f32 %v53_v13, %v53_v13  ;;  %v83_v24 = vadd.f32 %v68_v15, %v67_v14  ;;  %v25_v25 = vld [vmem:[%s287_s0 + $0x38] sm:$0xff]  ;;  %v159_v15 = vmov 0.0  }
   0x8   :  { %v55_v22 = vsub.f32 %v23_v16, %v39_v17  ;;  %v41_v26 = vld [vmem:[%s288_s1 + $0x38] sm:$0xff]  ;;  %v56_v27 = vsub.f32 %v24_v20, %v40_v21  ;;  %v71_v28 = vmul.f32 %v54_v18, %v54_v18  ;;  %v26_v30 = vld [vmem:[%s287_s0 + $0x40] sm:$0xff]  ;;  %v27_v35 = vld [vmem:[%s287_s0 + $0x48] sm:$0xff]  ;;  %17 = vst.msk [vmem:[#allocation2] sm:$0x1] %vm16_vm0, %v159_v15 }
   0x9   :  { %v84_v29 = vadd.f32 %v83_v24, %v69_v19  ;;  %v42_v31 = vld [vmem:[%s288_s1 + $0x40] sm:$0xff]  ;;  %v57_v32 = vsub.f32 %v25_v25, %v41_v26  ;;  %v43_v36 = vld [vmem:[%s288_s1 + $0x48] sm:$0xff]  ;;  %v28_v40 = vld [vmem:[%s287_s0 + $0x50] sm:$0xff] }
   0xa   :  { %v72_v33 = vmul.f32 %v55_v22, %v55_v22  ;;  %v58_v37 = vsub.f32 %v26_v30, %v42_v31  ;;  %v73_v38 = vmul.f32 %v56_v27, %v56_v27  ;;  %v44_v41 = vld [vmem:[%s288_s1 + $0x50] sm:$0xff]  ;;  %v59_v42 = vsub.f32 %v27_v35, %v43_v36  ;;  %v29_v45 = vld [vmem:[%s287_s0 + $0x58] sm:$0xff]  ;;  %v30_v50 = vld [vmem:[%s287_s0 + $0x60] sm:$0xff] }
   0xb   :  { %v85_v34 = vadd.f32 %v84_v29, %v70_v23  ;;  %v74_v43 = vmul.f32 %v57_v32, %v57_v32  ;;  %v45_v46 = vld [vmem:[%s288_s1 + $0x58] sm:$0xff]  ;;  %v60_v47 = vsub.f32 %v28_v40, %v44_v41  ;;  %v46_v51 = vld [vmem:[%s288_s1 + $0x60] sm:$0xff]  ;;  %v31_v55 = vld [vmem:[%s287_s0 + $0x68] sm:$0xff] }
   0xc   :  { %v75_v48 = vmul.f32 %v58_v37, %v58_v37  ;;  %v61_v52 = vsub.f32 %v29_v45, %v45_v46  ;;  %v76_v53 = vmul.f32 %v59_v42, %v59_v42  ;;  %v47_v56 = vld [vmem:[%s288_s1 + $0x68] sm:$0xff]  ;;  %v62_v57 = vsub.f32 %v30_v50, %v46_v51  ;;  %v32_v60 = vld [vmem:[%s287_s0 + $0x70] sm:$0xff]  ;;  %v33_v1 = vld [vmem:[%s287_s0 + $0x78] sm:$0xff] }
   0xd   :  { %v86_v39 = vadd.f32 %v85_v34, %v71_v28  ;;  %v77_v58 = vmul.f32 %v60_v47, %v60_v47  ;;  %v48_v61 = vld [vmem:[%s288_s1 + $0x70] sm:$0xff]  ;;  %v63_v62 = vsub.f32 %v31_v55, %v47_v56  ;;  %v49_v2 = vld [vmem:[%s288_s1 + $0x78] sm:$0xff]  ;;  %s160_s1 = smov [#allocation2]  }
   0xe   :  { %v78_v63 = vmul.f32 %v61_v52, %v61_v52  ;;  %v64_v3 = vsub.f32 %v32_v60, %v48_v61  ;;  %v79_v4 = vmul.f32 %v62_v57, %v62_v57  ;;  %v65_v6 = vsub.f32 %v33_v1, %v49_v2  ;;  %s123_s17 = sshll.u32 %s160_s1, 4  ;;  %s124_s17 = int_to_ptr.vmem [resolvable:$true] %s123_s17 }
   0xf   :  { %v87_v44 = vadd.f32 %v86_v39, %v72_v33  ;;  %v80_v7 = vmul.f32 %v63_v62, %v63_v62  ;;  %v66_v23 = vld [vmem:[#allocation2] sm:$0x1]  ;;  %s135_s18 = scalar_lea.vmem %s124_s17, 16  ;;  %s139_s19 = scalar_lea.vmem %s124_s17, 32 }
  0x10   :  { %v81_v9 = vmul.f32 %v64_v3, %v64_v3  ;;  %v82_v11 = vmul.f32 %v65_v6, %v65_v6  ;;  %p136_p0 = scmp.ne.s32.totalorder %s124_s17, %s135_s18  ;;  %p140_p1 = scmp.lt.s32.totalorder %s124_s17, %s124_s17 }
  0x11   :  { %v88_v49 = vadd.f32 %v87_v44, %v73_v38  ;;  %p141_p2 = scmp.lt.s32.totalorder %s139_s19, %s135_s18 }
  0x13   :  { %v89_v54 = vadd.f32 %v88_v49, %v74_v43  ;;  %p142_p3 = por %p141_p2, %p140_p1 }
  0x15   :  { %v90_v59 = vadd.f32 %v89_v54, %v75_v48  ;;  %p143_p4 = pnand %p142_p3, %p136_p0 }
  0x17   :  { %v91_v0 = vadd.f32 %v90_v59, %v76_v53 }
  0x19   :  { %v92_v5 = vadd.f32 %v91_v0, %v77_v58 }
  0x1b   :  { %v93_v8 = vadd.f32 %v92_v5, %v78_v63 }
  0x1d   :  { %v94_v10 = vadd.f32 %v93_v8, %v79_v4 }
  0x1f   :  { %v95_v12 = vadd.f32 %v94_v10, %v80_v7 }
  0x21   :  { %v96_v13 = vadd.f32 %v95_v12, %v81_v9 }
  0x23   :  { %v97_v14 = vadd.f32 %v96_v13, %v82_v11 }
  0x25   :  { %98 = vadd.xlane.f32.xlu0 %v97_v14 }
  0xb2   :  { %v99_v16 = vpop.xlane.xlu0 %98 }
  0xb3   :  { %v100_v17 = vrot.slane %v99_v16, 4 }
  0xb5   :  { %v101_v18 = vadd.f32 %v100_v17, %v99_v16 }
  0xb7   :  { %v102_v19 = vrot.slane %v101_v18, 2 }
  0xb9   :  { %v103_v20 = vadd.f32 %v102_v19, %v101_v18 }
  0xbb   :  { %v104_v21 = vrot.slane %v103_v20, 1 }
  0xbd   :  { %v105_v22 = vadd.f32 %v104_v21, %v103_v20 }
  0xbf   :  { %131 = vpush %v105_v22 }
  0xf0   :  { %s132_s0 = spop %131 }
  0xf1   :  { %v107_v24 = vstv %s132_s0 }
  0xf2   :  { %v108_v25 = vadd.f32 %v107_v24, %v66_v23 }
  0xf4   :  { %110 = vst.msk [vmem:[#allocation2] sm:$0x1] %vm16_vm0, %v108_v25 }
  0xfb   :  { %v114_v26 = vld [vmem:[#allocation2] sm:$0x1] }
  0xfc   :  { %v115_v27 = vmul.f32 6.1035156e-05, %v114_v26 }
  0xfe   :  { %116 = vst.msk [vmem:[#allocation2] sm:$0x1] %vm16_vm0, %v115_v27 }
  0xff   :  { %146 = shalt.err (!%p143_p4)
}
 0x100   :  { %s147_s22 = scalar_lea.hbm %s289_s2, 16 }
 0x101   :  { %p148_p5 = scmp.ne.s32.totalorder %s289_s2, %s147_s22  ;;  %p151_p6 = scmp.lt.u32.totalorder %s147_s22, %s289_s2 }
 0x103   :  { %p153_p7 = pnand %p151_p6, %p148_p5 }
 0x105   :  { %156 = shalt.err (!%p153_p7)
}
 0x106   :  { %126 = dma.vmem_to_hbm [thread:$0]  %s124_s17, 16, %s289_s2, [#allocation3]  }
 0x107   :  { %157 = dma.done.wait [#allocation3], 16  }
 0x108   :  { %158 = vsyncadd [#allocation3], 4294967280 }
 0x109   :  { %130 = vsyncpa [#allocation3], 1 }

// kernel: perceptual_loss.12
= control target key start
LH: loop header
LB: loop body
LE: loop exit
PB: predicated region body
PF: predicated region fallthrough
CT: control target
= control target key end

     0   :  { %s2464_s12 = smov 0   ;;  %s2466_s13 = smov 0   ;;  %s2848_s0 = inlined_call_operand.vmem [shape: f32[4,10,10,128], index: 0, kind: input, shape index: {}]   ;;  %s2849_s1 = inlined_call_operand.vmem [shape: bf16[9,128,128], index: 1, kind: input, shape index: {}]   ;;  %s2850_s2 = inlined_call_operand.vmem [shape: f32[1,128], index: 2, kind: input, shape index: {}]   ;;  %s2851_s3 = inlined_call_operand.vmem [shape: f32[4,64,128], index: 3, kind: output, shape index: {}]  }
   0x1   :  { %s2468_s14 = smov 0  }
   0x2 LB: > { %s25_s15 = sadd.s32 1, %s2438_s13  ;;  %p1663_p0 = scmp.ge.s32.totalorder %s2442_s14, 1  ;;  %s2442_s14 = sphi %s2468_s14, %s13_s14   ;;  %s2438_s13 = sphi %s2466_s13, %s2853_s13   ;;  %s2434_s12 = sphi %s2464_s12, %s2852_s12  }
   0x3   : > { %p27_p1 = scmp.ge.s32.totalorder %s25_s15, 4  ;;  %p151_p2 = scmp.lt.s32.totalorder %s2442_s14, 5 }
   0x5   : > { %s2855_s15 = smov (%p27_p1, %s25_s15), 0  ;;  %p152_p3 = pnand %p1663_p0, %p151_p2 }
   0x6   : > { %v2348_v0 = vld [vmem:[%s2849_s1 + $0x40] sm:$0xff] (!%p152_p3)   ;;  %p179_p4 = scmp.lt.s32.totalorder (!%p152_p3), %s2434_s12, 3  ;;  %v2350_v2 = vld [vmem:[%s2849_s1 + $0x48] sm:$0xff] (!%p152_p3)   ;;  %v2352_v4 = vld [vmem:[%s2849_s1 + $0x50] sm:$0xff] (!%p152_p3)  }
   0x7   : > { %155 = sbr.rel (%p152_p3) target bundleno = 390 (0x186), region = 32  ;;  %v2349_v1 = vld [vmem:[%s2849_s1 + $0x100] sm:$0xff] (!%p152_p3)   ;;  %2027 = vmatprep.subr.bf16.mxu1 (!%p152_p3), %v2348_v0  ;;  %v2351_v3 = vld [vmem:[%s2849_s1 + $0x108] sm:$0xff] (!%p152_p3)   ;;  %v2353_v5 = vld [vmem:[%s2849_s1 + $0x110] sm:$0xff] (!%p152_p3)  }
   0x8   : > { %2123 = vmatprep.subr.bf16.mxu0 (!%p152_p3), %v2349_v1  ;;  %2028 = vmatpush3.bf16.msra.mxu1 (!%p152_p3), %v2348_v0  ;;  %v2354_v6 = vld [vmem:[%s2849_s1 + $0x58] sm:$0xff] (!%p152_p3)   ;;  %v2356_v8 = vld [vmem:[%s2849_s1 + $0x60] sm:$0xff] (!%p152_p3)   ;;  %v2358_v10 = vld [vmem:[%s2849_s1 + $0x68] sm:$0xff] (!%p152_p3)  }
   0x9   : > { %2124 = vmatpush3.bf16.msra.mxu0 (!%p152_p3), %v2349_v1  ;;  %2029 = vmatprep.subr.bf16.mxu1 (!%p152_p3), %v2350_v2  ;;  %v2355_v7 = vld [vmem:[%s2849_s1 + $0x118] sm:$0xff] (!%p152_p3)   ;;  %v2357_v9 = vld [vmem:[%s2849_s1 + $0x120] sm:$0xff] (!%p152_p3)   ;;  %v2359_v13 = vld [vmem:[%s2849_s1 + $0x128] sm:$0xff] (!%p152_p3)  }
   0xa   : > { %2125 = vmatprep.subr.bf16.mxu0 (!%p152_p3), %v2351_v3  ;;  %v2360_v17 = vld [vmem:[%s2849_s1 + $0x70] sm:$0xff] (!%p152_p3)   ;;  %v2362_v19 = vld [vmem:[%s2849_s1 + $0x78] sm:$0xff] (!%p152_p3)   ;;  %v2364_v21 = vld [vmem:[%s2849_s1] sm:$0xff] (!%p152_p3)  }
   0xb   : > { %v2361_v18 = vld [vmem:[%s2849_s1 + $0x130] sm:$0xff] (!%p152_p3)   ;;  %v2363_v20 = vld [vmem:[%s2849_s1 + $0x138] sm:$0xff] (!%p152_p3)   ;;  %v2365_v24 = vld [vmem:[%s2849_s1 + $0x140] sm:$0xff] (!%p152_p3)  }
   0xc   : > { %2030 = vmatpush3.bf16.msra.mxu1 (!%p152_p3), %v2350_v2  ;;  %v2366_v29 = vld [vmem:[%s2849_s1 + $0x8] sm:$0xff] (!%p152_p3)   ;;  %v2368_v34 = vld [vmem:[%s2849_s1 + $0x10] sm:$0xff] (!%p152_p3)   ;;  %v2370_v43 = vld [vmem:[%s2849_s1 + $0x18] sm:$0xff] (!%p152_p3)  }
   0xd   : > { %2126 = vmatpush3.bf16.msra.mxu0 (!%p152_p3), %v2351_v3  ;;  %2031 = vmatprep.subr.bf16.mxu1 (!%p152_p3), %v2352_v4  ;;  %v2367_v30 = vld [vmem:[%s2849_s1 + $0x148] sm:$0xff] (!%p152_p3)   ;;  %v2369_v36 = vld [vmem:[%s2849_s1 + $0x150] sm:$0xff] (!%p152_p3)   ;;  %v2371_v44 = vld [vmem:[%s2849_s1 + $0x158] sm:$0xff] (!%p152_p3)  }
   0xe   : > { %s2857_s12 = smov (!%p179_p4, %s2434_s12), 3  ;;  %2127 = vmatprep.subr.bf16.mxu0 %v2353_v5  ;;  %v2372_v47 = vld [vmem:[%s2849_s1 + $0x20] sm:$0xff]   ;;  %v2374_v49 = vld [vmem:[%s2849_s1 + $0x28] sm:$0xff]   ;;  %v2376_v51 = vld [vmem:[%s2849_s1 + $0x30] sm:$0xff]  }
   0xf   : > { %s2323_s5 = smul.u32 160, %s2857_s12  ;;  %v2373_v48 = vld [vmem:[%s2849_s1 + $0x160] sm:$0xff]   ;;  %v2375_v50 = vld [vmem:[%s2849_s1 + $0x168] sm:$0xff]   ;;  %v2377_v52 = vld [vmem:[%s2849_s1 + $0x170] sm:$0xff]  }
  0x10   : > { %2032 = vmatpush3.bf16.msra.mxu1 %v2352_v4  ;;  %v2378_v53 = vld [vmem:[%s2849_s1 + $0x38] sm:$0xff]   ;;  %v2380_v57 = vld [vmem:[%s2849_s1 + $0x80] sm:$0xff]   ;;  %v2382_v0 = vld [vmem:[%s2849_s1 + $0x88] sm:$0xff]  }
  0x11   : > { %2128 = vmatpush3.bf16.msra.mxu0 %v2353_v5  ;;  %2033 = vmatprep.subr.bf16.mxu1 %v2354_v6  ;;  %s2518_s16 = scalar_lea.vmem %s2848_s0, %s2323_s5  ;;  %v2379_v54 = vld [vmem:[%s2849_s1 + $0x178] sm:$0xff]   ;;  %v2381_v59 = vld [vmem:[%s2849_s1 + $0x180] sm:$0xff]   ;;  %v2383_v4 = vld [vmem:[%s2849_s1 + $0x188] sm:$0xff]   ;;  %s1918_s5 = sshll.u32 %s2857_s12, 6 }
  0x12   : > { %2129 = vmatprep.subr.bf16.mxu0 %v2355_v7  ;;  %v226_v11 = vld [vmem:[%s2518_s16 + $0x1] sm:$0xff]  ;;  %v227_v12 = vld [vmem:[%s2518_s16 + $0x11] sm:$0xff]  ;;  %s192_s8 = scalar_lea.vmem %s2851_s3, %s1918_s5 }
  0x13   : > { %v234_v14 = vpack.c.bf16 %v227_v12, %v226_v11  ;;  %v1756_v15 = vld [vmem:[%s2518_s16 + $0x21] sm:$0xff]  ;;  %v229_v22 = vld [vmem:[%s2518_s16 + $0x31] sm:$0xff] }
  0x14   : > { %2034 = vmatpush3.bf16.msra.mxu1 %v2354_v6  ;;  %v792_v16 = vpack.c.bf16 %v1756_v15, %v227_v12  ;;  %v1758_v23 = vld [vmem:[%s2518_s16 + $0x41] sm:$0xff]  ;;  %v2549_v25 = vpack.c.bf16 %v229_v22, %v1756_v15  ;;  %v231_v26 = vld [vmem:[%s2518_s16 + $0x51] sm:$0xff] }
  0x15   : > { %2130 = vmatpush3.bf16.msra.mxu0 %v2355_v7  ;;  %2035 = vmatprep.subr.bf16.mxu1 %v2356_v8  ;;  %v793_v27 = vpack.c.bf16 %v1758_v23, %v229_v22  ;;  %v1760_v28 = vld [vmem:[%s2518_s16 + $0x61] sm:$0xff]  ;;  %v2559_v31 = vpack.c.bf16 %v231_v26, %v1758_v23  ;;  %v233_v33 = vld [vmem:[%s2518_s16 + $0x71] sm:$0xff] }
  0x16   : > { %2131 = vmatprep.subr.bf16.mxu0 %v2357_v9  ;;  %2043 = vmatprep.mubr.bf16.mxu1 %v234_v14  ;;  %v794_v32 = vpack.c.bf16 %v1760_v28, %v231_v26  ;;  %v2567_v35 = vld [vmem:[%s2518_s16 + $0x81] sm:$0xff]  ;;  %v2573_v37 = vpack.c.bf16 %v233_v33, %v1760_v28  ;;  %v2577_v39 = vld [vmem:[%s2518_s16 + $0x10] sm:$0xff]  ;;  %v2394_v26 = vld [vmem:[%s2849_s1 + $0xb8] sm:$0xff]  }
  0x17   : > { %2139 = vmatprep.mubr.bf16.mxu0 %v792_v16  ;;  %v198_v38 = vld [vmem:[%s2518_s16] sm:$0xff]  ;;  %v795_v40 = vpack.c.bf16 %v2567_v35, %v233_v33  ;;  %v2581_v41 = vld [vmem:[%s2518_s16 + $0x12] sm:$0xff]  ;;  %v2391_v22 = vld [vmem:[%s2849_s1 + $0x1a8] sm:$0xff]  }
  0x18   : > { %2036 = vmatpush3.bf16.msra.mxu1 %v2356_v8  ;;  %v2584_v42 = vld [vmem:[%s2518_s16 + $0x22] sm:$0xff]  ;;  %v206_v45 = vpack.c.bf16 %v2577_v39, %v198_v38  ;;  %v2624_v56 = vld [vmem:[%s2518_s16 + $0x30] sm:$0xff]  ;;  %v2386_v16 = vld [vmem:[%s2849_s1 + $0x98] sm:$0xff]  }
  0x19   : > { %2132 = vmatpush3.bf16.msra.mxu0 %v2357_v9  ;;  %2037 = vmatprep.subr.bf16.mxu1 %v2358_v10  ;;  %v942_v46 = vpack.c.bf16 %v2584_v42, %v2581_v41  ;;  %v2621_v55 = vld [vmem:[%s2518_s16 + $0x20] sm:$0xff]  ;;  %v2630_v58 = vld [vmem:[%s2518_s16 + $0x32] sm:$0xff]  ;;  %v2399_v33 = vld [vmem:[%s2849_s1 + $0x1c8] sm:$0xff]  }
  0x1a   : > { %2133 = vmatprep.subr.bf16.mxu0 %v2359_v13  ;;  %v2636_v60 = vld [vmem:[%s2518_s16 + $0x42] sm:$0xff]  ;;  %v2642_v62 = vld [vmem:[%s2518_s16 + $0x50] sm:$0xff]  ;;  %v207_v63 = vpack.c.bf16 %v2624_v56, %v2621_v55 }
  0x1b   : > { %v2639_v61 = vld [vmem:[%s2518_s16 + $0x40] sm:$0xff]  ;;  %v2650_v1 = vld [vmem:[%s2518_s16 + $0x52] sm:$0xff]  ;;  %v943_v2 = vpack.c.bf16 %v2636_v60, %v2630_v58 }
  0x1c   : > { %2038 = vmatpush3.bf16.msra.mxu1 %v2358_v10  ;;  %v2655_v3 = vld [vmem:[%s2518_s16 + $0x62] sm:$0xff]  ;;  %v2662_v5 = vpack.c.bf16 %v2642_v62, %v2639_v61  ;;  %v2384_v7 = vld [vmem:[%s2849_s1 + $0x90] sm:$0xff]  }
  0x1d   : > { %2134 = vmatpush3.bf16.msra.mxu0 %v2359_v13  ;;  %2039 = vmatprep.subr.bf16.mxu1 %v2360_v17  ;;  %v2665_v6 = vld [vmem:[%s2518_s16 + $0x60] sm:$0xff]  ;;  %v944_v8 = vpack.c.bf16 %v2655_v3, %v2650_v1  ;;  %v2673_v9 = vld [vmem:[%s2518_s16 + $0x70] sm:$0xff] }
  0x1e   : > { %2135 = vmatprep.subr.bf16.mxu0 %v2361_v18  ;;  %v2676_v10 = vld [vmem:[%s2518_s16 + $0x72] sm:$0xff]  ;;  %v2679_v11 = vld [vmem:[%s2518_s16 + $0x82] sm:$0xff]  ;;  %v209_v13 = vpack.c.bf16 %v2673_v9, %v2665_v6 }
  0x1f   : > { %v2385_v12 = vld [vmem:[%s2849_s1 + $0x190] sm:$0xff]   ;;  %v481_v14 = vld [vmem:[%s2518_s16 + $0x2] sm:$0xff]  ;;  %v945_v15 = vpack.c.bf16 %v2679_v11, %v2676_v10 }
  0x20   : > { %2040 = vmatpush3.bf16.msra.mxu1 %v2360_v17  ;;  %v2387_v17 = vld [vmem:[%s2849_s1 + $0x198] sm:$0xff]   ;;  %v2392_v23 = vld [vmem:[%s2849_s1 + $0xb0] sm:$0xff]   ;;  %v2396_v28 = vld [vmem:[%s2849_s1 + $0xc0] sm:$0xff]  }
  0x21   : > { %2136 = vmatpush3.bf16.msra.mxu0 %v2361_v18  ;;  %2041 = vmatprep.subr.bf16.mxu1 %v2362_v19  ;;  %v489_v18 = vpack.c.bf16 %v2581_v41, %v481_v14  ;;  %v2747_v38 = vld [vmem:[%s2518_s16 + $0x80] sm:$0xff]  ;;  %v2401_v41 = vld [vmem:[%s2849_s1 + $0x1d0] sm:$0xff]  }
  0x22   : > { %2137 = vmatprep.subr.bf16.mxu0 %v2363_v20 }
  0x24   : > { %2042 = vmatpush3.bf16.msra.mxu1 %v2362_v19  ;;  %v2388_v19 = vld [vmem:[%s2849_s1 + $0xa0] sm:$0xff]  }
  0x25   : > { %2138 = vmatpush3.bf16.msra.mxu0 %v2363_v20  ;;  %2051 = vmatprep.subr.bf16.mxu1 %v2364_v21  ;;  %v2389_v20 = vld [vmem:[%s2849_s1 + $0x1a0] sm:$0xff]  }
  0x26   : > { %2147 = vmatprep.subr.bf16.mxu0 %v2365_v24 }
  0x27   : > { %2044 = vmatmul.mubr.bf16.vlgmr.msra.gmra.mrb[0].mxu1 %v2549_v25 }
  0x28   : > { %2052 = vmatpush3.bf16.msra.mxu1 %v2364_v21  ;;  %2140 = vmatmul.mubr.bf16.vlgmr.msra.gmra.mrb[0].mxu0 %v793_v27  ;;  %v2390_v21 = vld [vmem:[%s2849_s1 + $0xa8] sm:$0xff]   ;;  %v2395_v27 = vld [vmem:[%s2849_s1 + $0x1b8] sm:$0xff]  }
  0x29   : > { %2148 = vmatpush3.bf16.msra.mxu0 %v2365_v24  ;;  %2053 = vmatprep.subr.bf16.mxu1 %v2366_v29  ;;  %v2393_v24 = vld [vmem:[%s2849_s1 + $0x1b0] sm:$0xff]  }
  0x2a   : > { %2149 = vmatprep.subr.bf16.mxu0 %v2367_v30  ;;  %2047 = vmatprep.mubr.bf16.mxu1 %v2559_v31 }
  0x2b   : > { %2143 = vmatprep.mubr.bf16.mxu0 %v794_v32  ;;  %v2398_v32 = vld [vmem:[%s2849_s1 + $0xc8] sm:$0xff]  }
  0x2c   : > { %2054 = vmatpush3.bf16.msra.mxu1 %v2366_v29  ;;  %v2397_v29 = vld [vmem:[%s2849_s1 + $0x1c0] sm:$0xff]  }
  0x2d   : > { %2150 = vmatpush3.bf16.msra.mxu0 %v2367_v30  ;;  %2055 = vmatprep.subr.bf16.mxu1 %v2368_v34  ;;  %v2729_v30 = vpack.c.bf16 %v2630_v58, %v2584_v42  ;;  %v2756_v42 = vpack.c.bf16 %v2676_v10, %v2655_v3  ;;  %v1858_v58 = vld [vmem:[%s2518_s16 + $0x91] sm:$0xff] }
  0x2e   : > { %2151 = vmatprep.subr.bf16.mxu0 %v2369_v36 }
  0x2f   : > { %2048 = vmatmul.mubr.bf16.gmra.mrb[4].mxu1 %v2573_v37 }
  0x30   : > { %2056 = vmatpush3.bf16.msra.mxu1 %v2368_v34  ;;  %2144 = vmatmul.mubr.bf16.gmra.mrb[4].mxu0 %v795_v40  ;;  %v2739_v34 = vpack.c.bf16 %v2650_v1, %v2636_v60  ;;  %v1826_v40 = vld [vmem:[%s2518_s16 + $0x90] sm:$0xff]  ;;  %v1248_v60 = vpack.c.bf16 %v1858_v58, %v2567_v35  ;;  %v2417_v35 = vld [vmem:[%s2849_s1 + $0x228] sm:$0xff]  }
  0x31   : > { %2152 = vmatpush3.bf16.msra.mxu0 %v2369_v36  ;;  %2057 = vmatprep.subr.bf16.mxu1 %v2370_v43  ;;  %v2400_v36 = vld [vmem:[%s2849_s1 + $0xd0] sm:$0xff]  }
  0x32   : > { %2153 = vmatprep.subr.bf16.mxu0 %v2371_v44  ;;  %2067 = vmatprep.mubr.bf16.mxu1 %v206_v45  ;;  %v2403_v45 = vld [vmem:[%s2849_s1 + $0x1d8] sm:$0xff]  }
  0x33   : > { %2163 = vmatprep.mubr.bf16.mxu0 %v942_v46  ;;  %v642_v46 = vpack.c.bf16 %v2621_v55, %v2577_v39  ;;  %v2406_v39 = vld [vmem:[%s2849_s1 + $0xe8] sm:$0xff]  }
  0x34   : > { %2058 = vmatpush3.bf16.msra.mxu1 %v2370_v43  ;;  %v1098_v43 = vpack.c.bf16 %v1826_v40, %v2747_v38  ;;  %v2413_v55 = vld [vmem:[%s2849_s1 + $0x208] sm:$0xff]  }
  0x35   : > { %2154 = vmatpush3.bf16.msra.mxu0 %v2371_v44  ;;  %2059 = vmatprep.subr.bf16.mxu1 %v2372_v47  ;;  %v2402_v44 = vld [vmem:[%s2849_s1 + $0xd8] sm:$0xff]  }
  0x36   : > { %2155 = vmatprep.subr.bf16.mxu0 %v2373_v48 }
  0x38   : > { %2060 = vmatpush3.bf16.msra.mxu1 %v2372_v47  ;;  %v2404_v47 = vld [vmem:[%s2849_s1 + $0xe0] sm:$0xff]  }
  0x39   : > { %2156 = vmatpush3.bf16.msra.mxu0 %v2373_v48  ;;  %2061 = vmatprep.subr.bf16.mxu1 %v2374_v49  ;;  %v2405_v48 = vld [vmem:[%s2849_s1 + $0x1e0] sm:$0xff]  }
  0x3a   : > { %2157 = vmatprep.subr.bf16.mxu0 %v2375_v50 }
  0x3c   : > { %2062 = vmatpush3.bf16.msra.mxu1 %v2374_v49  ;;  %v2407_v49 = vld [vmem:[%s2849_s1 + $0x1e8] sm:$0xff]  }
  0x3d   : > { %2158 = vmatpush3.bf16.msra.mxu0 %v2375_v50  ;;  %2063 = vmatprep.subr.bf16.mxu1 %v2376_v51  ;;  %v2408_v50 = vld [vmem:[%s2849_s1 + $0xf0] sm:$0xff]  }
  0x3e   : > { %2159 = vmatprep.subr.bf16.mxu0 %v2377_v52 }
  0x40   : > { %2064 = vmatpush3.bf16.msra.mxu1 %v2376_v51  ;;  %v2410_v51 = vld [vmem:[%s2849_s1 + $0xf8] sm:$0xff]  }
  0x41   : > { %2160 = vmatpush3.bf16.msra.mxu0 %v2377_v52  ;;  %2065 = vmatprep.subr.bf16.mxu1 %v2378_v53  ;;  %v2411_v52 = vld [vmem:[%s2849_s1 + $0x1f8] sm:$0xff]  }
  0x42   : > { %2161 = vmatprep.subr.bf16.mxu0 %v2379_v54 }
  0x44   : > { %2066 = vmatpush3.bf16.msra.mxu1 %v2378_v53  ;;  %v2412_v53 = vld [vmem:[%s2849_s1 + $0x200] sm:$0xff]  }
  0x45   : > { %2162 = vmatpush3.bf16.msra.mxu0 %v2379_v54  ;;  %2075 = vmatprep.subr.bf16.mxu1 %v2380_v57  ;;  %v643_v54 = vpack.c.bf16 %v2639_v61, %v2624_v56  ;;  %v2414_v56 = vld [vmem:[%s2849_s1 + $0x210] sm:$0xff]  }
  0x46   : > { %2171 = vmatprep.subr.bf16.mxu0 %v2381_v59  ;;  %v2418_v61 = vld [vmem:[%s2849_s1 + $0x230] sm:$0xff]  }
  0x47   : > { %2068 = vmatmul.mubr.bf16.vlgmr.msra.gmra.mrb[0].mxu1 %v207_v63 }
  0x48   : > { %2076 = vmatpush3.bf16.msra.mxu1 %v2380_v57  ;;  %2164 = vmatmul.mubr.bf16.vlgmr.msra.gmra.mrb[0].mxu0 %v943_v2  ;;  %v644_v57 = vpack.c.bf16 %v2665_v6, %v2642_v62  ;;  %v2419_v62 = vld [vmem:[%s2849_s1 + $0x238] sm:$0xff]  }
  0x49   : > { %2172 = vmatpush3.bf16.msra.mxu0 %v2381_v59  ;;  %2077 = vmatprep.subr.bf16.mxu1 %v2382_v0  ;;  %v645_v59 = vpack.c.bf16 %v2747_v38, %v2673_v9 }
  0x4a   : > { %2173 = vmatprep.subr.bf16.mxu0 %v2383_v4  ;;  %2071 = vmatprep.mubr.bf16.mxu1 %v2662_v5 }
  0x4b   : > { %2167 = vmatprep.mubr.bf16.mxu0 %v944_v8 }
  0x4c   : > { %2078 = vmatpush3.bf16.msra.mxu1 %v2382_v0 }
  0x4d   : > { %2174 = vmatpush3.bf16.msra.mxu0 %v2383_v4  ;;  %2079 = vmatprep.subr.bf16.mxu1 %v2384_v7 }
  0x4e   : > { %2175 = vmatprep.subr.bf16.mxu0 %v2385_v12 }
  0x4f   : > { %2072 = vmatmul.mubr.bf16.gmra.mrb[4].mxu1 %v209_v13 }
  0x50   : > { %2080 = vmatpush3.bf16.msra.mxu1 %v2384_v7  ;;  %2168 = vmatmul.mubr.bf16.gmra.mrb[4].mxu0 %v945_v15 }
  0x51   : > { %2176 = vmatpush3.bf16.msra.mxu0 %v2385_v12  ;;  %2081 = vmatprep.subr.bf16.mxu1 %v2386_v16 }
  0x52   : > { %2177 = vmatprep.subr.bf16.mxu0 %v2387_v17  ;;  %2091 = vmatprep.mubr.bf16.mxu1 %v489_v18 }
  0x53   : > { %2187 = vmatprep.mubr.bf16.mxu0 %v207_v63  ;;  %v1890_v63 = vld [vmem:[%s2518_s16 + $0x92] sm:$0xff] }
  0x54   : > { %2082 = vmatpush3.bf16.msra.mxu1 %v2386_v16  ;;  %v1398_v0 = vpack.c.bf16 %v1890_v63, %v2679_v11 }
  0x55   : > { %2178 = vmatpush3.bf16.msra.mxu0 %v2387_v17  ;;  %2083 = vmatprep.subr.bf16.mxu1 %v2388_v19  ;;  %v1915_v17 = vld [vmem:[%s2850_s2] ss:$0 sm:$0xff] }
  0x56   : > { %2179 = vmatprep.subr.bf16.mxu0 %v2389_v20 }
  0x58   : > { %2084 = vmatpush3.bf16.msra.mxu1 %v2388_v19 }
  0x59   : > { %2180 = vmatpush3.bf16.msra.mxu0 %v2389_v20  ;;  %2085 = vmatprep.subr.bf16.mxu1 %v2390_v21 }
  0x5a   : > { %2181 = vmatprep.subr.bf16.mxu0 %v2391_v22 }
  0x5c   : > { %2086 = vmatpush3.bf16.msra.mxu1 %v2390_v21 }
  0x5d   : > { %2182 = vmatpush3.bf16.msra.mxu0 %v2391_v22  ;;  %2087 = vmatprep.subr.bf16.mxu1 %v2392_v23 }
  0x5e   : > { %2183 = vmatprep.subr.bf16.mxu0 %v2393_v24 }
  0x60   : > { %2088 = vmatpush3.bf16.msra.mxu1 %v2392_v23 }
  0x61   : > { %2184 = vmatpush3.bf16.msra.mxu0 %v2393_v24  ;;  %2089 = vmatprep.subr.bf16.mxu1 %v2394_v26 }
  0x62   : > { %2185 = vmatprep.subr.bf16.mxu0 %v2395_v27 }
  0x64   : > { %2090 = vmatpush3.bf16.msra.mxu1 %v2394_v26 }
  0x65   : > { %2186 = vmatpush3.bf16.msra.mxu0 %v2395_v27  ;;  %2099 = vmatprep.subr.bf16.mxu1 %v2396_v28 }
  0x66   : > { %2195 = vmatprep.subr.bf16.mxu0 %v2397_v29 }
  0x67   : > { %2092 = vmatmul.mubr.bf16.vlgmr.msra.gmra.mrb[0].mxu1 %v2729_v30 }
  0x68   : > { %2100 = vmatpush3.bf16.msra.mxu1 %v2396_v28  ;;  %2188 = vmatmul.mubr.bf16.vlgmr.msra.gmra.mrb[0].mxu0 %v2662_v5 }
  0x69   : > { %2196 = vmatpush3.bf16.msra.mxu0 %v2397_v29  ;;  %2101 = vmatprep.subr.bf16.mxu1 %v2398_v32 }
  0x6a   : > { %2197 = vmatprep.subr.bf16.mxu0 %v2399_v33  ;;  %2095 = vmatprep.mubr.bf16.mxu1 %v2739_v34 }
  0x6b   : > { %2191 = vmatprep.mubr.bf16.mxu0 %v209_v13 }
  0x6c   : > { %2102 = vmatpush3.bf16.msra.mxu1 %v2398_v32 }
  0x6d   : > { %2198 = vmatpush3.bf16.msra.mxu0 %v2399_v33  ;;  %2103 = vmatprep.subr.bf16.mxu1 %v2400_v36 }
  0x6e   : > { %2199 = vmatprep.subr.bf16.mxu0 %v2401_v41 }
  0x6f   : > { %2096 = vmatmul.mubr.bf16.gmra.mrb[4].mxu1 %v2756_v42 }
  0x70   : > { %2104 = vmatpush3.bf16.msra.mxu1 %v2400_v36  ;;  %2192 = vmatmul.mubr.bf16.gmra.mrb[4].mxu0 %v1098_v43 }
  0x71   : > { %2200 = vmatpush3.bf16.msra.mxu0 %v2401_v41  ;;  %2105 = vmatprep.subr.bf16.mxu1 %v2402_v44 }
  0x72   : > { %2201 = vmatprep.subr.bf16.mxu0 %v2403_v45  ;;  %2115 = vmatprep.mubr.bf16.mxu1 %v642_v46 }
  0x73   : > { %2211 = vmatprep.mubr.bf16.mxu0 %v2549_v25  ;;  %v2409_v25 = vld [vmem:[%s2849_s1 + $0x1f0] sm:$0xff]  }
  0x74   : > { %2106 = vmatpush3.bf16.msra.mxu1 %v2402_v44 }
  0x75   : > { %2202 = vmatpush3.bf16.msra.mxu0 %v2403_v45  ;;  %2107 = vmatprep.subr.bf16.mxu1 %v2404_v47 }
  0x76   : > { %2203 = vmatprep.subr.bf16.mxu0 %v2405_v48 }
  0x78   : > { %2108 = vmatpush3.bf16.msra.mxu1 %v2404_v47 }
  0x79   : > { %2204 = vmatpush3.bf16.msra.mxu0 %v2405_v48  ;;  %2109 = vmatprep.subr.bf16.mxu1 %v2406_v39 }
  0x7a   : > { %2205 = vmatprep.subr.bf16.mxu0 %v2407_v49 }
  0x7c   : > { %2110 = vmatpush3.bf16.msra.mxu1 %v2406_v39 }
  0x7d   : > { %2206 = vmatpush3.bf16.msra.mxu0 %v2407_v49  ;;  %2111 = vmatprep.subr.bf16.mxu1 %v2408_v50 }
  0x7e   : > { %2207 = vmatprep.subr.bf16.mxu0 %v2409_v25 }
  0x80   : > { %2112 = vmatpush3.bf16.msra.mxu1 %v2408_v50 }
  0x81   : > { %2208 = vmatpush3.bf16.msra.mxu0 %v2409_v25  ;;  %2113 = vmatprep.subr.bf16.mxu1 %v2410_v51 }
  0x82   : > { %2209 = vmatprep.subr.bf16.mxu0 %v2411_v52 }
  0x84   : > { %2114 = vmatpush3.bf16.msra.mxu1 %v2410_v51 }
  0x85   : > { %2210 = vmatpush3.bf16.msra.mxu0 %v2411_v52  ;;  %2243 = vmatprep.subr.bf16.mxu1 %v2412_v53 }
  0x86   : > { %2219 = vmatprep.subr.bf16.mxu0 %v2412_v53 }
  0x87   : > { %2116 = vmatmul.mubr.bf16.vlgmr.msra.gmra.mrb[0].mxu1 %v643_v54 }
  0x88   : > { %2212 = vmatmul.mubr.bf16.vlgmr.msra.gmra.mrb[0].mxu0 %v2559_v31  ;;  %2251 = vmatpush3.bf16.msra.mxu1 %v2412_v53  ;;  %v2415_v31 = vld [vmem:[%s2849_s1 + $0x218] sm:$0xff]  }
  0x89   : > { %2220 = vmatpush3.bf16.msra.mxu0 %v2412_v53  ;;  %2244 = vmatprep.subr.bf16.mxu1 %v2413_v55 }
  0x8a   : > { %2221 = vmatprep.subr.bf16.mxu0 %v2413_v55  ;;  %2119 = vmatprep.mubr.bf16.mxu1 %v644_v57 }
  0x8b   : > { %2215 = vmatprep.mubr.bf16.mxu0 %v2573_v37  ;;  %v2416_v37 = vld [vmem:[%s2849_s1 + $0x220] sm:$0xff]  }
  0x8c   : > { %2252 = vmatpush3.bf16.msra.mxu1 %v2413_v55 }
  0x8d   : > { %2222 = vmatpush3.bf16.msra.mxu0 %v2413_v55  ;;  %2245 = vmatprep.subr.bf16.mxu1 %v2414_v56 }
  0x8e   : > { %2223 = vmatprep.subr.bf16.mxu0 %v2414_v56 }
  0x8f   : > { %2120 = vmatmul.mubr.bf16.gmra.mrb[4].mxu1 %v645_v59 }
  0x90   : > { %2216 = vmatmul.mubr.bf16.gmra.mrb[4].mxu0 %v1248_v60  ;;  %2253 = vmatpush3.bf16.msra.mxu1 %v2414_v56 }
  0x91   : > { %2224 = vmatpush3.bf16.msra.mxu0 %v2414_v56  ;;  %2246 = vmatprep.subr.bf16.mxu1 %v2415_v31 }
  0x92   : > { %2225 = vmatprep.subr.bf16.mxu0 %v2415_v31  ;;  %2235 = vmatprep.mubr.bf16.mxu0 %v2729_v30 }
  0x93   : > { %2239 = vmatprep.mubr.bf16.mxu1 %v2756_v42 }
  0x94   : > { %2254 = vmatpush3.bf16.msra.mxu1 %v2415_v31 }
  0x95   : > { %2226 = vmatpush3.bf16.msra.mxu0 %v2415_v31  ;;  %2247 = vmatprep.subr.bf16.mxu1 %v2416_v37 }
  0x96   : > { %2227 = vmatprep.subr.bf16.mxu0 %v2416_v37 }
  0x98   : > { %2255 = vmatpush3.bf16.msra.mxu1 %v2416_v37 }
  0x99   : > { %2228 = vmatpush3.bf16.msra.mxu0 %v2416_v37  ;;  %2248 = vmatprep.subr.bf16.mxu1 %v2417_v35 }
  0x9a   : > { %2229 = vmatprep.subr.bf16.mxu0 %v2417_v35 }
  0x9c   : > { %2256 = vmatpush3.bf16.msra.mxu1 %v2417_v35 }
  0x9d   : > { %2230 = vmatpush3.bf16.msra.mxu0 %v2417_v35  ;;  %2249 = vmatprep.subr.bf16.mxu1 %v2418_v61 }
  0x9e   : > { %2231 = vmatprep.subr.bf16.mxu0 %v2418_v61 }
  0xa0   : > { %2257 = vmatpush3.bf16.msra.mxu1 %v2418_v61 }
  0xa1   : > { %2232 = vmatpush3.bf16.msra.mxu0 %v2418_v61  ;;  %2250 = vmatprep.subr.bf16.mxu1 %v2419_v62 }
  0xa2   : > { %2233 = vmatprep.subr.bf16.mxu0 %v2419_v62 }
  0xa4   : > { %2258 = vmatpush3.bf16.msra.mxu1 %v2419_v62 }
  0xa5   : > { %2234 = vmatpush3.bf16.msra.mxu0 %v2419_v62 }
  0xa7   : > { %2240 = vmatmul.mubr.bf16.vlgmr.msra.gmra.mrb[8].mxu1 %v1398_v0 }
  0xa8   : > { %2236 = vmatmul.mubr.bf16.vlgmr.msra.gmra.mrb[0].mxu0 %v2739_v34 }
 0x15a   : > { %v2117_v1 = vpop.f32.mrb[0].mxu1 }
 0x15b   : > { %v745_v2 = vpop.f32.mrb[1].mxu1 }
 0x15c   : > { %v2118_v3 = vpop.f32.mrb[2].mxu1 }
 0x15d   : > { %v748_v4 = vpop.f32.mrb[3].mxu1 }
 0x162   : > { %v2121_v5 = vpop.f32.mrb[4].mxu1 }
 0x163   : > { %v2217_v6 = vpop.f32.mrb[4].mxu0  ;;  %v761_v7 = vpop.f32.mrb[5].mxu1 }
 0x164   : > { %v2263_v8 = vadd.f32 %v2217_v6, %v2121_v5  ;;  %v1364_v9 = vpop.f32.mrb[5].mxu0  ;;  %v2122_v10 = vpop.f32.mrb[6].mxu1 }
 0x165   : > { %v2265_v12 = vadd.f32 %v1364_v9, %v761_v7  ;;  %v2218_v13 = vpop.f32.mrb[6].mxu0  ;;  %v764_v14 = vpop.f32.mrb[7].mxu1 }
 0x166   : > { %v2267_v11 = vadd.f32 %v2218_v13, %v2122_v10  ;;  %v1367_v15 = vpop.f32.mrb[7].mxu0 }
 0x167   : > { %v2269_v16 = vadd.f32 %v1367_v15, %v764_v14 }
 0x17a   : > { %v2241_v18 = vpop.f32.mrb[8].mxu1 }
 0x17b   : > { %v2237_v19 = vpop.f32.mrb[0].mxu0  ;;  %v2264_v20 = vadd.f32 %v2263_v8, %v2241_v18  ;;  %v1514_v21 = vpop.f32.mrb[9].mxu1 }
 0x17c   : > { %v2259_v22 = vadd.f32 %v2237_v19, %v2117_v1  ;;  %v1498_v23 = vpop.f32.mrb[1].mxu0  ;;  %v2266_v24 = vadd.f32 %v2265_v12, %v1514_v21  ;;  %v2242_v26 = vpop.f32.mrb[10].mxu1 }
 0x17d   : > { %v1550_v27 = vadd.f32 %v2264_v20, %v1915_v17  ;;  %v2260_v28 = vadd.f32 %v1498_v23, %v745_v2  ;;  %v2238_v29 = vpop.f32.mrb[2].mxu0  ;;  %v2268_v30 = vadd.f32 %v2267_v11, %v2242_v26  ;;  %v1517_v32 = vpop.f32.mrb[11].mxu1 }
 0x17e   : > { %v1546_v33 = vadd.f32 %v2259_v22, %v1915_v17  ;;  %v1548_v34 = vadd.f32 %v2266_v24, %v1915_v17  ;;  %v2261_v36 = vadd.f32 %v2238_v29, %v2118_v3  ;;  %v1501_v38 = vpop.f32.mrb[3].mxu0  ;;  %v2270_v40 = vadd.f32 %v2269_v16, %v1517_v32 }
 0x17f   : > { %v1558_v41 = vmax.f32 %v1550_v27, 0.0  ;;  %v1544_v42 = vadd.f32 %v2260_v28, %v1915_v17  ;;  %v1551_v43 = vadd.f32 %v2268_v30, %v1915_v17  ;;  %v2262_v44 = vadd.f32 %v1501_v38, %v748_v4 }
 0x180   : > { %v1554_v45 = vmax.f32 %v1546_v33, 0.0  ;;  %v1556_v46 = vmax.f32 %v1548_v34, 0.0  ;;  %v1547_v47 = vadd.f32 %v2261_v36, %v1915_v17  ;;  %v1549_v48 = vadd.f32 %v2270_v40, %v1915_v17 }
 0x181   : > { %1566 = vst [vmem:[%s192_s8 + $0x30] sm:$0xff] %v1558_v41  ;;  %v1552_v39 = vmax.f32 %v1544_v42, 0.0  ;;  %v1559_v49 = vmax.f32 %v1551_v43, 0.0  ;;  %v1545_v50 = vadd.f32 %v2262_v44, %v1915_v17 }
 0x182   : > { %1562 = vst [vmem:[%s192_s8 + $0x10] sm:$0xff] %v1554_v45  ;;  %1564 = vst [vmem:[%s192_s8 + $0x20] sm:$0xff] %v1556_v46  ;;  %v1555_v25 = vmax.f32 %v1547_v47, 0.0  ;;  %v1557_v51 = vmax.f32 %v1549_v48, 0.0 }
 0x183   : > { %1560 = vst [vmem:[%s192_s8] sm:$0xff] %v1552_v39  ;;  %1567 = vst [vmem:[%s192_s8 + $0x38] sm:$0xff] %v1559_v49  ;;  %v1553_v52 = vmax.f32 %v1545_v50, 0.0 }
 0x184   : > { %1563 = vst [vmem:[%s192_s8 + $0x18] sm:$0xff] %v1555_v25  ;;  %1565 = vst [vmem:[%s192_s8 + $0x28] sm:$0xff] %v1557_v51 }
 0x185   : > { %1561 = vst [vmem:[%s192_s8 + $0x8] sm:$0xff] %v1553_v52 }
 0x186 PF: > { %s13_s14 = sadd.s32 1, %s2442_s14   ;;  %s2852_s12 = smov %s2438_s13 }
 0x187   : > { %p10_p5 = scmp.ge.s32.totalorder %s13_s14, 6   ;;  %s2853_s13 = smov %s2855_s15 }
 0x189   :  { %12 = sbr.rel (!%p10_p5) target bundleno = 2 (0x2), region = 73 }

</bundles_post_ra>
